<compile_context>
chip_gen: v7x
topology: tpu7x:2x2x1
jax: 0.10.0
libtpu: 0.0.40
codegen_flags: <defaults>
</compile_context>

<pallas_src>
import functools
import math

import jax
import jax.numpy as jnp
from jax.experimental import pallas as pl
from jax.experimental.pallas import tpu as pltpu


# ----------------------------------------------------------------------------
# Fused decoder kernel (one batch element per grid step)
# ----------------------------------------------------------------------------
def _decoder_kernel(
    x_ref, f_ref, mask_ref,
    w_in_ref, b_in_ref, w_out_ref, b_out_ref,
    wff_ref, bff_ref, wqk_ref, bqk_ref, wv_ref, bv_ref,
    wo_ref, bo_ref, w1_ref, b1_ref,
    out_ref, feat_ref,
    *, alpha, l_valid, tq,
):
    bf16 = jnp.bfloat16
    x = x_ref[0].astype(bf16)           # (Din, Lp)   decoder input
    f = f_ref[0]                        # (C,   Lp)   encoder features (bf16)
    pm = mask_ref[0]                    # (1,   Lp)   padding mask row (f32)

    nl = wff_ref.shape[0]
    c = w1_ref.shape[1]                 # num_f_maps
    cq = wqk_ref.shape[1] // 2          # query/key channels
    cv = wo_ref.shape[2]                # value channels
    lp = pm.shape[-1]                   # lane-padded length
    nt = lp // tq                       # number of query tiles

    # Column index / "true length" mask (1 for columns < original L).
    col = jax.lax.broadcasted_iota(jnp.int32, (1, lp), 1)
    valid = (col < l_valid).astype(jnp.float32)

    # Softmax key-bias, computed once and reused by every layer:
    #   within the true length: log(mask + 1e-6)  (exactly like the reference)
    #   lane padding columns : -1e30 -> contribute exactly 0 to the softmax.
    key_bias = jnp.where(valid > 0.0, jnp.log(pm + 1e-6), -1e30)

    # Input 1x1 conv (bf16 MXU, f32 accumulate).  Lane padding zeroed.
    feat = (jnp.dot(w_in_ref[...], x, preferred_element_type=jnp.float32)
            + b_in_ref[...]) * valid

    # Layer-invariant V projections hoisted: one (NL*Cv, C) x (C, Lp) matmul.
    # The post-softmax key mask is folded into V here (identical math, costs
    # Cv*Lp instead of Lp^2 multiplies per layer).
    v_all = ((jnp.dot(wv_ref[...], f, preferred_element_type=jnp.float32)
              + bv_ref[...]) * pm).astype(bf16)               # (NL*Cv, Lp)

    inv_n = 1.0 / float(l_valid)

    for li in range(nl):                                      # unrolled loop
        d = 2 ** li

        # --- ConvFeedForward (k=3, dilation d) via roll-commutation ---------
        # ystack = [w0; w1; w2] @ feat, then roll the *outputs*; wrap-around
        # columns are zeroed with iota masks (== PyTorch zero padding).
        ystack = jnp.dot(wff_ref[li], feat.astype(bf16),
                         preferred_element_type=jnp.float32)   # (3C, Lp)
        left = (pltpu.roll(ystack[0:c], d, axis=1)
                * (col >= d).astype(jnp.float32))
        right = (pltpu.roll(ystack[2 * c:3 * c], lp - d, axis=1)
                 * (col < lp - d).astype(jnp.float32))
        ff = jnp.maximum(left + ystack[c:2 * c] + right + bff_ref[li], 0.0)

        # --- InstanceNorm1d (eps=1e-5, biased var, f32 stats over true L) ---
        ffv = ff * valid
        mean = jnp.sum(ffv, axis=1, keepdims=True) * inv_n
        ex2 = jnp.sum(ffv * ff, axis=1, keepdims=True) * inv_n
        var = jnp.maximum(ex2 - mean * mean, 0.0)
        xn = (ff - mean) * jax.lax.rsqrt(var + 1e-5)

        # --- Fused Q|K projection (1/sqrt(Cq) folded into Q weights) --------
        qk = (jnp.dot(wqk_ref[li], xn.astype(bf16),
                      preferred_element_type=jnp.float32) + bqk_ref[li])
        q = qk[0:cq].astype(bf16)                              # (Cq, Lp)
        k = qk[cq:2 * cq].astype(bf16)                         # (Cq, Lp)
        v = v_all[li * cv:(li + 1) * cv]                       # (Cv, Lp) bf16

        # --- Query-tiled attention: footprint tq x Lp, exact softmax --------
        o_tiles = []
        for ti in range(nt):
            q_t = q[:, ti * tq:(ti + 1) * tq]                  # (Cq, tq)
            e = jax.lax.dot_general(q_t, k, (((0,), (0,)), ((), ())),
                                    preferred_element_type=jnp.float32)
            e = e + key_bias                                   # (tq, Lp)
            p = jnp.exp(e - jnp.max(e, axis=-1, keepdims=True))
            p = p * pl.reciprocal(jnp.sum(p, axis=-1, keepdims=True),
                                  approx=True)
            o_tiles.append(jax.lax.dot_general(
                v, p.astype(bf16), (((1,), (1,)), ((), ())),
                preferred_element_type=jnp.float32))           # (Cv, tq)
        out_att = o_tiles[0] if nt == 1 else jnp.concatenate(o_tiles, axis=1)

        att_out = (jnp.dot(wo_ref[li],
                           jnp.maximum(out_att, 0.0).astype(bf16),
                           preferred_element_type=jnp.float32)
                   + bo_ref[li]) * pm

        # --- residual / 1x1 conv / mask (dropout = identity) ----------------
        h = alpha * att_out + ff
        h = jnp.dot(w1_ref[li], h.astype(bf16),
                    preferred_element_type=jnp.float32) + b1_ref[li]
        feat = (feat + h) * pm

    feat_ref[0] = feat.astype(feat_ref.dtype)
    logits = (jnp.dot(w_out_ref[...], feat.astype(bf16),
                      preferred_element_type=jnp.float32) + b_out_ref[...])
    out_ref[0] = (logits * pm).astype(out_ref.dtype)


def _full_spec(a):
    nd = a.ndim
    return pl.BlockSpec(a.shape, lambda i, nd=nd: (0,) * nd)


# ----------------------------------------------------------------------------
# Wrapper: pad, pack / pre-scale weights (bf16), one pallas_call
# ----------------------------------------------------------------------------
def _pack_layer_params(layers):
    bf16 = jnp.bfloat16
    wff, bff, wqk, bqk, wv, bv, wo, bo, w1, b1 = ([] for _ in range(10))
    for (wf0, wf1, wf2, bf, wq, bq, wk, bk, wvv, bvv, woo, boo, w11, b11) in layers:
        s = 1.0 / math.sqrt(wq.shape[0])           # fold 1/sqrt(Cq) into Q
        wff.append(jnp.concatenate([wf0, wf1, wf2], axis=0))   # (3C, C)
        bff.append(bf)
        wqk.append(jnp.concatenate([wq * s, wk], axis=0))      # (2Cq, C)
        bqk.append(jnp.concatenate([bq * s, bk], axis=0))
        wv.append(wvv)
        bv.append(bvv)
        wo.append(woo)
        bo.append(boo)
        w1.append(w11)
        b1.append(b11)
    return dict(
        wff=jnp.stack(wff).astype(bf16), bff=jnp.stack(bff),
        wqk=jnp.stack(wqk).astype(bf16), bqk=jnp.stack(bqk),
        wv_all=jnp.concatenate(wv, axis=0).astype(bf16),        # (NL*Cv, C)
        bv_all=jnp.concatenate(bv, axis=0),                     # (NL*Cv, 1)
        wo=jnp.stack(wo).astype(bf16), bo=jnp.stack(bo),
        w1=jnp.stack(w1).astype(bf16), b1=jnp.stack(b1),
    )


@functools.partial(jax.jit, static_argnames=("alpha",))
def decoder_forward(x, fencoder, mask, params, *, alpha):
    # x: (B, input_dim, L), fencoder: (B, num_f_maps, L), mask: (B, 1, L)
    B, Din, L = x.shape
    C = params["w_in"].shape[0]
    num_classes = params["w_out"].shape[0]
    NL = len(params["layers"])
    Cq = params["layers"][0][4].shape[0]
    Cv = params["layers"][0][8].shape[0]

    # Pad the sequence axis to a multiple of 128 (lane-dense vregs / MXU N).
    Lp = ((L + 127) // 128) * 128
    pad = Lp - L
    if pad:
        x = jnp.pad(x, ((0, 0), (0, 0), (0, pad)))
        fencoder = jnp.pad(fencoder, ((0, 0), (0, 0), (0, pad)))
        mask = jnp.pad(mask, ((0, 0), (0, 0), (0, pad)))

    # Pad num_classes to a full sublane (8) -> unmasked stores for the logits.
    ncls_p = ((num_classes + 7) // 8) * 8
    w_out = params["w_out"]
    b_out = params["b_out"]
    if ncls_p != num_classes:
        w_out = jnp.pad(w_out, ((0, ncls_p - num_classes), (0, 0)))
        b_out = jnp.pad(b_out, ((0, ncls_p - num_classes), (0, 0)))

    packed = _pack_layer_params(params["layers"])

    # Query tile size: largest of 512/256/128 dividing Lp.
    tq = 512 if Lp % 512 == 0 else (256 if Lp % 256 == 0 else 128)

    kernel = functools.partial(_decoder_kernel, alpha=float(alpha),
                               l_valid=L, tq=tq)

    weight_args = (
        params["w_in"].astype(jnp.bfloat16), params["b_in"],
        w_out.astype(jnp.bfloat16), b_out,
        packed["wff"], packed["bff"], packed["wqk"], packed["bqk"],
        packed["wv_all"], packed["bv_all"],
        packed["wo"], packed["bo"], packed["w1"], packed["b1"],
    )
    fenc_bf = fencoder.astype(jnp.bfloat16)

    # Advisory cost estimate for XLA scheduling.
    mm_flops = 2 * B * Lp * (C * Din + ncls_p * C + NL * Cv * C
                             + NL * (3 * C * C + 2 * Cq * C + C * Cv + C * C))
    att_flops = 2 * B * NL * Lp * Lp * (Cq + Cv)
    w_bytes = sum(int(w.size) * w.dtype.itemsize for w in weight_args)
    bytes_accessed = int(x.size * 4 + fencoder.size * 2 + mask.size * 4
                         + w_bytes + B * ncls_p * Lp * 4 + B * C * Lp * 4)

    # Scoped VMEM limit sized to the per-step working set (clamped to be safe
    # on every generation: v7x has only 64 MiB physical per TC).
    f32b, b16b = 4, 2
    io_bytes = 2 * Lp * (Din * f32b + C * b16b + f32b + ncls_p * f32b + C * f32b)
    act_bytes = Lp * (f32b * (8 * C + 2 * Cq + Cv) + (f32b + b16b) * NL * Cv)
    att_bytes = tq * Lp * (3 * f32b + b16b)
    vmem_limit = int(min(64 * 1024 * 1024,
                         max(32 * 1024 * 1024,
                             2 * (io_bytes + w_bytes + act_bytes + att_bytes))))

    out, feat = pl.pallas_call(
        kernel,
        out_shape=(
            jax.ShapeDtypeStruct((B, ncls_p, Lp), x.dtype),
            jax.ShapeDtypeStruct((B, C, Lp), x.dtype),
        ),
        grid=(B,),
        in_specs=[
            pl.BlockSpec((1, Din, Lp), lambda i: (i, 0, 0)),   # x
            pl.BlockSpec((1, C, Lp), lambda i: (i, 0, 0)),     # fencoder (bf16)
            pl.BlockSpec((1, 1, Lp), lambda i: (i, 0, 0)),     # mask
        ] + [_full_spec(w) for w in weight_args],
        out_specs=[
            pl.BlockSpec((1, ncls_p, Lp), lambda i: (i, 0, 0)),
            pl.BlockSpec((1, C, Lp), lambda i: (i, 0, 0)),
        ],
        compiler_params=pltpu.CompilerParams(
            dimension_semantics=("parallel",),
            vmem_limit_bytes=vmem_limit),
        cost_estimate=pl.CostEstimate(
            flops=int(mm_flops + att_flops),
            transcendentals=int(B * NL * (Lp * Lp + 2 * Lp)),
            bytes_accessed=bytes_accessed),
    )(x, fenc_bf, mask, *weight_args)

    return out[:, :num_classes, :L], feat[:, :, :L]


# ----------------------------------------------------------------------------
# Parameter construction (deterministic, synthetic)
# ----------------------------------------------------------------------------
def init_decoder_params(key, num_layers, r1, r2, num_f_maps, input_dim, num_classes):
    def nxt():
        nonlocal key
        key, sub = jax.random.split(key)
        return sub

    def rnd(shape, scale=0.1):
        return (scale * jax.random.normal(nxt(), shape)).astype(jnp.float32)

    C = num_f_maps
    Cq = C // r1
    Cv = C // r2
    params = {
        "w_in": rnd((C, input_dim)),
        "b_in": rnd((C, 1)),
        "w_out": rnd((num_classes, C)),
        "b_out": rnd((num_classes, 1)),
        "layers": [],
    }
    for _ in range(num_layers):
        layer = (
            rnd((C, C)), rnd((C, C)), rnd((C, C)), rnd((C, 1)),   # feed_forward taps + bias
            rnd((Cq, C)), rnd((Cq, 1)),                           # query_conv
            rnd((Cq, C)), rnd((Cq, 1)),                           # key_conv
            rnd((Cv, C)), rnd((Cv, 1)),                           # value_conv
            rnd((C, Cv)), rnd((C, 1)),                            # att conv_out
            rnd((C, C)), rnd((C, 1)),                             # conv_1x1
        )
        params["layers"].append(layer)
    return params


# ----------------------------------------------------------------------------
if __name__ == "__main__":
    num_layers = 3
    r1, r2 = 2, 2
    num_f_maps = 32
    input_dim = 12
    num_classes = 6
    alpha = 1.0
    B, L = 2, 64

    key = jax.random.PRNGKey(0)
    k_p, k_x, k_f = jax.random.split(key, 3)

    params = init_decoder_params(k_p, num_layers, r1, r2, num_f_maps,
                                 input_dim, num_classes)

    x = jax.random.normal(k_x, (B, input_dim, L), dtype=jnp.float32)
    fencoder = jax.random.normal(k_f, (B, num_f_maps, L), dtype=jnp.float32)
    # binary padding mask: batch 0 full length, batch 1 length 48
    lens = jnp.array([L, 48])
    pos = jnp.arange(L)[None, :]
    mask = (pos < lens[:, None]).astype(jnp.float32)[:, None, :]  # (B, 1, L)

    out, feature = decoder_forward(x, fencoder, mask, params, alpha=alpha)
    out, feature = jax.block_until_ready((out, feature))

    assert out.shape == (B, num_classes, L)
    assert feature.shape == (B, num_f_maps, L)
    assert bool(jnp.all(jnp.isfinite(out))) and bool(jnp.all(jnp.isfinite(feature)))
    print("KERNEL_OK")
</pallas_src>

<mosaic_0001>
module attributes {stable_mosaic.version = 11 : i64} {
  func.func @_decoder_kernel(%arg0: i32, %arg1: memref<1x12x128xf32, #tpu.memory_space<vmem>>, %arg2: memref<1x32x128xbf16, #tpu.memory_space<vmem>>, %arg3: memref<1x1x128xf32, #tpu.memory_space<vmem>>, %arg4: memref<32x12xbf16, #tpu.memory_space<vmem>>, %arg5: memref<32x1xf32, #tpu.memory_space<vmem>>, %arg6: memref<8x32xbf16, #tpu.memory_space<vmem>>, %arg7: memref<8x1xf32, #tpu.memory_space<vmem>>, %arg8: memref<3x96x32xbf16, #tpu.memory_space<vmem>>, %arg9: memref<3x32x1xf32, #tpu.memory_space<vmem>>, %arg10: memref<3x32x32xbf16, #tpu.memory_space<vmem>>, %arg11: memref<3x32x1xf32, #tpu.memory_space<vmem>>, %arg12: memref<48x32xbf16, #tpu.memory_space<vmem>>, %arg13: memref<48x1xf32, #tpu.memory_space<vmem>>, %arg14: memref<3x32x16xbf16, #tpu.memory_space<vmem>>, %arg15: memref<3x32x1xf32, #tpu.memory_space<vmem>>, %arg16: memref<3x32x32xbf16, #tpu.memory_space<vmem>>, %arg17: memref<3x32x1xf32, #tpu.memory_space<vmem>>, %arg18: memref<1x8x128xf32, #tpu.memory_space<vmem>>, %arg19: memref<1x32x128xf32, #tpu.memory_space<vmem>>) attributes {dimension_semantics = [#tpu.dimension_semantics<parallel>], iteration_bounds = array<i64: 2>, scalar_prefetch = 0 : i64, scratch_operands = 0 : i64, tpu.core_type = #tpu.core_type<tc>, window_params = [{transform_indices = @transform_0, window_bounds = array<i64: 1, 12, 128>}, {transform_indices = @transform_1, window_bounds = array<i64: 1, 32, 128>}, {transform_indices = @transform_2, window_bounds = array<i64: 1, 1, 128>}, {pipeline_mode = #tpu.pipeline_mode<synchronous>, transform_indices = @transform_3, window_bounds = array<i64: 32, 12>}, {pipeline_mode = #tpu.pipeline_mode<synchronous>, transform_indices = @transform_4, window_bounds = array<i64: 32, 1>}, {pipeline_mode = #tpu.pipeline_mode<synchronous>, transform_indices = @transform_5, window_bounds = array<i64: 8, 32>}, {pipeline_mode = #tpu.pipeline_mode<synchronous>, transform_indices = @transform_6, window_bounds = array<i64: 8, 1>}, {pipeline_mode = #tpu.pipeline_mode<synchronous>, transform_indices = @transform_7, window_bounds = array<i64: 3, 96, 32>}, {pipeline_mode = #tpu.pipeline_mode<synchronous>, transform_indices = @transform_8, window_bounds = array<i64: 3, 32, 1>}, {pipeline_mode = #tpu.pipeline_mode<synchronous>, transform_indices = @transform_9, window_bounds = array<i64: 3, 32, 32>}, {pipeline_mode = #tpu.pipeline_mode<synchronous>, transform_indices = @transform_10, window_bounds = array<i64: 3, 32, 1>}, {pipeline_mode = #tpu.pipeline_mode<synchronous>, transform_indices = @transform_11, window_bounds = array<i64: 48, 32>}, {pipeline_mode = #tpu.pipeline_mode<synchronous>, transform_indices = @transform_12, window_bounds = array<i64: 48, 1>}, {pipeline_mode = #tpu.pipeline_mode<synchronous>, transform_indices = @transform_13, window_bounds = array<i64: 3, 32, 16>}, {pipeline_mode = #tpu.pipeline_mode<synchronous>, transform_indices = @transform_14, window_bounds = array<i64: 3, 32, 1>}, {pipeline_mode = #tpu.pipeline_mode<synchronous>, transform_indices = @transform_15, window_bounds = array<i64: 3, 32, 32>}, {pipeline_mode = #tpu.pipeline_mode<synchronous>, transform_indices = @transform_16, window_bounds = array<i64: 3, 32, 1>}, {transform_indices = @transform_17, window_bounds = array<i64: 1, 8, 128>}, {transform_indices = @transform_18, window_bounds = array<i64: 1, 32, 128>}]} {
    %c0 = arith.constant 0 : index
    %c0_0 = arith.constant 0 : index
    %c0_1 = arith.constant 0 : index
    %0 = vector.load %arg1[%c0, %c0_0, %c0_1] : memref<1x12x128xf32, #tpu.memory_space<vmem>>, vector<1x12x128xf32>
    %1 = vector.shape_cast %0 : vector<1x12x128xf32> to vector<12x128xf32>
    %2 = arith.truncf %1 : vector<12x128xf32> to vector<12x128xbf16>
    %c0_2 = arith.constant 0 : index
    %c0_3 = arith.constant 0 : index
    %c0_4 = arith.constant 0 : index
    %3 = vector.load %arg2[%c0_2, %c0_3, %c0_4] : memref<1x32x128xbf16, #tpu.memory_space<vmem>>, vector<1x32x128xbf16>
    %4 = vector.shape_cast %3 : vector<1x32x128xbf16> to vector<32x128xbf16>
    %c0_5 = arith.constant 0 : index
    %c0_6 = arith.constant 0 : index
    %c0_7 = arith.constant 0 : index
    %5 = vector.load %arg3[%c0_5, %c0_6, %c0_7] : memref<1x1x128xf32, #tpu.memory_space<vmem>>, vector<1x1x128xf32>
    %6 = vector.shape_cast %5 : vector<1x1x128xf32> to vector<1x128xf32>
    %7 = tpu.iota {dimensions = array<i32: 1>} : vector<1x128xi32>
    %c64_i32 = arith.constant 64 : i32
    %8 = vector.broadcast %c64_i32 : i32 to vector<1x128xi32>
    %9 = arith.cmpi slt, %7, %8 : vector<1x128xi32>
    %10 = arith.extui %9 : vector<1x128xi1> to vector<1x128xi32>
    %11 = arith.sitofp %10 : vector<1x128xi32> to vector<1x128xf32>
    %cst = arith.constant 0.000000e+00 : f32
    %12 = vector.broadcast %cst : f32 to vector<1x128xf32>
    %13 = arith.cmpf ogt, %11, %12 : vector<1x128xf32>
    %cst_8 = arith.constant 9.99999997E-7 : f32
    %14 = vector.broadcast %cst_8 : f32 to vector<1x128xf32>
    %15 = arith.addf %6, %14 : vector<1x128xf32>
    %16 = math.log %15 : vector<1x128xf32>
    %cst_9 = arith.constant -1.000000e+30 : f32
    %17 = vector.broadcast %cst_9 : f32 to vector<1x128xf32>
    %18 = arith.select %13, %16, %17 : vector<1x128xi1>, vector<1x128xf32>
    %c0_10 = arith.constant 0 : index
    %c0_11 = arith.constant 0 : index
    %19 = vector.load %arg4[%c0_10, %c0_11] : memref<32x12xbf16, #tpu.memory_space<vmem>>, vector<32x12xbf16>
    %cst_12 = arith.constant dense<0.000000e+00> : vector<32x128xf32>
    %20 = tpu.matmul %19, %2, %cst_12 {dimension_numbers = #tpu.dot_dimension_numbers<[1], [0], [0], [1], [0, 0, 1, 1], [], []>} : vector<32x12xbf16>, vector<12x128xbf16>, vector<32x128xf32> -> vector<32x128xf32>
    %c0_13 = arith.constant 0 : index
    %c0_14 = arith.constant 0 : index
    %21 = vector.load %arg5[%c0_13, %c0_14] : memref<32x1xf32, #tpu.memory_space<vmem>>, vector<32x1xf32>
    %22 = vector.broadcast %21 : vector<32x1xf32> to vector<32x128xf32>
    %23 = arith.addf %20, %22 : vector<32x128xf32>
    %24 = vector.broadcast %11 : vector<1x128xf32> to vector<32x128xf32>
    %25 = arith.mulf %23, %24 : vector<32x128xf32>
    %c0_15 = arith.constant 0 : index
    %c0_16 = arith.constant 0 : index
    %26 = vector.load %arg12[%c0_15, %c0_16] : memref<48x32xbf16, #tpu.memory_space<vmem>>, vector<48x32xbf16>
    %cst_17 = arith.constant dense<0.000000e+00> : vector<48x128xf32>
    %27 = tpu.matmul %26, %4, %cst_17 {dimension_numbers = #tpu.dot_dimension_numbers<[1], [0], [0], [1], [0, 0, 1, 1], [], []>} : vector<48x32xbf16>, vector<32x128xbf16>, vector<48x128xf32> -> vector<48x128xf32>
    %c0_18 = arith.constant 0 : index
    %c0_19 = arith.constant 0 : index
    %28 = vector.load %arg13[%c0_18, %c0_19] : memref<48x1xf32, #tpu.memory_space<vmem>>, vector<48x1xf32>
    %29 = vector.broadcast %28 : vector<48x1xf32> to vector<48x128xf32>
    %30 = arith.addf %27, %29 : vector<48x128xf32>
    %31 = vector.broadcast %6 : vector<1x128xf32> to vector<48x128xf32>
    %32 = arith.mulf %30, %31 : vector<48x128xf32>
    %33 = arith.truncf %32 : vector<48x128xf32> to vector<48x128xbf16>
    %c0_20 = arith.constant 0 : index
    %c0_21 = arith.constant 0 : index
    %c0_22 = arith.constant 0 : index
    %34 = vector.load %arg8[%c0_20, %c0_21, %c0_22] : memref<3x96x32xbf16, #tpu.memory_space<vmem>>, vector<1x96x32xbf16>
    %35 = vector.shape_cast %34 : vector<1x96x32xbf16> to vector<96x32xbf16>
    %36 = arith.truncf %25 : vector<32x128xf32> to vector<32x128xbf16>
    %cst_23 = arith.constant dense<0.000000e+00> : vector<96x128xf32>
    %37 = tpu.matmul %35, %36, %cst_23 {dimension_numbers = #tpu.dot_dimension_numbers<[1], [0], [0], [1], [0, 0, 1, 1], [], []>} : vector<96x32xbf16>, vector<32x128xbf16>, vector<96x128xf32> -> vector<96x128xf32>
    %38 = vector.extract_strided_slice %37 {offsets = [0, 0], sizes = [32, 128], strides = [1, 1]} : vector<96x128xf32> to vector<32x128xf32>
    %c1_i32 = arith.constant 1 : i32
    %39 = tpu.dynamic_rotate %38 by %c1_i32 dim 1 : vector<32x128xf32>, i32 -> vector<32x128xf32>
    %c1_i32_24 = arith.constant 1 : i32
    %40 = vector.broadcast %c1_i32_24 : i32 to vector<1x128xi32>
    %41 = arith.cmpi sge, %7, %40 : vector<1x128xi32>
    %42 = arith.extui %41 : vector<1x128xi1> to vector<1x128xi32>
    %43 = arith.sitofp %42 : vector<1x128xi32> to vector<1x128xf32>
    %44 = vector.broadcast %43 : vector<1x128xf32> to vector<32x128xf32>
    %45 = arith.mulf %39, %44 : vector<32x128xf32>
    %46 = vector.extract_strided_slice %37 {offsets = [64, 0], sizes = [32, 128], strides = [1, 1]} : vector<96x128xf32> to vector<32x128xf32>
    %c127_i32 = arith.constant 127 : i32
    %47 = tpu.dynamic_rotate %46 by %c127_i32 dim 1 : vector<32x128xf32>, i32 -> vector<32x128xf32>
    %c127_i32_25 = arith.constant 127 : i32
    %48 = vector.broadcast %c127_i32_25 : i32 to vector<1x128xi32>
    %49 = arith.cmpi slt, %7, %48 : vector<1x128xi32>
    %50 = arith.extui %49 : vector<1x128xi1> to vector<1x128xi32>
    %51 = arith.sitofp %50 : vector<1x128xi32> to vector<1x128xf32>
    %52 = vector.broadcast %51 : vector<1x128xf32> to vector<32x128xf32>
    %53 = arith.mulf %47, %52 : vector<32x128xf32>
    %54 = vector.extract_strided_slice %37 {offsets = [32, 0], sizes = [32, 128], strides = [1, 1]} : vector<96x128xf32> to vector<32x128xf32>
    %55 = arith.addf %45, %54 : vector<32x128xf32>
    %56 = arith.addf %55, %53 : vector<32x128xf32>
    %c0_26 = arith.constant 0 : index
    %c0_27 = arith.constant 0 : index
    %c0_28 = arith.constant 0 : index
    %57 = vector.load %arg9[%c0_26, %c0_27, %c0_28] : memref<3x32x1xf32, #tpu.memory_space<vmem>>, vector<1x32x1xf32>
    %58 = vector.shape_cast %57 : vector<1x32x1xf32> to vector<32x1xf32>
    %59 = vector.broadcast %58 : vector<32x1xf32> to vector<32x128xf32>
    %60 = arith.addf %56, %59 : vector<32x128xf32>
    %cst_29 = arith.constant 0.000000e+00 : f32
    %61 = vector.broadcast %cst_29 : f32 to vector<32x128xf32>
    %62 = arith.maximumf %60, %61 : vector<32x128xf32>
    %63 = vector.broadcast %11 : vector<1x128xf32> to vector<32x128xf32>
    %64 = arith.mulf %62, %63 : vector<32x128xf32>
    %cst_30 = arith.constant dense<0.000000e+00> : vector<32xf32>
    %65 = vector.multi_reduction <add>, %64, %cst_30 [1] : vector<32x128xf32> to vector<32xf32>
    %66 = vector.shape_cast %65 : vector<32xf32> to vector<32x1xf32>
    %cst_31 = arith.constant 1.562500e-02 : f32
    %67 = vector.broadcast %cst_31 : f32 to vector<32x1xf32>
    %68 = arith.mulf %66, %67 : vector<32x1xf32>
    %69 = arith.mulf %64, %62 : vector<32x128xf32>
    %cst_32 = arith.constant dense<0.000000e+00> : vector<32xf32>
    %70 = vector.multi_reduction <add>, %69, %cst_32 [1] : vector<32x128xf32> to vector<32xf32>
    %71 = vector.shape_cast %70 : vector<32xf32> to vector<32x1xf32>
    %cst_33 = arith.constant 1.562500e-02 : f32
    %72 = vector.broadcast %cst_33 : f32 to vector<32x1xf32>
    %73 = arith.mulf %71, %72 : vector<32x1xf32>
    %74 = arith.mulf %68, %68 : vector<32x1xf32>
    %75 = arith.subf %73, %74 : vector<32x1xf32>
    %cst_34 = arith.constant 0.000000e+00 : f32
    %76 = vector.broadcast %cst_34 : f32 to vector<32x1xf32>
    %77 = arith.maximumf %75, %76 : vector<32x1xf32>
    %78 = vector.broadcast %68 : vector<32x1xf32> to vector<32x128xf32>
    %79 = arith.subf %62, %78 : vector<32x128xf32>
    %cst_35 = arith.constant 9.99999974E-6 : f32
    %80 = vector.broadcast %cst_35 : f32 to vector<32x1xf32>
    %81 = arith.addf %77, %80 : vector<32x1xf32>
    %82 = math.rsqrt %81 : vector<32x1xf32>
    %83 = vector.broadcast %82 : vector<32x1xf32> to vector<32x128xf32>
    %84 = arith.mulf %79, %83 : vector<32x128xf32>
    %c0_36 = arith.constant 0 : index
    %c0_37 = arith.constant 0 : index
    %c0_38 = arith.constant 0 : index
    %85 = vector.load %arg10[%c0_36, %c0_37, %c0_38] : memref<3x32x32xbf16, #tpu.memory_space<vmem>>, vector<1x32x32xbf16>
    %86 = vector.shape_cast %85 : vector<1x32x32xbf16> to vector<32x32xbf16>
    %87 = arith.truncf %84 : vector<32x128xf32> to vector<32x128xbf16>
    %cst_39 = arith.constant dense<0.000000e+00> : vector<32x128xf32>
    %88 = tpu.matmul %86, %87, %cst_39 {dimension_numbers = #tpu.dot_dimension_numbers<[1], [0], [0], [1], [0, 0, 1, 1], [], []>} : vector<32x32xbf16>, vector<32x128xbf16>, vector<32x128xf32> -> vector<32x128xf32>
    %c0_40 = arith.constant 0 : index
    %c0_41 = arith.constant 0 : index
    %c0_42 = arith.constant 0 : index
    %89 = vector.load %arg11[%c0_40, %c0_41, %c0_42] : memref<3x32x1xf32, #tpu.memory_space<vmem>>, vector<1x32x1xf32>
    %90 = vector.shape_cast %89 : vector<1x32x1xf32> to vector<32x1xf32>
    %91 = vector.broadcast %90 : vector<32x1xf32> to vector<32x128xf32>
    %92 = arith.addf %88, %91 : vector<32x128xf32>
    %93 = vector.extract_strided_slice %92 {offsets = [0, 0], sizes = [16, 128], strides = [1, 1]} : vector<32x128xf32> to vector<16x128xf32>
    %94 = arith.truncf %93 : vector<16x128xf32> to vector<16x128xbf16>
    %95 = vector.extract_strided_slice %92 {offsets = [16, 0], sizes = [16, 128], strides = [1, 1]} : vector<32x128xf32> to vector<16x128xf32>
    %96 = arith.truncf %95 : vector<16x128xf32> to vector<16x128xbf16>
    %97 = vector.extract_strided_slice %33 {offsets = [0, 0], sizes = [16, 128], strides = [1, 1]} : vector<48x128xbf16> to vector<16x128xbf16>
    %cst_43 = arith.constant dense<0.000000e+00> : vector<128x128xf32>
    %98 = tpu.matmul %94, %96, %cst_43 {dimension_numbers = #tpu.dot_dimension_numbers<[0], [0], [1], [1], [0, 1, 1, 1], [], []>} : vector<16x128xbf16>, vector<16x128xbf16>, vector<128x128xf32> -> vector<128x128xf32>
    %99 = vector.broadcast %18 : vector<1x128xf32> to vector<128x128xf32>
    %100 = arith.addf %98, %99 : vector<128x128xf32>
    %cst_44 = arith.constant dense<0xFF800000> : vector<128xf32>
    %101 = vector.multi_reduction <maximumf>, %100, %cst_44 [1] : vector<128x128xf32> to vector<128xf32>
    %102 = vector.shape_cast %101 : vector<128xf32> to vector<128x1xf32>
    %103 = vector.broadcast %102 : vector<128x1xf32> to vector<128x128xf32>
    %104 = arith.subf %100, %103 : vector<128x128xf32>
    %105 = math.exp %104 : vector<128x128xf32>
    %cst_45 = arith.constant dense<0.000000e+00> : vector<128xf32>
    %106 = vector.multi_reduction <add>, %105, %cst_45 [1] : vector<128x128xf32> to vector<128xf32>
    %107 = vector.shape_cast %106 : vector<128xf32> to vector<128x1xf32>
    %108 = tpu.reciprocal %107 {approx = true} : vector<128x1xf32> -> vector<128x1xf32>
    %109 = vector.broadcast %108 : vector<128x1xf32> to vector<128x128xf32>
    %110 = arith.mulf %105, %109 : vector<128x128xf32>
    %111 = arith.truncf %110 : vector<128x128xf32> to vector<128x128xbf16>
    %cst_46 = arith.constant dense<0.000000e+00> : vector<16x128xf32>
    %112 = tpu.matmul %97, %111, %cst_46 {dimension_numbers = #tpu.dot_dimension_numbers<[1], [1], [0], [0], [0, 0, 1, 0], [], []>} : vector<16x128xbf16>, vector<128x128xbf16>, vector<16x128xf32> -> vector<16x128xf32>
    %c0_47 = arith.constant 0 : index
    %c0_48 = arith.constant 0 : index
    %c0_49 = arith.constant 0 : index
    %113 = vector.load %arg14[%c0_47, %c0_48, %c0_49] : memref<3x32x16xbf16, #tpu.memory_space<vmem>>, vector<1x32x16xbf16>
    %114 = vector.shape_cast %113 : vector<1x32x16xbf16> to vector<32x16xbf16>
    %cst_50 = arith.constant 0.000000e+00 : f32
    %115 = vector.broadcast %cst_50 : f32 to vector<16x128xf32>
    %116 = arith.maximumf %112, %115 : vector<16x128xf32>
    %117 = arith.truncf %116 : vector<16x128xf32> to vector<16x128xbf16>
    %cst_51 = arith.constant dense<0.000000e+00> : vector<32x128xf32>
    %118 = tpu.matmul %114, %117, %cst_51 {dimension_numbers = #tpu.dot_dimension_numbers<[1], [0], [0], [1], [0, 0, 1, 1], [], []>} : vector<32x16xbf16>, vector<16x128xbf16>, vector<32x128xf32> -> vector<32x128xf32>
    %c0_52 = arith.constant 0 : index
    %c0_53 = arith.constant 0 : index
    %c0_54 = arith.constant 0 : index
    %119 = vector.load %arg15[%c0_52, %c0_53, %c0_54] : memref<3x32x1xf32, #tpu.memory_space<vmem>>, vector<1x32x1xf32>
    %120 = vector.shape_cast %119 : vector<1x32x1xf32> to vector<32x1xf32>
    %121 = vector.broadcast %120 : vector<32x1xf32> to vector<32x128xf32>
    %122 = arith.addf %118, %121 : vector<32x128xf32>
    %123 = vector.broadcast %6 : vector<1x128xf32> to vector<32x128xf32>
    %124 = arith.mulf %122, %123 : vector<32x128xf32>
    %cst_55 = arith.constant 1.000000e+00 : f32
    %125 = vector.broadcast %cst_55 : f32 to vector<32x128xf32>
    %126 = arith.mulf %125, %124 : vector<32x128xf32>
    %127 = arith.addf %126, %62 : vector<32x128xf32>
    %c0_56 = arith.constant 0 : index
    %c0_57 = arith.constant 0 : index
    %c0_58 = arith.constant 0 : index
    %128 = vector.load %arg16[%c0_56, %c0_57, %c0_58] : memref<3x32x32xbf16, #tpu.memory_space<vmem>>, vector<1x32x32xbf16>
    %129 = vector.shape_cast %128 : vector<1x32x32xbf16> to vector<32x32xbf16>
    %130 = arith.truncf %127 : vector<32x128xf32> to vector<32x128xbf16>
    %cst_59 = arith.constant dense<0.000000e+00> : vector<32x128xf32>
    %131 = tpu.matmul %129, %130, %cst_59 {dimension_numbers = #tpu.dot_dimension_numbers<[1], [0], [0], [1], [0, 0, 1, 1], [], []>} : vector<32x32xbf16>, vector<32x128xbf16>, vector<32x128xf32> -> vector<32x128xf32>
    %c0_60 = arith.constant 0 : index
    %c0_61 = arith.constant 0 : index
    %c0_62 = arith.constant 0 : index
    %132 = vector.load %arg17[%c0_60, %c0_61, %c0_62] : memref<3x32x1xf32, #tpu.memory_space<vmem>>, vector<1x32x1xf32>
    %133 = vector.shape_cast %132 : vector<1x32x1xf32> to vector<32x1xf32>
    %134 = vector.broadcast %133 : vector<32x1xf32> to vector<32x128xf32>
    %135 = arith.addf %131, %134 : vector<32x128xf32>
    %136 = arith.addf %25, %135 : vector<32x128xf32>
    %137 = vector.broadcast %6 : vector<1x128xf32> to vector<32x128xf32>
    %138 = arith.mulf %136, %137 : vector<32x128xf32>
    %c1 = arith.constant 1 : index
    %c0_63 = arith.constant 0 : index
    %c0_64 = arith.constant 0 : index
    %139 = vector.load %arg8[%c1, %c0_63, %c0_64] : memref<3x96x32xbf16, #tpu.memory_space<vmem>>, vector<1x96x32xbf16>
    %140 = vector.shape_cast %139 : vector<1x96x32xbf16> to vector<96x32xbf16>
    %141 = arith.truncf %138 : vector<32x128xf32> to vector<32x128xbf16>
    %cst_65 = arith.constant dense<0.000000e+00> : vector<96x128xf32>
    %142 = tpu.matmul %140, %141, %cst_65 {dimension_numbers = #tpu.dot_dimension_numbers<[1], [0], [0], [1], [0, 0, 1, 1], [], []>} : vector<96x32xbf16>, vector<32x128xbf16>, vector<96x128xf32> -> vector<96x128xf32>
    %143 = vector.extract_strided_slice %142 {offsets = [0, 0], sizes = [32, 128], strides = [1, 1]} : vector<96x128xf32> to vector<32x128xf32>
    %c2_i32 = arith.constant 2 : i32
    %144 = tpu.dynamic_rotate %143 by %c2_i32 dim 1 : vector<32x128xf32>, i32 -> vector<32x128xf32>
    %c2_i32_66 = arith.constant 2 : i32
    %145 = vector.broadcast %c2_i32_66 : i32 to vector<1x128xi32>
    %146 = arith.cmpi sge, %7, %145 : vector<1x128xi32>
    %147 = arith.extui %146 : vector<1x128xi1> to vector<1x128xi32>
    %148 = arith.sitofp %147 : vector<1x128xi32> to vector<1x128xf32>
    %149 = vector.broadcast %148 : vector<1x128xf32> to vector<32x128xf32>
    %150 = arith.mulf %144, %149 : vector<32x128xf32>
    %151 = vector.extract_strided_slice %142 {offsets = [64, 0], sizes = [32, 128], strides = [1, 1]} : vector<96x128xf32> to vector<32x128xf32>
    %c126_i32 = arith.constant 126 : i32
    %152 = tpu.dynamic_rotate %151 by %c126_i32 dim 1 : vector<32x128xf32>, i32 -> vector<32x128xf32>
    %c126_i32_67 = arith.constant 126 : i32
    %153 = vector.broadcast %c126_i32_67 : i32 to vector<1x128xi32>
    %154 = arith.cmpi slt, %7, %153 : vector<1x128xi32>
    %155 = arith.extui %154 : vector<1x128xi1> to vector<1x128xi32>
    %156 = arith.sitofp %155 : vector<1x128xi32> to vector<1x128xf32>
    %157 = vector.broadcast %156 : vector<1x128xf32> to vector<32x128xf32>
    %158 = arith.mulf %152, %157 : vector<32x128xf32>
    %159 = vector.extract_strided_slice %142 {offsets = [32, 0], sizes = [32, 128], strides = [1, 1]} : vector<96x128xf32> to vector<32x128xf32>
    %160 = arith.addf %150, %159 : vector<32x128xf32>
    %161 = arith.addf %160, %158 : vector<32x128xf32>
    %c1_68 = arith.constant 1 : index
    %c0_69 = arith.constant 0 : index
    %c0_70 = arith.constant 0 : index
    %162 = vector.load %arg9[%c1_68, %c0_69, %c0_70] : memref<3x32x1xf32, #tpu.memory_space<vmem>>, vector<1x32x1xf32>
    %163 = vector.shape_cast %162 : vector<1x32x1xf32> to vector<32x1xf32>
    %164 = vector.broadcast %163 : vector<32x1xf32> to vector<32x128xf32>
    %165 = arith.addf %161, %164 : vector<32x128xf32>
    %cst_71 = arith.constant 0.000000e+00 : f32
    %166 = vector.broadcast %cst_71 : f32 to vector<32x128xf32>
    %167 = arith.maximumf %165, %166 : vector<32x128xf32>
    %168 = vector.broadcast %11 : vector<1x128xf32> to vector<32x128xf32>
    %169 = arith.mulf %167, %168 : vector<32x128xf32>
    %cst_72 = arith.constant dense<0.000000e+00> : vector<32xf32>
    %170 = vector.multi_reduction <add>, %169, %cst_72 [1] : vector<32x128xf32> to vector<32xf32>
    %171 = vector.shape_cast %170 : vector<32xf32> to vector<32x1xf32>
    %cst_73 = arith.constant 1.562500e-02 : f32
    %172 = vector.broadcast %cst_73 : f32 to vector<32x1xf32>
    %173 = arith.mulf %171, %172 : vector<32x1xf32>
    %174 = arith.mulf %169, %167 : vector<32x128xf32>
    %cst_74 = arith.constant dense<0.000000e+00> : vector<32xf32>
    %175 = vector.multi_reduction <add>, %174, %cst_74 [1] : vector<32x128xf32> to vector<32xf32>
    %176 = vector.shape_cast %175 : vector<32xf32> to vector<32x1xf32>
    %cst_75 = arith.constant 1.562500e-02 : f32
    %177 = vector.broadcast %cst_75 : f32 to vector<32x1xf32>
    %178 = arith.mulf %176, %177 : vector<32x1xf32>
    %179 = arith.mulf %173, %173 : vector<32x1xf32>
    %180 = arith.subf %178, %179 : vector<32x1xf32>
    %cst_76 = arith.constant 0.000000e+00 : f32
    %181 = vector.broadcast %cst_76 : f32 to vector<32x1xf32>
    %182 = arith.maximumf %180, %181 : vector<32x1xf32>
    %183 = vector.broadcast %173 : vector<32x1xf32> to vector<32x128xf32>
    %184 = arith.subf %167, %183 : vector<32x128xf32>
    %cst_77 = arith.constant 9.99999974E-6 : f32
    %185 = vector.broadcast %cst_77 : f32 to vector<32x1xf32>
    %186 = arith.addf %182, %185 : vector<32x1xf32>
    %187 = math.rsqrt %186 : vector<32x1xf32>
    %188 = vector.broadcast %187 : vector<32x1xf32> to vector<32x128xf32>
    %189 = arith.mulf %184, %188 : vector<32x128xf32>
    %c1_78 = arith.constant 1 : index
    %c0_79 = arith.constant 0 : index
    %c0_80 = arith.constant 0 : index
    %190 = vector.load %arg10[%c1_78, %c0_79, %c0_80] : memref<3x32x32xbf16, #tpu.memory_space<vmem>>, vector<1x32x32xbf16>
    %191 = vector.shape_cast %190 : vector<1x32x32xbf16> to vector<32x32xbf16>
    %192 = arith.truncf %189 : vector<32x128xf32> to vector<32x128xbf16>
    %cst_81 = arith.constant dense<0.000000e+00> : vector<32x128xf32>
    %193 = tpu.matmul %191, %192, %cst_81 {dimension_numbers = #tpu.dot_dimension_numbers<[1], [0], [0], [1], [0, 0, 1, 1], [], []>} : vector<32x32xbf16>, vector<32x128xbf16>, vector<32x128xf32> -> vector<32x128xf32>
    %c1_82 = arith.constant 1 : index
    %c0_83 = arith.constant 0 : index
    %c0_84 = arith.constant 0 : index
    %194 = vector.load %arg11[%c1_82, %c0_83, %c0_84] : memref<3x32x1xf32, #tpu.memory_space<vmem>>, vector<1x32x1xf32>
    %195 = vector.shape_cast %194 : vector<1x32x1xf32> to vector<32x1xf32>
    %196 = vector.broadcast %195 : vector<32x1xf32> to vector<32x128xf32>
    %197 = arith.addf %193, %196 : vector<32x128xf32>
    %198 = vector.extract_strided_slice %197 {offsets = [0, 0], sizes = [16, 128], strides = [1, 1]} : vector<32x128xf32> to vector<16x128xf32>
    %199 = arith.truncf %198 : vector<16x128xf32> to vector<16x128xbf16>
    %200 = vector.extract_strided_slice %197 {offsets = [16, 0], sizes = [16, 128], strides = [1, 1]} : vector<32x128xf32> to vector<16x128xf32>
    %201 = arith.truncf %200 : vector<16x128xf32> to vector<16x128xbf16>
    %202 = vector.extract_strided_slice %33 {offsets = [16, 0], sizes = [16, 128], strides = [1, 1]} : vector<48x128xbf16> to vector<16x128xbf16>
    %cst_85 = arith.constant dense<0.000000e+00> : vector<128x128xf32>
    %203 = tpu.matmul %199, %201, %cst_85 {dimension_numbers = #tpu.dot_dimension_numbers<[0], [0], [1], [1], [0, 1, 1, 1], [], []>} : vector<16x128xbf16>, vector<16x128xbf16>, vector<128x128xf32> -> vector<128x128xf32>
    %204 = vector.broadcast %18 : vector<1x128xf32> to vector<128x128xf32>
    %205 = arith.addf %203, %204 : vector<128x128xf32>
    %cst_86 = arith.constant dense<0xFF800000> : vector<128xf32>
    %206 = vector.multi_reduction <maximumf>, %205, %cst_86 [1] : vector<128x128xf32> to vector<128xf32>
    %207 = vector.shape_cast %206 : vector<128xf32> to vector<128x1xf32>
    %208 = vector.broadcast %207 : vector<128x1xf32> to vector<128x128xf32>
    %209 = arith.subf %205, %208 : vector<128x128xf32>
    %210 = math.exp %209 : vector<128x128xf32>
    %cst_87 = arith.constant dense<0.000000e+00> : vector<128xf32>
    %211 = vector.multi_reduction <add>, %210, %cst_87 [1] : vector<128x128xf32> to vector<128xf32>
    %212 = vector.shape_cast %211 : vector<128xf32> to vector<128x1xf32>
    %213 = tpu.reciprocal %212 {approx = true} : vector<128x1xf32> -> vector<128x1xf32>
    %214 = vector.broadcast %213 : vector<128x1xf32> to vector<128x128xf32>
    %215 = arith.mulf %210, %214 : vector<128x128xf32>
    %216 = arith.truncf %215 : vector<128x128xf32> to vector<128x128xbf16>
    %cst_88 = arith.constant dense<0.000000e+00> : vector<16x128xf32>
    %217 = tpu.matmul %202, %216, %cst_88 {dimension_numbers = #tpu.dot_dimension_numbers<[1], [1], [0], [0], [0, 0, 1, 0], [], []>} : vector<16x128xbf16>, vector<128x128xbf16>, vector<16x128xf32> -> vector<16x128xf32>
    %c1_89 = arith.constant 1 : index
    %c0_90 = arith.constant 0 : index
    %c0_91 = arith.constant 0 : index
    %218 = vector.load %arg14[%c1_89, %c0_90, %c0_91] : memref<3x32x16xbf16, #tpu.memory_space<vmem>>, vector<1x32x16xbf16>
    %219 = vector.shape_cast %218 : vector<1x32x16xbf16> to vector<32x16xbf16>
    %cst_92 = arith.constant 0.000000e+00 : f32
    %220 = vector.broadcast %cst_92 : f32 to vector<16x128xf32>
    %221 = arith.maximumf %217, %220 : vector<16x128xf32>
    %222 = arith.truncf %221 : vector<16x128xf32> to vector<16x128xbf16>
    %cst_93 = arith.constant dense<0.000000e+00> : vector<32x128xf32>
    %223 = tpu.matmul %219, %222, %cst_93 {dimension_numbers = #tpu.dot_dimension_numbers<[1], [0], [0], [1], [0, 0, 1, 1], [], []>} : vector<32x16xbf16>, vector<16x128xbf16>, vector<32x128xf32> -> vector<32x128xf32>
    %c1_94 = arith.constant 1 : index
    %c0_95 = arith.constant 0 : index
    %c0_96 = arith.constant 0 : index
    %224 = vector.load %arg15[%c1_94, %c0_95, %c0_96] : memref<3x32x1xf32, #tpu.memory_space<vmem>>, vector<1x32x1xf32>
    %225 = vector.shape_cast %224 : vector<1x32x1xf32> to vector<32x1xf32>
    %226 = vector.broadcast %225 : vector<32x1xf32> to vector<32x128xf32>
    %227 = arith.addf %223, %226 : vector<32x128xf32>
    %228 = vector.broadcast %6 : vector<1x128xf32> to vector<32x128xf32>
    %229 = arith.mulf %227, %228 : vector<32x128xf32>
    %cst_97 = arith.constant 1.000000e+00 : f32
    %230 = vector.broadcast %cst_97 : f32 to vector<32x128xf32>
    %231 = arith.mulf %230, %229 : vector<32x128xf32>
    %232 = arith.addf %231, %167 : vector<32x128xf32>
    %c1_98 = arith.constant 1 : index
    %c0_99 = arith.constant 0 : index
    %c0_100 = arith.constant 0 : index
    %233 = vector.load %arg16[%c1_98, %c0_99, %c0_100] : memref<3x32x32xbf16, #tpu.memory_space<vmem>>, vector<1x32x32xbf16>
    %234 = vector.shape_cast %233 : vector<1x32x32xbf16> to vector<32x32xbf16>
    %235 = arith.truncf %232 : vector<32x128xf32> to vector<32x128xbf16>
    %cst_101 = arith.constant dense<0.000000e+00> : vector<32x128xf32>
    %236 = tpu.matmul %234, %235, %cst_101 {dimension_numbers = #tpu.dot_dimension_numbers<[1], [0], [0], [1], [0, 0, 1, 1], [], []>} : vector<32x32xbf16>, vector<32x128xbf16>, vector<32x128xf32> -> vector<32x128xf32>
    %c1_102 = arith.constant 1 : index
    %c0_103 = arith.constant 0 : index
    %c0_104 = arith.constant 0 : index
    %237 = vector.load %arg17[%c1_102, %c0_103, %c0_104] : memref<3x32x1xf32, #tpu.memory_space<vmem>>, vector<1x32x1xf32>
    %238 = vector.shape_cast %237 : vector<1x32x1xf32> to vector<32x1xf32>
    %239 = vector.broadcast %238 : vector<32x1xf32> to vector<32x128xf32>
    %240 = arith.addf %236, %239 : vector<32x128xf32>
    %241 = arith.addf %138, %240 : vector<32x128xf32>
    %242 = vector.broadcast %6 : vector<1x128xf32> to vector<32x128xf32>
    %243 = arith.mulf %241, %242 : vector<32x128xf32>
    %c2 = arith.constant 2 : index
    %c0_105 = arith.constant 0 : index
    %c0_106 = arith.constant 0 : index
    %244 = vector.load %arg8[%c2, %c0_105, %c0_106] : memref<3x96x32xbf16, #tpu.memory_space<vmem>>, vector<1x96x32xbf16>
    %245 = vector.shape_cast %244 : vector<1x96x32xbf16> to vector<96x32xbf16>
    %246 = arith.truncf %243 : vector<32x128xf32> to vector<32x128xbf16>
    %cst_107 = arith.constant dense<0.000000e+00> : vector<96x128xf32>
    %247 = tpu.matmul %245, %246, %cst_107 {dimension_numbers = #tpu.dot_dimension_numbers<[1], [0], [0], [1], [0, 0, 1, 1], [], []>} : vector<96x32xbf16>, vector<32x128xbf16>, vector<96x128xf32> -> vector<96x128xf32>
    %248 = vector.extract_strided_slice %247 {offsets = [0, 0], sizes = [32, 128], strides = [1, 1]} : vector<96x128xf32> to vector<32x128xf32>
    %c4_i32 = arith.constant 4 : i32
    %249 = tpu.dynamic_rotate %248 by %c4_i32 dim 1 : vector<32x128xf32>, i32 -> vector<32x128xf32>
    %c4_i32_108 = arith.constant 4 : i32
    %250 = vector.broadcast %c4_i32_108 : i32 to vector<1x128xi32>
    %251 = arith.cmpi sge, %7, %250 : vector<1x128xi32>
    %252 = arith.extui %251 : vector<1x128xi1> to vector<1x128xi32>
    %253 = arith.sitofp %252 : vector<1x128xi32> to vector<1x128xf32>
    %254 = vector.broadcast %253 : vector<1x128xf32> to vector<32x128xf32>
    %255 = arith.mulf %249, %254 : vector<32x128xf32>
    %256 = vector.extract_strided_slice %247 {offsets = [64, 0], sizes = [32, 128], strides = [1, 1]} : vector<96x128xf32> to vector<32x128xf32>
    %c124_i32 = arith.constant 124 : i32
    %257 = tpu.dynamic_rotate %256 by %c124_i32 dim 1 : vector<32x128xf32>, i32 -> vector<32x128xf32>
    %c124_i32_109 = arith.constant 124 : i32
    %258 = vector.broadcast %c124_i32_109 : i32 to vector<1x128xi32>
    %259 = arith.cmpi slt, %7, %258 : vector<1x128xi32>
    %260 = arith.extui %259 : vector<1x128xi1> to vector<1x128xi32>
    %261 = arith.sitofp %260 : vector<1x128xi32> to vector<1x128xf32>
    %262 = vector.broadcast %261 : vector<1x128xf32> to vector<32x128xf32>
    %263 = arith.mulf %257, %262 : vector<32x128xf32>
    %264 = vector.extract_strided_slice %247 {offsets = [32, 0], sizes = [32, 128], strides = [1, 1]} : vector<96x128xf32> to vector<32x128xf32>
    %265 = arith.addf %255, %264 : vector<32x128xf32>
    %266 = arith.addf %265, %263 : vector<32x128xf32>
    %c2_110 = arith.constant 2 : index
    %c0_111 = arith.constant 0 : index
    %c0_112 = arith.constant 0 : index
    %267 = vector.load %arg9[%c2_110, %c0_111, %c0_112] : memref<3x32x1xf32, #tpu.memory_space<vmem>>, vector<1x32x1xf32>
    %268 = vector.shape_cast %267 : vector<1x32x1xf32> to vector<32x1xf32>
    %269 = vector.broadcast %268 : vector<32x1xf32> to vector<32x128xf32>
    %270 = arith.addf %266, %269 : vector<32x128xf32>
    %cst_113 = arith.constant 0.000000e+00 : f32
    %271 = vector.broadcast %cst_113 : f32 to vector<32x128xf32>
    %272 = arith.maximumf %270, %271 : vector<32x128xf32>
    %273 = vector.broadcast %11 : vector<1x128xf32> to vector<32x128xf32>
    %274 = arith.mulf %272, %273 : vector<32x128xf32>
    %cst_114 = arith.constant dense<0.000000e+00> : vector<32xf32>
    %275 = vector.multi_reduction <add>, %274, %cst_114 [1] : vector<32x128xf32> to vector<32xf32>
    %276 = vector.shape_cast %275 : vector<32xf32> to vector<32x1xf32>
    %cst_115 = arith.constant 1.562500e-02 : f32
    %277 = vector.broadcast %cst_115 : f32 to vector<32x1xf32>
    %278 = arith.mulf %276, %277 : vector<32x1xf32>
    %279 = arith.mulf %274, %272 : vector<32x128xf32>
    %cst_116 = arith.constant dense<0.000000e+00> : vector<32xf32>
    %280 = vector.multi_reduction <add>, %279, %cst_116 [1] : vector<32x128xf32> to vector<32xf32>
    %281 = vector.shape_cast %280 : vector<32xf32> to vector<32x1xf32>
    %cst_117 = arith.constant 1.562500e-02 : f32
    %282 = vector.broadcast %cst_117 : f32 to vector<32x1xf32>
    %283 = arith.mulf %281, %282 : vector<32x1xf32>
    %284 = arith.mulf %278, %278 : vector<32x1xf32>
    %285 = arith.subf %283, %284 : vector<32x1xf32>
    %cst_118 = arith.constant 0.000000e+00 : f32
    %286 = vector.broadcast %cst_118 : f32 to vector<32x1xf32>
    %287 = arith.maximumf %285, %286 : vector<32x1xf32>
    %288 = vector.broadcast %278 : vector<32x1xf32> to vector<32x128xf32>
    %289 = arith.subf %272, %288 : vector<32x128xf32>
    %cst_119 = arith.constant 9.99999974E-6 : f32
    %290 = vector.broadcast %cst_119 : f32 to vector<32x1xf32>
    %291 = arith.addf %287, %290 : vector<32x1xf32>
    %292 = math.rsqrt %291 : vector<32x1xf32>
    %293 = vector.broadcast %292 : vector<32x1xf32> to vector<32x128xf32>
    %294 = arith.mulf %289, %293 : vector<32x128xf32>
    %c2_120 = arith.constant 2 : index
    %c0_121 = arith.constant 0 : index
    %c0_122 = arith.constant 0 : index
    %295 = vector.load %arg10[%c2_120, %c0_121, %c0_122] : memref<3x32x32xbf16, #tpu.memory_space<vmem>>, vector<1x32x32xbf16>
    %296 = vector.shape_cast %295 : vector<1x32x32xbf16> to vector<32x32xbf16>
    %297 = arith.truncf %294 : vector<32x128xf32> to vector<32x128xbf16>
    %cst_123 = arith.constant dense<0.000000e+00> : vector<32x128xf32>
    %298 = tpu.matmul %296, %297, %cst_123 {dimension_numbers = #tpu.dot_dimension_numbers<[1], [0], [0], [1], [0, 0, 1, 1], [], []>} : vector<32x32xbf16>, vector<32x128xbf16>, vector<32x128xf32> -> vector<32x128xf32>
    %c2_124 = arith.constant 2 : index
    %c0_125 = arith.constant 0 : index
    %c0_126 = arith.constant 0 : index
    %299 = vector.load %arg11[%c2_124, %c0_125, %c0_126] : memref<3x32x1xf32, #tpu.memory_space<vmem>>, vector<1x32x1xf32>
    %300 = vector.shape_cast %299 : vector<1x32x1xf32> to vector<32x1xf32>
    %301 = vector.broadcast %300 : vector<32x1xf32> to vector<32x128xf32>
    %302 = arith.addf %298, %301 : vector<32x128xf32>
    %303 = vector.extract_strided_slice %302 {offsets = [0, 0], sizes = [16, 128], strides = [1, 1]} : vector<32x128xf32> to vector<16x128xf32>
    %304 = arith.truncf %303 : vector<16x128xf32> to vector<16x128xbf16>
    %305 = vector.extract_strided_slice %302 {offsets = [16, 0], sizes = [16, 128], strides = [1, 1]} : vector<32x128xf32> to vector<16x128xf32>
    %306 = arith.truncf %305 : vector<16x128xf32> to vector<16x128xbf16>
    %307 = vector.extract_strided_slice %33 {offsets = [32, 0], sizes = [16, 128], strides = [1, 1]} : vector<48x128xbf16> to vector<16x128xbf16>
    %cst_127 = arith.constant dense<0.000000e+00> : vector<128x128xf32>
    %308 = tpu.matmul %304, %306, %cst_127 {dimension_numbers = #tpu.dot_dimension_numbers<[0], [0], [1], [1], [0, 1, 1, 1], [], []>} : vector<16x128xbf16>, vector<16x128xbf16>, vector<128x128xf32> -> vector<128x128xf32>
    %309 = vector.broadcast %18 : vector<1x128xf32> to vector<128x128xf32>
    %310 = arith.addf %308, %309 : vector<128x128xf32>
    %cst_128 = arith.constant dense<0xFF800000> : vector<128xf32>
    %311 = vector.multi_reduction <maximumf>, %310, %cst_128 [1] : vector<128x128xf32> to vector<128xf32>
    %312 = vector.shape_cast %311 : vector<128xf32> to vector<128x1xf32>
    %313 = vector.broadcast %312 : vector<128x1xf32> to vector<128x128xf32>
    %314 = arith.subf %310, %313 : vector<128x128xf32>
    %315 = math.exp %314 : vector<128x128xf32>
    %cst_129 = arith.constant dense<0.000000e+00> : vector<128xf32>
    %316 = vector.multi_reduction <add>, %315, %cst_129 [1] : vector<128x128xf32> to vector<128xf32>
    %317 = vector.shape_cast %316 : vector<128xf32> to vector<128x1xf32>
    %318 = tpu.reciprocal %317 {approx = true} : vector<128x1xf32> -> vector<128x1xf32>
    %319 = vector.broadcast %318 : vector<128x1xf32> to vector<128x128xf32>
    %320 = arith.mulf %315, %319 : vector<128x128xf32>
    %321 = arith.truncf %320 : vector<128x128xf32> to vector<128x128xbf16>
    %cst_130 = arith.constant dense<0.000000e+00> : vector<16x128xf32>
    %322 = tpu.matmul %307, %321, %cst_130 {dimension_numbers = #tpu.dot_dimension_numbers<[1], [1], [0], [0], [0, 0, 1, 0], [], []>} : vector<16x128xbf16>, vector<128x128xbf16>, vector<16x128xf32> -> vector<16x128xf32>
    %c2_131 = arith.constant 2 : index
    %c0_132 = arith.constant 0 : index
    %c0_133 = arith.constant 0 : index
    %323 = vector.load %arg14[%c2_131, %c0_132, %c0_133] : memref<3x32x16xbf16, #tpu.memory_space<vmem>>, vector<1x32x16xbf16>
    %324 = vector.shape_cast %323 : vector<1x32x16xbf16> to vector<32x16xbf16>
    %cst_134 = arith.constant 0.000000e+00 : f32
    %325 = vector.broadcast %cst_134 : f32 to vector<16x128xf32>
    %326 = arith.maximumf %322, %325 : vector<16x128xf32>
    %327 = arith.truncf %326 : vector<16x128xf32> to vector<16x128xbf16>
    %cst_135 = arith.constant dense<0.000000e+00> : vector<32x128xf32>
    %328 = tpu.matmul %324, %327, %cst_135 {dimension_numbers = #tpu.dot_dimension_numbers<[1], [0], [0], [1], [0, 0, 1, 1], [], []>} : vector<32x16xbf16>, vector<16x128xbf16>, vector<32x128xf32> -> vector<32x128xf32>
    %c2_136 = arith.constant 2 : index
    %c0_137 = arith.constant 0 : index
    %c0_138 = arith.constant 0 : index
    %329 = vector.load %arg15[%c2_136, %c0_137, %c0_138] : memref<3x32x1xf32, #tpu.memory_space<vmem>>, vector<1x32x1xf32>
    %330 = vector.shape_cast %329 : vector<1x32x1xf32> to vector<32x1xf32>
    %331 = vector.broadcast %330 : vector<32x1xf32> to vector<32x128xf32>
    %332 = arith.addf %328, %331 : vector<32x128xf32>
    %333 = vector.broadcast %6 : vector<1x128xf32> to vector<32x128xf32>
    %334 = arith.mulf %332, %333 : vector<32x128xf32>
    %cst_139 = arith.constant 1.000000e+00 : f32
    %335 = vector.broadcast %cst_139 : f32 to vector<32x128xf32>
    %336 = arith.mulf %335, %334 : vector<32x128xf32>
    %337 = arith.addf %336, %272 : vector<32x128xf32>
    %c2_140 = arith.constant 2 : index
    %c0_141 = arith.constant 0 : index
    %c0_142 = arith.constant 0 : index
    %338 = vector.load %arg16[%c2_140, %c0_141, %c0_142] : memref<3x32x32xbf16, #tpu.memory_space<vmem>>, vector<1x32x32xbf16>
    %339 = vector.shape_cast %338 : vector<1x32x32xbf16> to vector<32x32xbf16>
    %340 = arith.truncf %337 : vector<32x128xf32> to vector<32x128xbf16>
    %cst_143 = arith.constant dense<0.000000e+00> : vector<32x128xf32>
    %341 = tpu.matmul %339, %340, %cst_143 {dimension_numbers = #tpu.dot_dimension_numbers<[1], [0], [0], [1], [0, 0, 1, 1], [], []>} : vector<32x32xbf16>, vector<32x128xbf16>, vector<32x128xf32> -> vector<32x128xf32>
    %c2_144 = arith.constant 2 : index
    %c0_145 = arith.constant 0 : index
    %c0_146 = arith.constant 0 : index
    %342 = vector.load %arg17[%c2_144, %c0_145, %c0_146] : memref<3x32x1xf32, #tpu.memory_space<vmem>>, vector<1x32x1xf32>
    %343 = vector.shape_cast %342 : vector<1x32x1xf32> to vector<32x1xf32>
    %344 = vector.broadcast %343 : vector<32x1xf32> to vector<32x128xf32>
    %345 = arith.addf %341, %344 : vector<32x128xf32>
    %346 = arith.addf %243, %345 : vector<32x128xf32>
    %347 = vector.broadcast %6 : vector<1x128xf32> to vector<32x128xf32>
    %348 = arith.mulf %346, %347 : vector<32x128xf32>
    %c0_147 = arith.constant 0 : index
    %c0_148 = arith.constant 0 : index
    %c0_149 = arith.constant 0 : index
    %349 = vector.load %arg19[%c0_147, %c0_148, %c0_149] : memref<1x32x128xf32, #tpu.memory_space<vmem>>, vector<1x32x128xf32>
    %350 = vector.shape_cast %349 : vector<1x32x128xf32> to vector<32x128xf32>
    %351 = vector.shape_cast %348 : vector<32x128xf32> to vector<1x32x128xf32>
    tpu.vector_store %arg19[%c0_147, %c0_148, %c0_149], %351 {strides = array<i32>} : memref<1x32x128xf32, #tpu.memory_space<vmem>>, vector<1x32x128xf32>,
    %c0_150 = arith.constant 0 : index
    %c0_151 = arith.constant 0 : index
    %352 = vector.load %arg6[%c0_150, %c0_151] : memref<8x32xbf16, #tpu.memory_space<vmem>>, vector<8x32xbf16>
    %353 = arith.truncf %348 : vector<32x128xf32> to vector<32x128xbf16>
    %cst_152 = arith.constant dense<0.000000e+00> : vector<8x128xf32>
    %354 = tpu.matmul %352, %353, %cst_152 {dimension_numbers = #tpu.dot_dimension_numbers<[1], [0], [0], [1], [0, 0, 1, 1], [], []>} : vector<8x32xbf16>, vector<32x128xbf16>, vector<8x128xf32> -> vector<8x128xf32>
    %c0_153 = arith.constant 0 : index
    %c0_154 = arith.constant 0 : index
    %355 = vector.load %arg7[%c0_153, %c0_154] : memref<8x1xf32, #tpu.memory_space<vmem>>, vector<8x1xf32>
    %356 = vector.broadcast %355 : vector<8x1xf32> to vector<8x128xf32>
    %357 = arith.addf %354, %356 : vector<8x128xf32>
    %358 = vector.broadcast %6 : vector<1x128xf32> to vector<8x128xf32>
    %359 = arith.mulf %357, %358 : vector<8x128xf32>
    %c0_155 = arith.constant 0 : index
    %c0_156 = arith.constant 0 : index
    %c0_157 = arith.constant 0 : index
    %360 = vector.load %arg18[%c0_155, %c0_156, %c0_157] : memref<1x8x128xf32, #tpu.memory_space<vmem>>, vector<1x8x128xf32>
    %361 = vector.shape_cast %360 : vector<1x8x128xf32> to vector<8x128xf32>
    %362 = vector.shape_cast %359 : vector<8x128xf32> to vector<1x8x128xf32>
    tpu.vector_store %arg18[%c0_155, %c0_156, %c0_157], %362 {strides = array<i32>} : memref<1x8x128xf32, #tpu.memory_space<vmem>>, vector<1x8x128xf32>,
    return
  }
  func.func @transform_0(%arg0: i32) -> (i32, i32, i32) {
    %c0_i32 = arith.constant 0 : i32
    %c0_i32_0 = arith.constant 0 : i32
    %c0_i32_1 = arith.constant 0 : i32
    return %arg0, %c0_i32, %c0_i32_0 : i32, i32, i32
  }
  func.func @transform_1(%arg0: i32) -> (i32, i32, i32) {
    %c0_i32 = arith.constant 0 : i32
    %c0_i32_0 = arith.constant 0 : i32
    %c0_i32_1 = arith.constant 0 : i32
    return %arg0, %c0_i32, %c0_i32_0 : i32, i32, i32
  }
  func.func @transform_2(%arg0: i32) -> (i32, i32, i32) {
    %c0_i32 = arith.constant 0 : i32
    %c0_i32_0 = arith.constant 0 : i32
    %c0_i32_1 = arith.constant 0 : i32
    return %arg0, %c0_i32, %c0_i32_0 : i32, i32, i32
  }
  func.func @transform_3(%arg0: i32) -> (i32, i32) {
    %c0_i32 = arith.constant 0 : i32
    %c0_i32_0 = arith.constant 0 : i32
    %c0_i32_1 = arith.constant 0 : i32
    return %c0_i32, %c0_i32_0 : i32, i32
  }
  func.func @transform_4(%arg0: i32) -> (i32, i32) {
    %c0_i32 = arith.constant 0 : i32
    %c0_i32_0 = arith.constant 0 : i32
    %c0_i32_1 = arith.constant 0 : i32
    return %c0_i32, %c0_i32_0 : i32, i32
  }
  func.func @transform_5(%arg0: i32) -> (i32, i32) {
    %c0_i32 = arith.constant 0 : i32
    %c0_i32_0 = arith.constant 0 : i32
    %c0_i32_1 = arith.constant 0 : i32
    return %c0_i32, %c0_i32_0 : i32, i32
  }
  func.func @transform_6(%arg0: i32) -> (i32, i32) {
    %c0_i32 = arith.constant 0 : i32
    %c0_i32_0 = arith.constant 0 : i32
    %c0_i32_1 = arith.constant 0 : i32
    return %c0_i32, %c0_i32_0 : i32, i32
  }
  func.func @transform_7(%arg0: i32) -> (i32, i32, i32) {
    %c0_i32 = arith.constant 0 : i32
    %c0_i32_0 = arith.constant 0 : i32
    %c0_i32_1 = arith.constant 0 : i32
    %c0_i32_2 = arith.constant 0 : i32
    return %c0_i32, %c0_i32_0, %c0_i32_1 : i32, i32, i32
  }
  func.func @transform_8(%arg0: i32) -> (i32, i32, i32) {
    %c0_i32 = arith.constant 0 : i32
    %c0_i32_0 = arith.constant 0 : i32
    %c0_i32_1 = arith.constant 0 : i32
    %c0_i32_2 = arith.constant 0 : i32
    return %c0_i32, %c0_i32_0, %c0_i32_1 : i32, i32, i32
  }
  func.func @transform_9(%arg0: i32) -> (i32, i32, i32) {
    %c0_i32 = arith.constant 0 : i32
    %c0_i32_0 = arith.constant 0 : i32
    %c0_i32_1 = arith.constant 0 : i32
    %c0_i32_2 = arith.constant 0 : i32
    return %c0_i32, %c0_i32_0, %c0_i32_1 : i32, i32, i32
  }
  func.func @transform_10(%arg0: i32) -> (i32, i32, i32) {
    %c0_i32 = arith.constant 0 : i32
    %c0_i32_0 = arith.constant 0 : i32
    %c0_i32_1 = arith.constant 0 : i32
    %c0_i32_2 = arith.constant 0 : i32
    return %c0_i32, %c0_i32_0, %c0_i32_1 : i32, i32, i32
  }
  func.func @transform_11(%arg0: i32) -> (i32, i32) {
    %c0_i32 = arith.constant 0 : i32
    %c0_i32_0 = arith.constant 0 : i32
    %c0_i32_1 = arith.constant 0 : i32
    return %c0_i32, %c0_i32_0 : i32, i32
  }
  func.func @transform_12(%arg0: i32) -> (i32, i32) {
    %c0_i32 = arith.constant 0 : i32
    %c0_i32_0 = arith.constant 0 : i32
    %c0_i32_1 = arith.constant 0 : i32
    return %c0_i32, %c0_i32_0 : i32, i32
  }
  func.func @transform_13(%arg0: i32) -> (i32, i32, i32) {
    %c0_i32 = arith.constant 0 : i32
    %c0_i32_0 = arith.constant 0 : i32
    %c0_i32_1 = arith.constant 0 : i32
    %c0_i32_2 = arith.constant 0 : i32
    return %c0_i32, %c0_i32_0, %c0_i32_1 : i32, i32, i32
  }
  func.func @transform_14(%arg0: i32) -> (i32, i32, i32) {
    %c0_i32 = arith.constant 0 : i32
    %c0_i32_0 = arith.constant 0 : i32
    %c0_i32_1 = arith.constant 0 : i32
    %c0_i32_2 = arith.constant 0 : i32
    return %c0_i32, %c0_i32_0, %c0_i32_1 : i32, i32, i32
  }
  func.func @transform_15(%arg0: i32) -> (i32, i32, i32) {
    %c0_i32 = arith.constant 0 : i32
    %c0_i32_0 = arith.constant 0 : i32
    %c0_i32_1 = arith.constant 0 : i32
    %c0_i32_2 = arith.constant 0 : i32
    return %c0_i32, %c0_i32_0, %c0_i32_1 : i32, i32, i32
  }
  func.func @transform_16(%arg0: i32) -> (i32, i32, i32) {
    %c0_i32 = arith.constant 0 : i32
    %c0_i32_0 = arith.constant 0 : i32
    %c0_i32_1 = arith.constant 0 : i32
    %c0_i32_2 = arith.constant 0 : i32
    return %c0_i32, %c0_i32_0, %c0_i32_1 : i32, i32, i32
  }
  func.func @transform_17(%arg0: i32) -> (i32, i32, i32) {
    %c0_i32 = arith.constant 0 : i32
    %c0_i32_0 = arith.constant 0 : i32
    %c0_i32_1 = arith.constant 0 : i32
    return %arg0, %c0_i32, %c0_i32_0 : i32, i32, i32
  }
  func.func @transform_18(%arg0: i32) -> (i32, i32, i32) {
    %c0_i32 = arith.constant 0 : i32
    %c0_i32_0 = arith.constant 0 : i32
    %c0_i32_1 = arith.constant 0 : i32
    return %arg0, %c0_i32, %c0_i32_0 : i32, i32, i32
  }
}

</mosaic_0001>

<bundles_post_ra>
// kernel: decoder_forward.1
= control target key start
LH: loop header
LB: loop body
LE: loop exit
PB: predicated region body
PF: predicated region fallthrough
CT: control target
= control target key end

     0   :  { %s5977_s0 = inlined_call_operand.vmem [shape: f32[2,12,128], index: 0, kind: input, shape index: {}]   ;;  %s5978_s1 = inlined_call_operand.vmem [shape: bf16[2,32,128], index: 1, kind: input, shape index: {}]   ;;  %s5979_s2 = inlined_call_operand.vmem [shape: f32[2,1,128], index: 2, kind: input, shape index: {}]   ;;  %s5980_s3 = inlined_call_operand.vmem [shape: bf16[32,12], index: 3, kind: input, shape index: {}]   ;;  %s5981_s4 = inlined_call_operand.vmem [shape: f32[32,1], index: 4, kind: input, shape index: {}]   ;;  %s5982_s5 = inlined_call_operand.vmem [shape: bf16[8,32], index: 5, kind: input, shape index: {}]   ;;  %s5983_s6 = inlined_call_operand.vmem [shape: f32[8,1], index: 6, kind: input, shape index: {}]   ;;  %s5984_s7 = inlined_call_operand.vmem [shape: bf16[3,96,32], index: 7, kind: input, shape index: {}]   ;;  %s5985_s8 = inlined_call_operand.vmem [shape: f32[3,32,1], index: 8, kind: input, shape index: {}]   ;;  %s5986_s9 = inlined_call_operand.vmem [shape: bf16[3,32,32], index: 9, kind: input, shape index: {}]   ;;  %s5987_s10 = inlined_call_operand.vmem [shape: f32[3,32,1], index: 10, kind: input, shape index: {}]   ;;  %s5988_s11 = inlined_call_operand.vmem [shape: bf16[48,32], index: 11, kind: input, shape index: {}]   ;;  %s5989_s12 = inlined_call_operand.vmem [shape: f32[48,1], index: 12, kind: input, shape index: {}]   ;;  %s5990_s13 = inlined_call_operand.vmem [shape: bf16[3,32,16], index: 13, kind: input, shape index: {}]   ;;  %s5991_s14 = inlined_call_operand.vmem [shape: f32[3,32,1], index: 14, kind: input, shape index: {}]   ;;  %s5992_s15 = inlined_call_operand.vmem [shape: bf16[3,32,32], index: 15, kind: input, shape index: {}]   ;;  %s5993_s16 = inlined_call_operand.vmem [shape: f32[3,32,1], index: 16, kind: input, shape index: {}]   ;;  %s5994_s17 = inlined_call_operand.vmem [shape: f32[2,8,128], index: 17, kind: output, shape index: {0}]   ;;  %s5995_s18 = inlined_call_operand.hbm [shape: f32[2,32,128], index: 18, kind: output, shape index: {1}]  }
   0x1   :  { %6003 = sst [smem:[#allocation11_spill]] %s5977_s0 }
   0x2   :  { %6004 = sst [smem:[#allocation12_spill]] %s5978_s1 }
   0x3   :  { %6005 = sst [smem:[#allocation13_spill]] %s5979_s2 }
   0x4   :  { %6006 = sst [smem:[#allocation14_spill]] %s5994_s17 }
   0x5   :  { %6007 = sst [smem:[#allocation15_spill]] %s5995_s18 }
   0x6   :  { %24 = vsyncpa [#allocation3], 0 }
   0x7   :  { %26 = vsyncpa [#allocation3 + $0x1], 0  ;;  %s4898_s27 = smov 0   ;;  %s4900_s28 = smov 0  }
   0x8   :  { %s4902_s29 = smov 0   ;;  %s4904_s30 = smov 0  }
   0x9 LB: > { %6008 = sst [smem:[#allocation5_spill]] %s4777_s27  ;;  %s4919_s0 = sadd.s32 4294967295, %s4789_s30   ;;  %s4789_s30 = sphi %s4904_s30, %s6024_s30   ;;  %s4785_s29 = sphi %s4902_s29, %s6026_s29   ;;  %s4781_s28 = sphi %s4900_s28, %s6028_s28   ;;  %s4777_s27 = sphi %s4898_s27, %s6027_s27  }
   0xa   : > { %6009 = sst [smem:[#allocation6_spill]] %s4785_s29  ;;  %s3819_s19 = sadd.s32 4294967294, %s4789_s30  }
   0xb   : > { %6010 = sst [smem:[#allocation7_spill]] %s4789_s30  ;;  %s4923_s1 = sadd.s32 1, %s4789_s30  }
   0xc   : > { %6011 = sst [smem:[#allocation8_spill]] %s4923_s1  ;;  %s437_s20 = sadd.s32 1, %s4785_s29 }
   0xd   : > { %s434_s21 = ssub.s32 %s4789_s30, %s4923_s1  ;;  %p447_p0 = scmp.ne.s32.totalorder %s4785_s29, %s4781_s28 }
   0xe   : > { %p435_p1 = scmp.eq.s32.totalorder %s434_s21, 0  ;;  %p448_p2 = scmp.eq.s32.totalorder %s4919_s0, 1 }
   0xf   : > { %p453_p3 = scmp.ne.s32.totalorder %s4781_s28, %s4777_s27  ;;  %p454_p4 = scmp.eq.s32.totalorder %s3819_s19, 1 }
  0x10   : > { %s4934_s22 = scalar_select %p435_p1, %s4785_s29, %s437_s20  }
  0x11   : > { %p4936_p5 = por %p448_p2, %p447_p0  ;;  %p4940_p6 = por %p454_p4, %p453_p3 }
  0x12   : > { %6012 = sst [smem:[#allocation9_spill]] %s4934_s22  ;;  %p3822_p7 = scmp.ge.s32.totalorder %s4789_s30, 1 }
  0x13   : > { %s6014_s23 = scalar_select %p4940_p6, 1, 0 }
  0x14   : > { %p536_p8 = scmp.lt.s32.totalorder %s4789_s30, 3 }
  0x15   : > { %6015 = sst [smem:[#allocation10_spill]] %s6014_s23 }
  0x16   : > { %p537_p9 = pnand %p3822_p7, %p536_p8 }
  0x17   : > { %p602_p10 = scmp.lt.s32.totalorder (!%p537_p9), %s4919_s0, 1  ;;  %v628_v0 = vlaneseq (!%p537_p9)  ;;  %v4466_v1 = vld [vmem:[%s5980_s3] sm:$0xff] (!%p537_p9)   ;;  %vm676_vm0 = vcmask (!%p537_p9), 97280   ;;  %v4791_v2 = vmov (!%p537_p9), 0.0   ;;  %v4792_v4 = vmov (!%p537_p9), 0   ;;  %v644_v6 = vld [vmem:[%s5981_s4 + $0x10] sm:$0xff] (!%p537_p9) }
  0x18   : > { %540 = sbr.rel (%p537_p9) target bundleno = 6922 (0x1b0a), region = 88  ;;  %4161 = vmatprep.subr.bf16.mxu1 (!%p537_p9), %v4791_v2  ;;  %4157 = vmatprep.mubr.msk.bf16.mxu0 (!%p537_p9), %vm676_vm0, %v4466_v1  ;;  %v642_v5 = vld [vmem:[%s5981_s4] sm:$0xff] (!%p537_p9)  ;;  %s6016_s1 = sld [smem:[#allocation13_spill]] (!%p537_p9)  ;;  %v643_v9 = vld [vmem:[%s5981_s4 + $0x8] sm:$0xff] (!%p537_p9)  ;;  %v645_v10 = vld [vmem:[%s5981_s4 + $0x18] sm:$0xff] (!%p537_p9)  ;;  %vm683_vm1 = vcmask (!%p537_p9), 1045504  }
  0x19   : > { %v4954_v3 = vshrl.u32 (!%p537_p9), %v628_v0, 7  ;;  %4464 = vset.pattern.permute.xlu0 (!%p537_p9), %v4792_v4  ;;  %4465 = vset.pattern.permute.xlu1 (!%p537_p9), %v4792_v4  ;;  %s6017_s17 = sld [smem:[#allocation11_spill]] (!%p537_p9)  ;;  %v4467_v15 = vld [vmem:[%s5980_s3 + $0x8] sm:$0xff] (!%p537_p9)   ;;  %v1072_v16 = vld [vmem:[%s5985_s8] sm:$0xff] (!%p537_p9)  ;;  %s6018_s19 = sld [smem:[#allocation12_spill]] (!%p537_p9)  ;;  %v1074_v19 = vld [vmem:[%s5985_s8 + $0x10] sm:$0xff] (!%p537_p9) }
  0x1a   : > { %648 = vperm.xlu0 (!%p537_p9), %4464, %v642_v5   ;;  %658 = vperm.xlu1 (!%p537_p9), %4465, %v644_v6   ;;  %v1073_v18 = vld [vmem:[%s5985_s8 + $0x8] sm:$0xff] (!%p537_p9)  ;;  %v1075_v20 = vld [vmem:[%s5985_s8 + $0x18] sm:$0xff] (!%p537_p9)  ;;  %vm809_vm2 = vcmask (!%p537_p9), 261120   ;;  %v4468_v21 = vld [vmem:[%s5984_s7] sm:$0xff] (!%p537_p9)   ;;  %v5010_v22 = vand.u32 (!%p537_p9), 127, %v628_v0  ;;  %s4793_s29 = smov (!%p537_p9), 1  }
  0x1b   : > { %v879_v7 = vsub.s32 (!%p537_p9), 0, %v4954_v3  ;;  %v4469_v42 = vld [vmem:[%s5984_s7 + $0x8] sm:$0xff] (!%p537_p9)   ;;  %v4470_v43 = vld [vmem:[%s5984_s7 + $0x10] sm:$0xff] (!%p537_p9)   ;;  %v4471_v44 = vld [vmem:[%s5984_s7 + $0x18] sm:$0xff] (!%p537_p9)   ;;  %s4794_s30 = smov (!%p537_p9), 127   ;;  %vm1281_vm6 = vcmask (!%p537_p9), 130048  }
  0x1c   : > { %vm630_vm3 = vcmp.lt.s32.totalorder (!%p537_p9), %v5010_v22, 64  ;;  %v4472_v45 = vld [vmem:[%s5984_s7 + $0x20] sm:$0xff] (!%p537_p9)   ;;  %v4473_v46 = vld [vmem:[%s5984_s7 + $0x28] sm:$0xff] (!%p537_p9)   ;;  %vm1042_vm4 = vcmp.ge.s32.totalorder (!%p537_p9), %v5010_v22, 1  ;;  %vm1057_vm5 = vcmp.lt.s32.totalorder (!%p537_p9), %v5010_v22, 127  ;;  %vm4795_vm7 = vmmov (!%p537_p9), 0  }
  0x1d   : > { %v5014_v30 = vsel (!%p537_p9), %vm630_vm3, 1.0, %v4791_v2  ;;  %v3854_v4 = vsel (!%p537_p9), %vm1042_vm4, 1.0, %v4791_v2  ;;  %4165 = vmatprep.mubr.msk.bf16.mxu1 (!%p537_p9), %vm4795_vm7, %v4791_v2  ;;  %vm1955_vm9 = vcmp.ge.s32.totalorder (!%p537_p9), %v5010_v22, 2  ;;  %vm1970_vm10 = vcmp.lt.s32.totalorder (!%p537_p9), %v5010_v22, 126  ;;  %s599_s22 = sand.u32 (!%p537_p9), 1, %s4781_s28   ;;  %s4032_s27 = sshll.u32 (!%p537_p9), %s4919_s0, 9 }
  0x1e   : > { %653 = vperm.xlu0 (!%p537_p9), %4464, %v643_v9   ;;  %663 = vperm.xlu1 (!%p537_p9), %4465, %v645_v10   ;;  %v3855_v9 = vsel (!%p537_p9), %vm1057_vm5, 1.0, %v4791_v2  ;;  %vm633_vm8 = vcmp.gt.f32.partialorder (!%p537_p9), %v5014_v30, 0.0  ;;  %vm2870_vm11 = vcmp.ge.s32.totalorder (!%p537_p9), %v5010_v22, 4  ;;  %vm2885_vm12 = vcmp.lt.s32.totalorder (!%p537_p9), %v5010_v22, 124 }
  0x1f   : > { %s4952_s26 = scalar_select %p602_p10, %s4919_s0, 1 }
  0x21   : > { %s4030_s25 = sshll.u32 %s4952_s26, 4  ;;  %s614_s23 = scalar_lea.vmem %s6016_s1, %s4952_s26 }
  0x22   : > { %s606_s18 = scalar_lea.vmem %s6017_s17, %s4030_s25  ;;  %v4972_v8 = vld [vmem:[%s614_s23] sm:$0x1]  ;;  %s4997_s20 = scalar_lea.vmem %s6018_s19, %s4030_s25  ;;  %1078 = vperm.xlu0 %4464, %v1072_v16   ;;  %1083 = vperm.xlu1 %4465, %v1073_v18  }
  0x23   : > { %v620_v11 = vld [vmem:[%s606_s18] sm:$0xff]  ;;  %v621_v12 = vld [vmem:[%s606_s18 + $0x8] sm:$0xf]  ;;  %v4983_v13 = vrot.slane %v4972_v8, %v879_v7  ;;  %s4797_s1 = smov 126   ;;  %s4799_s25 = smov 124  }
  0x24   : > { %v622_v14 = vpack.c.bf16 %v621_v12, %v620_v11  ;;  %s3823_s23 = sshll.u32 %s599_s22, 5 }
  0x25   : > { %s601_s19 = scalar_lea.vmem [#allocation2], %s3823_s23  ;;  %s4800_s23 = smov [#allocation2]  }
  0x26   : > { %4413 = vmatprep.subr.msk.bf16.mxu0 %vm683_vm1, %v622_v14  ;;  %v685_v17 = vsel %vm683_vm1, %v622_v14, 0  ;;  %1088 = vperm.xlu0 %4464, %v1074_v19   ;;  %s3712_s17 = sshll.u32 %s601_s19, 4  ;;  %s5921_s17 = int_to_ptr.vmem [resolvable:$true] %s3712_s17 }
  0x27   : > { %4156 = vmatpush3.bf16.msra.mxu0 %v685_v17  ;;  %1093 = vperm.xlu1 %4465, %v1075_v20  }
  0x2a   : > { %4158 = vmatmul.mubr.msk.bf16.vlgmr.msra.gmra.mrb[0].mxu0 %vm676_vm0, %v4467_v15 }
  0x2b   : > { %4181 = vmatprep.mubr.msk.bf16.mxu0 %vm809_vm2, %v4468_v21 }
  0x99   : > { %v659_v23 = vpop.permute.xlu1 %658  ;;  %v649_v24 = vpop.permute.xlu0 %648 }
  0x9d   : > { %v664_v27 = vpop.permute.xlu1 %663  ;;  %v654_v31 = vpop.permute.xlu0 %653 }
  0xa1   : > { %v1079_v59 = vpop.permute.xlu0 %1078  ;;  %v1084_v60 = vpop.permute.xlu1 %1083 }
  0xa5   : > { %v1089_v61 = vpop.permute.xlu0 %1088 }
  0xa6   : > { %v1094_v62 = vpop.permute.xlu1 %1093 }
  0xfd   : > { %v4159_v25 = vpop.f32.mrb[0].mxu0 }
  0xfe   : > { %v721_v26 = vpop.f32.mrb[1].mxu0  ;;  %v730_v34 = vadd.f32 %v4159_v25, %v659_v23 }
  0xff   : > { %v722_v28 = vadd.f32 %v721_v26, %v649_v24  ;;  %v4160_v29 = vpop.f32.mrb[2].mxu0 }
 0x100   : > { %v733_v32 = vadd.f32 %v4160_v29, %v664_v27  ;;  %v724_v33 = vpop.f32.mrb[3].mxu0  ;;  %v5026_v39 = vmul.f32 %v5014_v30, %v730_v34 }
 0x101   : > { %v725_v35 = vadd.f32 %v724_v33, %v654_v31  ;;  %v5017_v36 = vmul.f32 %v5014_v30, %v722_v28 }
 0x102   : > { %v5020_v37 = vmul.f32 %v5014_v30, %v733_v32 }
 0x103   : > { %v5023_v38 = vmul.f32 %v5014_v30, %v725_v35 }
 0x104   : > { %v904_v41 = vpack.c.bf16 %v5020_v37, %v5026_v39 }
 0x105   : > { %v903_v40 = vpack.c.bf16 %v5023_v38, %v5017_v36 }
 0x107   : > { %4177 = vmatprep.subr.bf16.mxu0 %v903_v40 }
 0x108   : > { %4178 = vmatpush3.bf16.msra.mxu0 %v903_v40 }
 0x109   : > { %4179 = vmatprep.subr.bf16.mxu0 %v904_v41 }
 0x10c   : > { %4180 = vmatpush3.bf16.msra.mxu0 %v904_v41 }
 0x10f   : > { %4182 = vmatmul.mubr.msk.bf16.vlgmr.msra.gmra.mrb[4].mxu0 %vm809_vm2, %v4469_v42 }
 0x110   : > { %4185 = vmatprep.mubr.msk.bf16.mxu0 %vm809_vm2, %v4470_v43 }
 0x117   : > { %4186 = vmatmul.mubr.msk.bf16.gmra.mrb[8].mxu0 %vm809_vm2, %v4471_v44 }
 0x118   : > { %4189 = vmatprep.mubr.msk.bf16.mxu0 %vm809_vm2, %v4472_v45 }
 0x11f   : > { %4190 = vmatmul.mubr.msk.bf16.gmra.mrb[12].mxu0 %vm809_vm2, %v4473_v46 }
 0x1e2   : > { %v4183_v47 = vpop.f32.mrb[4].mxu0 }
 0x1e3   : > { %1038 = vrot.lane.b32.xlu0 %v4183_v47, %s4793_s29  ;;  %v987_v48 = vpop.f32.mrb[5].mxu0 }
 0x1e4   : > { %v4184_v49 = vpop.f32.mrb[6].mxu0 }
 0x1e5   : > { %1040 = vrot.lane.b32.xlu1 %v4184_v49, %s4793_s29  ;;  %v990_v50 = vpop.f32.mrb[7].mxu0 }
 0x1e7   : > { %1034 = vrot.lane.b32.xlu0 %v987_v48, %s4793_s29 }
 0x1e9   : > { %1036 = vrot.lane.b32.xlu1 %v990_v50, %s4793_s29 }
 0x1ea   : > { %v4187_v51 = vpop.f32.mrb[8].mxu0 }
 0x1eb   : > { %v1003_v52 = vpop.f32.mrb[9].mxu0 }
 0x1ec   : > { %v4188_v53 = vpop.f32.mrb[10].mxu0 }
 0x1ed   : > { %v1006_v54 = vpop.f32.mrb[11].mxu0 }
 0x1f2   : > { %v4191_v55 = vpop.f32.mrb[12].mxu0 }
 0x1f3   : > { %v1019_v56 = vpop.f32.mrb[13].mxu0 }
 0x1f4   : > { %1049 = vrot.lane.b32.xlu0 %v1019_v56, %s4794_s30  ;;  %v4192_v57 = vpop.f32.mrb[14].mxu0  ;;  %v4474_v56 = vld [vmem:[%s5986_s9] sm:$0xff]  }
 0x1f5   : > { %v1022_v58 = vpop.f32.mrb[15].mxu0  ;;  %4197 = vmatprep.mubr.msk.bf16.mxu0 %vm809_vm2, %v4474_v56 }
 0x1f6   : > { %1051 = vrot.lane.b32.xlu1 %v1022_v58, %s4794_s30 }
 0x1f8   : > { %1053 = vrot.lane.b32.xlu0 %v4191_v55, %s4794_s30  ;;  %v1171_v55 = vld [vmem:[%s5987_s10 + $0x8] sm:$0xff] }
 0x1fa   : > { %1055 = vrot.lane.b32.xlu1 %v4192_v57, %s4794_s30  ;;  %s4798_s30 = smov 4  }
 0x255   : > { %v1039_v63 = vpop.permute.xlu0 %1038 }
 0x256   : > { %v1047_v12 = vmul.f32 %v3854_v4, %v1039_v63 }
 0x257   : > { %v1041_v0 = vpop.permute.xlu1 %1040 }
 0x258   : > { %v1048_v16 = vmul.f32 %v3854_v4, %v1041_v0  ;;  %v1066_v23 = vadd.f32 %v4187_v51, %v1047_v12 }
 0x259   : > { %v1035_v1 = vpop.permute.xlu0 %1034 }
 0x25a   : > { %v1045_v6 = vmul.f32 %v3854_v4, %v1035_v1  ;;  %v1067_v27 = vadd.f32 %v4188_v53, %v1048_v16  ;;  %v1172_v53 = vld [vmem:[%s5987_s10 + $0x10] sm:$0xff] }
 0x25b   : > { %v1037_v5 = vpop.permute.xlu1 %1036 }
 0x25c   : > { %v1046_v10 = vmul.f32 %v3854_v4, %v1037_v5  ;;  %v1064_v14 = vadd.f32 %v1045_v6, %v1003_v52  ;;  %v1170_v52 = vld [vmem:[%s5987_s10] sm:$0xff] }
 0x25e   : > { %v1065_v18 = vadd.f32 %v1046_v10, %v1006_v54  ;;  %v1173_v54 = vld [vmem:[%s5987_s10 + $0x18] sm:$0xff] }
 0x266   : > { %v1050_v11 = vpop.permute.xlu0 %1049 }
 0x267   : > { %v1060_v15 = vmul.f32 %v3855_v9, %v1050_v11 }
 0x268   : > { %v1052_v17 = vpop.permute.xlu1 %1051 }
 0x269   : > { %v1068_v19 = vadd.f32 %v1064_v14, %v1060_v15  ;;  %v1061_v20 = vmul.f32 %v3855_v9, %v1052_v17 }
 0x26a   : > { %v1054_v21 = vpop.permute.xlu0 %1053 }
 0x26b   : > { %v1096_v24 = vadd.f32 %v1079_v59, %v1068_v19  ;;  %v1069_v25 = vadd.f32 %v1065_v18, %v1061_v20  ;;  %v1062_v26 = vmul.f32 %v3855_v9, %v1054_v21 }
 0x26c   : > { %v1056_v28 = vpop.permute.xlu1 %1055 }
 0x26d   : > { %v5056_v29 = vmax.f32 %v1096_v24, 0.0  ;;  %v1097_v31 = vadd.f32 %v1084_v60, %v1069_v25  ;;  %v1070_v32 = vadd.f32 %v1066_v23, %v1062_v26  ;;  %v1063_v33 = vmul.f32 %v3855_v9, %v1056_v28 }
 0x26f   : > { %v5058_v34 = vmax.f32 %v1097_v31, 0.0  ;;  %v1098_v35 = vadd.f32 %v1089_v61, %v1070_v32  ;;  %v1071_v40 = vadd.f32 %v1067_v27, %v1063_v33  ;;  %v1104_v41 = vmul.f32 %v5014_v30, %v5056_v29 }
 0x271   : > { %v5062_v42 = vmax.f32 %v1098_v35, 0.0  ;;  %v1099_v43 = vadd.f32 %v1094_v62, %v1071_v40  ;;  %1108 = vadd.xlane.f32.xlu0 %v1104_v41  ;;  %v1105_v44 = vmul.f32 %v5014_v30, %v5058_v34  ;;  %v1120_v49 = vmul.f32 %v1104_v41, %v5056_v29 }
 0x273   : > { %v5066_v45 = vmax.f32 %v1099_v43, 0.0  ;;  %1110 = vadd.xlane.f32.xlu1 %v1105_v44  ;;  %v1106_v46 = vmul.f32 %v5014_v30, %v5062_v42  ;;  %v1121_v50 = vmul.f32 %v1105_v44, %v5058_v34 }
 0x275   : > { %v1107_v47 = vmul.f32 %v5014_v30, %v5066_v45  ;;  %v1122_v48 = vmul.f32 %v1106_v46, %v5062_v42 }
 0x277   : > { %1112 = vadd.xlane.f32.xlu1 %v1106_v46  ;;  %1114 = vadd.xlane.f32.xlu0 %v1107_v47  ;;  %v1123_v51 = vmul.f32 %v1107_v47, %v5066_v45 }
 0x27b   : > { %1128 = vadd.xlane.f32.xlu1 %v1122_v48  ;;  %1124 = vadd.xlane.f32.xlu0 %v1120_v49 }
 0x27f   : > { %1126 = vadd.xlane.f32.xlu0 %v1121_v50 }
 0x283   : > { %1130 = vadd.xlane.f32.xlu0 %v1123_v51 }
 0x28c   : > { %1176 = vperm.xlu1 %4465, %v1170_v52  }
 0x290   : > { %1186 = vperm.xlu1 %4465, %v1172_v53  }
 0x294   : > { %1191 = vperm.xlu1 %4465, %v1173_v54   ;;  %v4475_v54 = vld [vmem:[%s5986_s9 + $0x8] sm:$0xff]  }
 0x299   : > { %1181 = vperm.xlu0 %4464, %v1171_v55  }
 0x2fe   : > { %v1109_v57 = vpop.xlane.xlu0 %1108 }
 0x2ff   : > { %v1116_v59 = vmul.f32 0.015625, %v1109_v57 }
 0x300   : > { %v1111_v58 = vpop.xlane.xlu1 %1110 }
 0x301   : > { %v1136_v63 = vmul.f32 %v1116_v59, %v1116_v59  ;;  %v1117_v4 = vmul.f32 0.015625, %v1111_v58  ;;  %v1148_v35 = vsub.f32 %v5056_v29, %v1116_v59 }
 0x303   : > { %v1137_v14 = vmul.f32 %v1117_v4, %v1117_v4  ;;  %v1149_v40 = vsub.f32 %v5058_v34, %v1117_v4 }
 0x304   : > { %v1115_v60 = vpop.xlane.xlu0 %1114  ;;  %v1113_v61 = vpop.xlane.xlu1 %1112 }
 0x305   : > { %v1118_v62 = vmul.f32 0.015625, %v1113_v61  ;;  %v1119_v15 = vmul.f32 0.015625, %v1115_v60 }
 0x307   : > { %v1138_v5 = vmul.f32 %v1118_v62, %v1118_v62  ;;  %v1139_v23 = vmul.f32 %v1119_v15, %v1119_v15  ;;  %v1151_v47 = vsub.f32 %v5066_v45, %v1119_v15  ;;  %v1150_v48 = vsub.f32 %v5062_v42, %v1118_v62 }
 0x308   : > { %v1125_v0 = vpop.xlane.xlu0 %1124  ;;  %v1129_v1 = vpop.xlane.xlu1 %1128 }
 0x309   : > { %v1132_v6 = vmul.f32 0.015625, %v1125_v0  ;;  %v1134_v9 = vmul.f32 0.015625, %v1129_v1 }
 0x30b   : > { %v1140_v10 = vsub.f32 %v1132_v6, %v1136_v63  ;;  %v1142_v11 = vsub.f32 %v1134_v9, %v1138_v5 }
 0x30c   : > { %v1127_v12 = vpop.xlane.xlu0 %1126  ;;  %v1177_v55 = vpop.permute.xlu1 %1176 }
 0x30d   : > { %v1144_v16 = vmax.f32 %v1140_v10, 0.0  ;;  %v1133_v17 = vmul.f32 0.015625, %v1127_v12  ;;  %v1146_v19 = vmax.f32 %v1142_v11, 0.0 }
 0x30f   : > { %v1152_v18 = vadd.f32 1e-05, %v1144_v16  ;;  %v1141_v20 = vsub.f32 %v1133_v17, %v1137_v14  ;;  %v1154_v26 = vadd.f32 1e-05, %v1146_v19  ;;  %v4477_v19 = vld [vmem:[%s4997_s20 + $0x8] sm:$0xff]  }
 0x310   : > { %v1131_v21 = vpop.xlane.xlu0 %1130  ;;  %v1187_v56 = vpop.permute.xlu1 %1186 }
 0x311   : > { %v1145_v24 = vmax.f32 %v1141_v20, 0.0  ;;  %v1135_v25 = vmul.f32 0.015625, %v1131_v21  ;;  %4509 = vrsqrt.f32 %v1152_v18  ;;  %v4476_v18 = vld [vmem:[%s4997_s20] sm:$0xff]   ;;  %v634_v21 = vadd.f32 1e-06, %v4972_v8  ;;  %s4796_s20 = smov 2  }
 0x312   : > { %4162 = vmatpush3.bf16.msra.mxu1 %v4476_v18  ;;  %v4478_v20 = vld [vmem:[%s5988_s11] sm:$0xff]  }
 0x313   : > { %v1153_v27 = vadd.f32 1e-05, %v1145_v24  ;;  %v1143_v28 = vsub.f32 %v1135_v25, %v1139_v23  ;;  %4163 = vmatprep.subr.bf16.mxu1 %v4791_v2 }
 0x314   : > { %v1192_v59 = vpop.permute.xlu1 %1191 }
 0x315   : > { %4511 = vrsqrt.f32 %v1153_v27  ;;  %v1147_v31 = vmax.f32 %v1143_v28, 0.0 }
 0x316   : > { %4513 = vrsqrt.f32 %v1154_v26  ;;  %4164 = vmatpush3.bf16.msra.mxu1 %v4477_v19 }
 0x317   : > { %v1155_v32 = vadd.f32 1e-05, %v1147_v31  ;;  %4219 = vmatprep.subr.bf16.mxu1 %v4791_v2 }
 0x318   : > { %v1182_v61 = vpop.permute.xlu0 %1181 }
 0x319   : > { %4515 = vrsqrt.f32 %v1155_v32  ;;  %4166 = vmatmul.mubr.msk.bf16.vlgmr.msra.gmra.mrb[0].mxu1 %vm809_vm2, %v4478_v20 }
 0x31a   : > { %4169 = vmatprep.mubr.msk.bf16.mxu1 %vm4795_vm7, %v4791_v2  ;;  %4517 = vlog2.f32 %v634_v21 }
 0x31b   : > { %v4510_v33 = vpop.eup %4509 }
 0x31c   : > { %v1160_v43 = vmul.f32 %v4510_v33, %v1148_v35 }
 0x31f   : > { %v4512_v41 = vpop.eup %4511 }
 0x320   : > { %v1161_v44 = vmul.f32 %v4512_v41, %v1149_v40  ;;  %v4514_v46 = vpop.eup %4513 }
 0x321   : > { %v1162_v51 = vmul.f32 %v4514_v46, %v1150_v48 }
 0x322   : > { %v1168_v49 = vpack.c.bf16 %v1161_v44, %v1160_v43 }
 0x323   : > { %v4516_v50 = vpop.eup %4515 }
 0x324   : > { %4193 = vmatprep.subr.bf16.mxu0 %v1168_v49  ;;  %v1163_v52 = vmul.f32 %v4516_v50, %v1151_v47  ;;  %v4518_v23 = vpop.eup %4517 }
 0x325   : > { %4194 = vmatpush3.bf16.msra.mxu0 %v1168_v49  ;;  %v636_v24 = vmul.f32 0.6931472, %v4518_v23 }
 0x326   : > { %v1169_v53 = vpack.c.bf16 %v1163_v52, %v1162_v51 }
 0x327   : > { %v637_v25 = vsel %vm633_vm8, %v636_v24, -1e+30 }
 0x328   : > { %4195 = vmatprep.subr.bf16.mxu0 %v1169_v53  ;;  %v5124_v26 = vrot.slane %v637_v25, %v879_v7 }
 0x329   : > { %4196 = vmatpush3.bf16.msra.mxu0 %v1169_v53 }
 0x32c   : > { %4198 = vmatmul.mubr.msk.bf16.vlgmr.msra.gmra.mrb[16].mxu0 %vm809_vm2, %v4475_v54 }
 0x3ff   : > { %v4199_v57 = vpop.f32.mrb[16].mxu0 }
 0x400   : > { %v1244_v58 = vpop.f32.mrb[17].mxu0  ;;  %v1253_v62 = vadd.f32 %v4199_v57, %v1187_v56 }
 0x401   : > { %v4200_v60 = vpop.f32.mrb[18].mxu0  ;;  %v1245_v1 = vadd.f32 %v1244_v58, %v1177_v55 }
 0x402   : > { %v1256_v63 = vadd.f32 %v4200_v60, %v1192_v59  ;;  %v1247_v0 = vpop.f32.mrb[19].mxu0 }
 0x403   : > { %v1248_v4 = vadd.f32 %v1247_v0, %v1182_v61 }
 0x404   : > { %v1260_v5 = vpack.c.bf16 %v1256_v63, %v1253_v62 }
 0x405   : > { %v1259_v6 = vpack.c.bf16 %v1248_v4, %v1245_v1 }
 0x406   : > { %4201 = vmatprep.subr.bf16.mxu0 %v1260_v5 }
 0x407   : > { %1265 = vxpose.xlu0.c.b16.start.end [1/1] (short) %v1259_v6, 128  ;;  %4202 = vmatpush3.bf16.msra.mxu0 %v1260_v5 }
 0x46d   : > { %v1273_v9 = vpop.trf.xlu0 }
 0x46e   : > { %4203 = vmatprep.mubr.msk.bf16.mxu0 %vm1281_vm6, %v1273_v9 }
 0x471   : > { %v1274_v10 = vpop.trf.xlu0 }
 0x472   : > { %4204 = vmatmul.mubr.msk.bf16.vlgmr.msra.gmra.mrb[20].mxu0 %vm1281_vm6, %v1274_v10 }
 0x475   : > { %v1275_v11 = vpop.trf.xlu0 }
 0x476   : > { %4207 = vmatprep.mubr.msk.bf16.mxu0 %vm1281_vm6, %v1275_v11 }
 0x479   : > { %v1276_v12 = vpop.trf.xlu0 }
 0x47a   : > { %4208 = vmatmul.mubr.msk.bf16.gmra.mrb[24].mxu0 %vm1281_vm6, %v1276_v12 }
 0x47d   : > { %v1277_v14 = vpop.trf.xlu0 }
 0x47e   : > { %4211 = vmatprep.mubr.msk.bf16.mxu0 %vm1281_vm6, %v1277_v14 }
 0x481   : > { %v1278_v15 = vpop.trf.xlu0 }
 0x482   : > { %4212 = vmatmul.mubr.msk.bf16.gmra.mrb[28].mxu0 %vm1281_vm6, %v1278_v15 }
 0x485   : > { %v1279_v16 = vpop.trf.xlu0 }
 0x486   : > { %4215 = vmatprep.mubr.msk.bf16.mxu0 %vm1281_vm6, %v1279_v16 }
 0x489   : > { %v1280_v17 = vpop.trf.xlu0 }
 0x48a   : > { %4216 = vmatmul.mubr.msk.bf16.gmra.mrb[32].mxu0 %vm1281_vm6, %v1280_v17 }
 0x545   : > { %v4205_v27 = vpop.f32.mrb[20].mxu0 }
 0x546   : > { %v1340_v28 = vpop.f32.mrb[21].mxu0  ;;  %v1349_v8 = vadd.f32 %v4205_v27, %v5124_v26 }
 0x547   : > { %v1341_v31 = vadd.f32 %v1340_v28, %v5124_v26  ;;  %v4206_v32 = vpop.f32.mrb[22].mxu0 }
 0x548   : > { %v1343_v33 = vpop.f32.mrb[23].mxu0  ;;  %v1352_v43 = vadd.f32 %v4206_v32, %v5124_v26 }
 0x549   : > { %v1344_v35 = vadd.f32 %v1343_v33, %v5124_v26  ;;  %1403 = vmax.xlane.f32.xlu1 %v1341_v31 }
 0x54b   : > { %1405 = vmax.xlane.f32.xlu0 %v1344_v35 }
 0x54d   : > { %1407 = vmax.xlane.f32.xlu1 %v1349_v8  ;;  %v4209_v40 = vpop.f32.mrb[24].mxu0 }
 0x54e   : > { %v1356_v41 = vpop.f32.mrb[25].mxu0  ;;  %v1365_v52 = vadd.f32 %v4209_v40, %v5124_v26 }
 0x54f   : > { %v4210_v3 = vpop.f32.mrb[26].mxu0  ;;  %v1357_v44 = vadd.f32 %v1356_v41, %v5124_v26 }
 0x550   : > { %v1359_v7 = vpop.f32.mrb[27].mxu0  ;;  %v1368_v55 = vadd.f32 %v4210_v3, %v5124_v26 }
 0x551   : > { %1409 = vmax.xlane.f32.xlu1 %v1352_v43  ;;  %v1360_v48 = vadd.f32 %v1359_v7, %v5124_v26 }
 0x555   : > { %v4213_v46 = vpop.f32.mrb[28].mxu0  ;;  %1411 = vmax.xlane.f32.xlu1 %v1357_v44 }
 0x556   : > { %v1372_v47 = vpop.f32.mrb[29].mxu0  ;;  %v5152_v62 = vadd.f32 %v4213_v46, %v5124_v26 }
 0x557   : > { %v4214_v49 = vpop.f32.mrb[30].mxu0  ;;  %v1373_v58 = vadd.f32 %v1372_v47, %v5124_v26 }
 0x558   : > { %v5133_v50 = vadd.f32 %v4214_v49, %v5124_v26  ;;  %v1375_v51 = vpop.f32.mrb[31].mxu0 }
 0x559   : > { %1413 = vmax.xlane.f32.xlu1 %v1360_v48  ;;  %v5147_v61 = vadd.f32 %v1375_v51, %v5124_v26 }
 0x55a   : > { %1425 = vmax.xlane.f32.xlu0 %v5133_v50 }
 0x55d   : > { %v4217_v53 = vpop.f32.mrb[32].mxu0  ;;  %1415 = vmax.xlane.f32.xlu1 %v1365_v52 }
 0x55e   : > { %v1388_v54 = vpop.f32.mrb[33].mxu0  ;;  %v5160_v0 = vadd.f32 %v4217_v53, %v5124_v26 }
 0x55f   : > { %v4218_v56 = vpop.f32.mrb[34].mxu0  ;;  %v5155_v63 = vadd.f32 %v1388_v54, %v5124_v26 }
 0x560   : > { %v1391_v57 = vpop.f32.mrb[35].mxu0  ;;  %v5143_v60 = vadd.f32 %v4218_v56, %v5124_v26 }
 0x561   : > { %v5140_v59 = vadd.f32 %v1391_v57, %v5124_v26  ;;  %1417 = vmax.xlane.f32.xlu1 %v1368_v55 }
 0x563   : > { %1429 = vmax.xlane.f32.xlu0 %v5140_v59 }
 0x565   : > { %1419 = vmax.xlane.f32.xlu1 %v1373_v58 }
 0x567   : > { %1433 = vmax.xlane.f32.xlu0 %v5143_v60 }
 0x569   : > { %1421 = vmax.xlane.f32.xlu1 %v5147_v61 }
 0x56d   : > { %1423 = vmax.xlane.f32.xlu1 %v5152_v62 }
 0x571   : > { %1427 = vmax.xlane.f32.xlu1 %v5155_v63 }
 0x575   : > { %1431 = vmax.xlane.f32.xlu1 %v5160_v0 }
 0x5d6   : > { %v1404_v1 = vpop.xlane.xlu1 %1403 }
 0x5d7   : > { %v1435_v4 = vsub.f32 %v1341_v31, %v1404_v1 }
 0x5d8   : > { %v1406_v5 = vpop.xlane.xlu0 %1405 }
 0x5d9   : > { %v1451_v6 = vmul.f32 1.442695, %v1435_v4  ;;  %v1436_v9 = vsub.f32 %v1344_v35, %v1406_v5 }
 0x5da   : > { %v1408_v10 = vpop.xlane.xlu1 %1407 }
 0x5db   : > { %4519 = vpow2.f32 %v1451_v6  ;;  %v1453_v11 = vmul.f32 1.442695, %v1436_v9  ;;  %v1437_v12 = vsub.f32 %v1349_v8, %v1408_v10 }
 0x5dd   : > { %4521 = vpow2.f32 %v1453_v11  ;;  %v1455_v14 = vmul.f32 1.442695, %v1437_v12 }
 0x5de   : > { %v1410_v15 = vpop.xlane.xlu1 %1409 }
 0x5df   : > { %4523 = vpow2.f32 %v1455_v14  ;;  %v1438_v16 = vsub.f32 %v1352_v43, %v1410_v15 }
 0x5e1   : > { %v1457_v17 = vmul.f32 1.442695, %v1438_v16 }
 0x5e2   : > { %v1412_v18 = vpop.xlane.xlu1 %1411 }
 0x5e3   : > { %4525 = vpow2.f32 %v1457_v17  ;;  %v1439_v19 = vsub.f32 %v1357_v44, %v1412_v18 }
 0x5e5   : > { %v5163_v20 = vpop.eup %4519  ;;  %v1459_v21 = vmul.f32 1.442695, %v1439_v19  ;;  %v746_v19 = vld [vmem:[%s5989_s12] sm:$0xff] }
 0x5e6   : > { %1483 = vadd.xlane.f32.xlu1 %v5163_v20  ;;  %v1414_v23 = vpop.xlane.xlu1 %1413 }
 0x5e7   : > { %v5166_v24 = vpop.eup %4521  ;;  %4527 = vpow2.f32 %v1459_v21  ;;  %v1440_v25 = vsub.f32 %v1360_v48, %v1414_v23  ;;  %v1426_v8 = vpop.xlane.xlu0 %1425  ;;  %v747_v23 = vld [vmem:[%s5989_s12 + $0x8] sm:$0xff] }
 0x5e8   : > { %1485 = vadd.xlane.f32.xlu0 %v5166_v24  ;;  %v1446_v49 = vsub.f32 %v5133_v50, %v1426_v8  ;;  %v5221_v21 = vpop.f32.mrb[0].mxu1  ;;  %v1604_v8 = vld [vmem:[%s5991_s14 + $0x8] sm:$0xff] }
 0x5e9   : > { %v5169_v27 = vpop.eup %4523  ;;  %v1461_v28 = vmul.f32 1.442695, %v1440_v25  ;;  %v4167_v25 = vpop.f32.mrb[1].mxu1 }
 0x5ea   : > { %1487 = vadd.xlane.f32.xlu1 %v5169_v27  ;;  %v1416_v31 = vpop.xlane.xlu1 %1415  ;;  %v1473_v56 = vmul.f32 1.442695, %v1446_v49  ;;  %v1709_v49 = vld [vmem:[%s5993_s16 + $0x18] sm:$0xff] }
 0x5eb   : > { %4529 = vpow2.f32 %v1461_v28  ;;  %v1441_v32 = vsub.f32 %v1365_v52, %v1416_v31  ;;  %v5226_v28 = vpop.f32.mrb[2].mxu1 }
 0x5ec   : > { %v4168_v31 = vpop.f32.mrb[3].mxu1 }
 0x5ed   : > { %v5172_v33 = vpop.eup %4525  ;;  %v1463_v35 = vmul.f32 1.442695, %v1441_v32  ;;  %v1603_v32 = vld [vmem:[%s5991_s14] sm:$0xff] }
 0x5ee   : > { %1489 = vadd.xlane.f32.xlu0 %v5172_v33  ;;  %v1418_v40 = vpop.xlane.xlu1 %1417 }
 0x5ef   : > { %4531 = vpow2.f32 %v1463_v35  ;;  %v1442_v41 = vsub.f32 %v1368_v55, %v1418_v40  ;;  %v1605_v35 = vld [vmem:[%s5991_s14 + $0x10] sm:$0xff]  ;;  %v1706_v40 = vld [vmem:[%s5993_s16] sm:$0xff] }
 0x5f0   : > { %v1430_v7 = vpop.xlane.xlu0 %1429 }
 0x5f1   : > { %v5175_v43 = vpop.eup %4527  ;;  %v1465_v3 = vmul.f32 1.442695, %v1442_v41  ;;  %v1448_v5 = vsub.f32 %v5140_v59, %v1430_v7  ;;  %v4479_v41 = vld [vmem:[%s5988_s11 + $0x8] sm:$0xff]   ;;  %v1708_v7 = vld [vmem:[%s5993_s16 + $0x10] sm:$0xff] }
 0x5f2   : > { %1491 = vadd.xlane.f32.xlu1 %v5175_v43  ;;  %v1420_v44 = vpop.xlane.xlu1 %1419  ;;  %4170 = vmatmul.mubr.msk.bf16.gmra.mrb[4].mxu1 %vm809_vm2, %v4479_v41 }
 0x5f3   : > { %4533 = vpow2.f32 %v1465_v3  ;;  %v1443_v46 = vsub.f32 %v1373_v58, %v1420_v44  ;;  %v1477_v10 = vmul.f32 1.442695, %v1448_v5  ;;  %v1606_v3 = vld [vmem:[%s5991_s14 + $0x18] sm:$0xff]  ;;  %4173 = vmatprep.mubr.msk.bf16.mxu1 %vm4795_vm7, %v4791_v2  ;;  %v1707_v44 = vld [vmem:[%s5993_s16 + $0x8] sm:$0xff] }
 0x5f4   : > { %v1434_v53 = vpop.xlane.xlu0 %1433 }
 0x5f5   : > { %v5178_v47 = vpop.eup %4529  ;;  %v1467_v48 = vmul.f32 1.442695, %v1443_v46  ;;  %v1450_v58 = vsub.f32 %v5143_v60, %v1434_v53  ;;  %v3902_v46 = vld [vmem:[%s5985_s8 + $0x20] sm:$0xff]  ;;  %v3905_v53 = vld [vmem:[%s5985_s8 + $0x38] sm:$0xff] }
 0x5f6   : > { %1493 = vadd.xlane.f32.xlu0 %v5178_v47  ;;  %v1422_v51 = vpop.xlane.xlu1 %1421 }
 0x5f7   : > { %4535 = vpow2.f32 %v1467_v48  ;;  %v1444_v52 = vsub.f32 %v5147_v61, %v1422_v51  ;;  %v1481_v6 = vmul.f32 1.442695, %v1450_v58  ;;  %v4480_v48 = vld [vmem:[%s5988_s11 + $0x10] sm:$0xff]  }
 0x5f8   : > { %v3904_v51 = vld [vmem:[%s5985_s8 + $0x30] sm:$0xff] }
 0x5f9   : > { %v5183_v54 = vpop.eup %4531  ;;  %v1469_v55 = vmul.f32 1.442695, %v1444_v52  ;;  %v3903_v52 = vld [vmem:[%s5985_s8 + $0x28] sm:$0xff] }
 0x5fa   : > { %1495 = vadd.xlane.f32.xlu1 %v5183_v54  ;;  %v1424_v57 = vpop.xlane.xlu1 %1423  ;;  %4174 = vmatmul.mubr.msk.bf16.gmra.mrb[8].mxu1 %vm809_vm2, %v4480_v48 }
 0x5fb   : > { %4537 = vpow2.f32 %v1469_v55  ;;  %v1445_v1 = vsub.f32 %v5152_v62, %v1424_v57  ;;  %4235 = vmatprep.mubr.msk.bf16.mxu1 %vm4795_vm7, %v4791_v2 }
 0x5fc   : > { %4539 = vpow2.f32 %v1473_v56 }
 0x5fd   : > { %v5188_v50 = vpop.eup %4533  ;;  %v1471_v4 = vmul.f32 1.442695, %v1445_v1 }
 0x5fe   : > { %1497 = vadd.xlane.f32.xlu0 %v5188_v50  ;;  %v1428_v61 = vpop.xlane.xlu1 %1427 }
 0x5ff   : > { %4541 = vpow2.f32 %v1471_v4  ;;  %v1447_v62 = vsub.f32 %v5155_v63, %v1428_v61 }
 0x600   : > { %4543 = vpow2.f32 %v1481_v6 }
 0x601   : > { %v5192_v9 = vpop.eup %4535  ;;  %4545 = vpow2.f32 %v1477_v10  ;;  %v1475_v59 = vmul.f32 1.442695, %v1447_v62 }
 0x602   : > { %1499 = vadd.xlane.f32.xlu1 %v5192_v9  ;;  %v1432_v60 = vpop.xlane.xlu1 %1431 }
 0x603   : > { %v1449_v11 = vsub.f32 %v5160_v0, %v1432_v60 }
 0x605   : > { %v5197_v12 = vpop.eup %4537  ;;  %v1479_v14 = vmul.f32 1.442695, %v1449_v11 }
 0x606   : > { %1501 = vadd.xlane.f32.xlu0 %v5197_v12  ;;  %v5200_v15 = vpop.eup %4539 }
 0x607   : > { %4547 = vpow2.f32 %v1479_v14 }
 0x608   : > { %4549 = vpow2.f32 %v1475_v59 }
 0x609   : > { %v5202_v16 = vpop.eup %4541 }
 0x60a   : > { %1505 = vadd.xlane.f32.xlu0 %v5200_v15  ;;  %1503 = vadd.xlane.f32.xlu1 %v5202_v16  ;;  %v5206_v63 = vpop.eup %4543 }
 0x60b   : > { %v5209_v0 = vpop.eup %4545 }
 0x60e   : > { %1513 = vadd.xlane.f32.xlu0 %v5206_v63 }
 0x611   : > { %v5211_v17 = vpop.eup %4547 }
 0x612   : > { %1509 = vadd.xlane.f32.xlu0 %v5209_v0  ;;  %1511 = vadd.xlane.f32.xlu1 %v5211_v17  ;;  %v5215_v18 = vpop.eup %4549 }
 0x616   : > { %1507 = vadd.xlane.f32.xlu1 %v5215_v18 }
 0x627   : > { %754 = vperm.xlu1 %4465, %v746_v19  }
 0x628   : > { %759 = vperm.xlu0 %4464, %v747_v23  }
 0x62b   : > { %1609 = vperm.xlu1 %4465, %v1603_v32  }
 0x62c   : > { %1619 = vperm.xlu0 %4464, %v1605_v35  }
 0x62f   : > { %1614 = vperm.xlu1 %4465, %v1604_v8  }
 0x630   : > { %1712 = vperm.xlu0 %4464, %v1706_v40  }
 0x633   : > { %1624 = vperm.xlu1 %4465, %v1606_v3  }
 0x634   : > { %1722 = vperm.xlu0 %4464, %v1708_v7  }
 0x637   : > { %1717 = vperm.xlu1 %4465, %v1707_v44  }
 0x638   : > { %1992 = vperm.xlu0 %4464, %v3902_v46  }
 0x63b   : > { %1727 = vperm.xlu1 %4465, %v1709_v49  }
 0x63c   : > { %2002 = vperm.xlu0 %4464, %v3904_v51  }
 0x63f   : > { %1997 = vperm.xlu1 %4465, %v3903_v52  }
 0x643   : > { %2007 = vperm.xlu1 %4465, %v3905_v53  }
 0x673   : > { %v1484_v55 = vpop.xlane.xlu1 %1483 }
 0x674   : > { %4551 = vrcp.f32 %v1484_v55 }
 0x675   : > { %v1486_v56 = vpop.xlane.xlu0 %1485 }
 0x676   : > { %4553 = vrcp.f32 %v1486_v56 }
 0x677   : > { %v1488_v57 = vpop.xlane.xlu1 %1487 }
 0x678   : > { %4555 = vrcp.f32 %v1488_v57 }
 0x67b   : > { %v1490_v58 = vpop.xlane.xlu0 %1489 }
 0x67c   : > { %4557 = vrcp.f32 %v1490_v58 }
 0x67e   : > { %v4552_v1 = vpop.eup %4551 }
 0x67f   : > { %v1492_v5 = vpop.xlane.xlu1 %1491  ;;  %v1531_v61 = vmul.f32 %v4552_v1, %v5163_v20 }
 0x680   : > { %v4554_v4 = vpop.eup %4553  ;;  %4559 = vrcp.f32 %v1492_v5 }
 0x681   : > { %v1532_v6 = vmul.f32 %v4554_v4, %v5166_v24 }
 0x682   : > { %v4556_v62 = vpop.eup %4555 }
 0x683   : > { %v1494_v10 = vpop.xlane.xlu0 %1493  ;;  %v1547_v60 = vpack.c.bf16 %v1532_v6, %v1531_v61  ;;  %v1533_v19 = vmul.f32 %v4556_v62, %v5169_v27 }
 0x684   : > { %4561 = vrcp.f32 %v1494_v10 }
 0x685   : > { %4220 = vmatpush3.bf16.xpose.msra.mxu1 %v1547_v60 }
 0x686   : > { %v4558_v11 = vpop.eup %4557  ;;  %4221 = vmatprep.subr.bf16.mxu1 %v4791_v2 }
 0x687   : > { %v1534_v14 = vmul.f32 %v4558_v11, %v5172_v33  ;;  %v1496_v59 = vpop.xlane.xlu1 %1495 }
 0x688   : > { %4563 = vrcp.f32 %v1496_v59 }
 0x689   : > { %v1548_v25 = vpack.c.bf16 %v1534_v14, %v1533_v19 }
 0x68a   : > { %v4560_v20 = vpop.eup %4559 }
 0x68b   : > { %v1498_v23 = vpop.xlane.xlu0 %1497  ;;  %v1535_v35 = vmul.f32 %v4560_v20, %v5175_v43 }
 0x68c   : > { %4565 = vrcp.f32 %v1498_v23 }
 0x68d   : > { %4222 = vmatpush3.bf16.xpose.msra.mxu1 %v1548_v25 }
 0x68e   : > { %v4562_v24 = vpop.eup %4561  ;;  %4223 = vmatprep.subr.bf16.mxu1 %v4791_v2 }
 0x68f   : > { %v1536_v31 = vmul.f32 %v4562_v24, %v5178_v47  ;;  %v1500_v32 = vpop.xlane.xlu1 %1499 }
 0x690   : > { %4567 = vrcp.f32 %v1500_v32 }
 0x691   : > { %v1549_v33 = vpack.c.bf16 %v1536_v31, %v1535_v35 }
 0x692   : > { %v4564_v40 = vpop.eup %4563 }
 0x693   : > { %v1502_v8 = vpop.xlane.xlu0 %1501  ;;  %v1537_v44 = vmul.f32 %v4564_v40, %v5183_v54 }
 0x694   : > { %4569 = vrcp.f32 %v1502_v8 }
 0x695   : > { %4224 = vmatpush3.bf16.xpose.msra.mxu1 %v1549_v33 }
 0x696   : > { %v4566_v27 = vpop.eup %4565  ;;  %4225 = vmatprep.subr.bf16.mxu1 %v4791_v2 }
 0x697   : > { %v1506_v41 = vpop.xlane.xlu0 %1505  ;;  %v1504_v3 = vpop.xlane.xlu1 %1503  ;;  %v1538_v7 = vmul.f32 %v4566_v27, %v5188_v50 }
 0x698   : > { %4571 = vrcp.f32 %v1506_v41 }
 0x699   : > { %4573 = vrcp.f32 %v1504_v3  ;;  %v1550_v46 = vpack.c.bf16 %v1538_v7, %v1537_v44  ;;  %v4482_v3 = vld [vmem:[%s5990_s13 + $0x8] sm:$0xff]   ;;  %v4483_v7 = vld [vmem:[%s5992_s15] sm:$0xff]  }
 0x69a   : > { %v4568_v43 = vpop.eup %4567 }
 0x69b   : > { %v1514_v47 = vpop.xlane.xlu0 %1513  ;;  %v1539_v53 = vmul.f32 %v4568_v43, %v5192_v9 }
 0x69d   : > { %4226 = vmatpush3.bf16.xpose.msra.mxu1 %v1550_v46 }
 0x69e   : > { %v4570_v48 = vpop.eup %4569  ;;  %4227 = vmatprep.subr.bf16.mxu1 %v4791_v2 }
 0x69f   : > { %v1512_v49 = vpop.xlane.xlu1 %1511  ;;  %v1540_v51 = vmul.f32 %v4570_v48, %v5197_v12  ;;  %v1510_v52 = vpop.xlane.xlu0 %1509 }
 0x6a0   : > { %4575 = vrcp.f32 %v1510_v52 }
 0x6a1   : > { %v1551_v56 = vpack.c.bf16 %v1540_v51, %v1539_v53 }
 0x6a2   : > { %v4572_v55 = vpop.eup %4571 }
 0x6a3   : > { %v1508_v50 = vpop.xlane.xlu1 %1507  ;;  %v4574_v57 = vpop.eup %4573  ;;  %v1542_v4 = vmul.f32 %v4572_v55, %v5200_v15 }
 0x6a4   : > { %4577 = vrcp.f32 %v1508_v50  ;;  %v1541_v1 = vmul.f32 %v4574_v57, %v5202_v16 }
 0x6a5   : > { %4228 = vmatpush3.bf16.xpose.msra.mxu1 %v1551_v56  ;;  %4579 = vrcp.f32 %v1512_v49 }
 0x6a6   : > { %4229 = vmatprep.subr.bf16.mxu1 %v4791_v2  ;;  %v1552_v6 = vpack.c.bf16 %v1542_v4, %v1541_v1  ;;  %4581 = vrcp.f32 %v1514_v47 }
 0x6a7   : > { %v760_v54 = vpop.permute.xlu0 %759  ;;  %v755_v58 = vpop.permute.xlu1 %754 }
 0x6a8   : > { %v857_v12 = vadd.f32 %v5226_v28, %v760_v54  ;;  %v854_v5 = vadd.f32 %v5221_v21, %v755_v58 }
 0x6aa   : > { %v883_v9 = vmul.f32 %v4983_v13, %v857_v12  ;;  %v882_v61 = vmul.f32 %v4983_v13, %v854_v5  ;;  %v4576_v60 = vpop.eup %4575 }
 0x6ab   : > { %v1544_v15 = vmul.f32 %v4576_v60, %v5209_v0  ;;  %v1610_v44 = vpop.permute.xlu1 %1609  ;;  %v1620_v46 = vpop.permute.xlu0 %1619 }
 0x6ac   : > { %v888_v10 = vpack.c.bf16 %v883_v9, %v882_v61 }
 0x6ad   : > { %4230 = vmatpush3.bf16.xpose.msra.mxu1 %v1552_v6 }
 0x6ae   : > { %v4578_v62 = vpop.eup %4577  ;;  %4231 = vmatprep.subr.bf16.mxu1 %v4791_v2 }
 0x6af   : > { %v1543_v16 = vmul.f32 %v4578_v62, %v5215_v18  ;;  %v4580_v11 = vpop.eup %4579  ;;  %v1615_v47 = vpop.permute.xlu1 %1614 }
 0x6b0   : > { %v4582_v21 = vpop.eup %4581  ;;  %v1545_v14 = vmul.f32 %v4580_v11, %v5211_v17  ;;  %v4481_v17 = vld [vmem:[%s5990_s13] sm:$0xff]  }
 0x6b1   : > { %v1553_v28 = vpack.c.bf16 %v1544_v15, %v1543_v16  ;;  %v1546_v59 = vmul.f32 %v4582_v21, %v5206_v63  ;;  %4241 = vmatprep.mubr.msk.bf16.mxu0 %vm1281_vm6, %v4481_v17 }
 0x6b3   : > { %v1554_v19 = vpack.c.bf16 %v1546_v59, %v1545_v14  ;;  %v1625_v51 = vpop.permute.xlu1 %1624 }
 0x6b5   : > { %4232 = vmatpush3.bf16.xpose.msra.mxu1 %v1553_v28 }
 0x6b6   : > { %4233 = vmatprep.subr.bf16.mxu1 %v4791_v2 }
 0x6bd   : > { %4234 = vmatpush3.bf16.xpose.msra.mxu1 %v1554_v19 }
 0x6c4   : > { %4236 = vmatmul.mubr.bf16.vlgmr.msra.gmra.mrb[12].mxu1 %v888_v10  ;;  %v4484_v10 = vld [vmem:[%s5992_s15 + $0x8] sm:$0xff]  }
 0x6c5   : > { %v5303_v23 = vpop.f32.mrb[4].mxu1 }
 0x6c6   : > { %v4171_v25 = vpop.f32.mrb[5].mxu1 }
 0x6c7   : > { %v5305_v20 = vpop.f32.mrb[6].mxu1 }
 0x6c8   : > { %v4172_v18 = vpop.f32.mrb[7].mxu1 }
 0x6cd   : > { %v5307_v0 = vpop.f32.mrb[8].mxu1 }
 0x6ce   : > { %v4175_v24 = vpop.f32.mrb[9].mxu1 }
 0x6cf   : > { %v5309_v31 = vpop.f32.mrb[10].mxu1 }
 0x6d0   : > { %v4176_v32 = vpop.f32.mrb[11].mxu1 }
 0x797   : > { %v1589_v63 = vpop.f32.mrb[12].mxu1 }
 0x798   : > { %v4237_v35 = vpop.f32.mrb[13].mxu1  ;;  %v1600_v33 = vmax.f32 %v1589_v63, 0.0 }
 0x799   : > { %v1592_v8 = vpop.f32.mrb[14].mxu1 }
 0x79a   : > { %v1601_v40 = vmax.f32 %v1592_v8, 0.0  ;;  %v4238_v27 = vpop.f32.mrb[15].mxu1  ;;  %v4488_v8 = vld [vmem:[%s5984_s7 + $0x48] sm:$0xff]  }
 0x79c   : > { %v1602_v41 = vpack.c.bf16 %v1601_v40, %v1600_v33  ;;  %v4489_v33 = vld [vmem:[%s5984_s7 + $0x50] sm:$0xff]   ;;  %v4490_v40 = vld [vmem:[%s5984_s7 + $0x58] sm:$0xff]  }
 0x79e   : > { %4239 = vmatprep.subr.bf16.mxu0 %v1602_v41 }
 0x79f   : > { %4240 = vmatpush3.bf16.msra.mxu0 %v1602_v41 }
 0x7a2   : > { %4242 = vmatmul.mubr.msk.bf16.vlgmr.msra.gmra.mrb[36].mxu0 %vm1281_vm6, %v4482_v3 }
 0x7a3   : > { %4249 = vmatprep.mubr.msk.bf16.mxu0 %vm809_vm2, %v4483_v7 }
 0x875   : > { %v4243_v43 = vpop.f32.mrb[36].mxu0 }
 0x876   : > { %v1686_v48 = vadd.f32 %v4243_v43, %v1620_v46  ;;  %v1677_v49 = vpop.f32.mrb[37].mxu0 }
 0x877   : > { %v1678_v52 = vadd.f32 %v1677_v49, %v1610_v44  ;;  %v4244_v53 = vpop.f32.mrb[38].mxu0 }
 0x878   : > { %v1694_v55 = vmul.f32 %v1686_v48, %v4983_v13  ;;  %v1689_v50 = vadd.f32 %v4244_v53, %v1625_v51  ;;  %v1680_v56 = vpop.f32.mrb[39].mxu0 }
 0x879   : > { %v1692_v57 = vmul.f32 %v1678_v52, %v4983_v13  ;;  %v1681_v54 = vadd.f32 %v1680_v56, %v1615_v47 }
 0x87a   : > { %v1695_v58 = vmul.f32 %v1689_v50, %v4983_v13  ;;  %v1698_v4 = vadd.f32 %v1694_v55, %v5062_v42  ;;  %v4485_v42 = vld [vmem:[%s5984_s7 + $0x30] sm:$0xff]  }
 0x87b   : > { %v1693_v1 = vmul.f32 %v1681_v54, %v4983_v13  ;;  %v1696_v5 = vadd.f32 %v1692_v57, %v5056_v29  ;;  %v1713_v29 = vpop.permute.xlu0 %1712 }
 0x87c   : > { %v1699_v12 = vadd.f32 %v1695_v58, %v5066_v45 }
 0x87d   : > { %v1697_v9 = vadd.f32 %v1693_v1, %v5058_v34  ;;  %v1718_v34 = vpop.permute.xlu1 %1717  ;;  %v3900_v1 = vsel %vm1955_vm9, 1.0, %v4791_v2 }
 0x87e   : > { %v1705_v61 = vpack.c.bf16 %v1699_v12, %v1698_v4 }
 0x87f   : > { %v1704_v6 = vpack.c.bf16 %v1697_v9, %v1696_v5  ;;  %v1723_v60 = vpop.permute.xlu0 %1722  ;;  %v3901_v5 = vsel %vm1970_vm10, 1.0, %v4791_v2 }
 0x881   : > { %4245 = vmatprep.subr.bf16.mxu0 %v1704_v6  ;;  %v1728_v16 = vpop.permute.xlu1 %1727 }
 0x882   : > { %4246 = vmatpush3.bf16.msra.mxu0 %v1704_v6 }
 0x883   : > { %4247 = vmatprep.subr.bf16.mxu0 %v1705_v61  ;;  %v1993_v53 = vpop.permute.xlu0 %1992 }
 0x885   : > { %v1998_v55 = vpop.permute.xlu1 %1997 }
 0x886   : > { %4248 = vmatpush3.bf16.msra.mxu0 %v1705_v61 }
 0x887   : > { %v2003_v50 = vpop.permute.xlu0 %2002 }
 0x889   : > { %4250 = vmatmul.mubr.msk.bf16.vlgmr.msra.gmra.mrb[40].mxu0 %vm809_vm2, %v4484_v10  ;;  %v2008_v56 = vpop.permute.xlu1 %2007 }
 0x88a   : > { %4257 = vmatprep.mubr.msk.bf16.mxu0 %vm809_vm2, %v4485_v42 }
 0x95c   : > { %v4251_v45 = vpop.f32.mrb[40].mxu0 }
 0x95d   : > { %v1780_v62 = vpop.f32.mrb[41].mxu0  ;;  %v1789_v15 = vadd.f32 %v4251_v45, %v1723_v60 }
 0x95e   : > { %v1781_v28 = vadd.f32 %v1780_v62, %v1713_v29  ;;  %v4252_v11 = vpop.f32.mrb[42].mxu0 }
 0x95f   : > { %v1792_v21 = vadd.f32 %v4252_v11, %v1728_v16  ;;  %v1783_v14 = vpop.f32.mrb[43].mxu0  ;;  %v1797_v18 = vadd.f32 %v1789_v15, %v5026_v39  ;;  %v4487_v39 = vld [vmem:[%s5984_s7 + $0x40] sm:$0xff]  }
 0x960   : > { %v1795_v59 = vadd.f32 %v1781_v28, %v5017_v36  ;;  %v1784_v19 = vadd.f32 %v1783_v14, %v1718_v34 }
 0x961   : > { %v1798_v25 = vadd.f32 %v1792_v21, %v5020_v37  ;;  %v5353_v35 = vmul.f32 %v1797_v18, %v4983_v13 }
 0x962   : > { %v1796_v24 = vadd.f32 %v1784_v19, %v5023_v38  ;;  %v5344_v32 = vmul.f32 %v1795_v59, %v4983_v13  ;;  %v4486_v38 = vld [vmem:[%s5984_s7 + $0x38] sm:$0xff]  }
 0x963   : > { %v5347_v17 = vmul.f32 %v1798_v25, %v4983_v13 }
 0x964   : > { %v5350_v63 = vmul.f32 %v1796_v24, %v4983_v13 }
 0x965   : > { %v1817_v37 = vpack.c.bf16 %v5347_v17, %v5353_v35 }
 0x966   : > { %v1816_v36 = vpack.c.bf16 %v5350_v63, %v5344_v32 }
 0x968   : > { %4253 = vmatprep.subr.bf16.mxu0 %v1816_v36 }
 0x969   : > { %4254 = vmatpush3.bf16.msra.mxu0 %v1816_v36 }
 0x96a   : > { %4255 = vmatprep.subr.bf16.mxu0 %v1817_v37 }
 0x96d   : > { %4256 = vmatpush3.bf16.msra.mxu0 %v1817_v37 }
 0x970   : > { %4258 = vmatmul.mubr.msk.bf16.vlgmr.msra.gmra.mrb[44].mxu0 %vm809_vm2, %v4486_v38 }
 0x971   : > { %4261 = vmatprep.mubr.msk.bf16.mxu0 %vm809_vm2, %v4487_v39 }
 0x978   : > { %4262 = vmatmul.mubr.msk.bf16.gmra.mrb[48].mxu0 %vm809_vm2, %v4488_v8 }
 0x979   : > { %4265 = vmatprep.mubr.msk.bf16.mxu0 %vm809_vm2, %v4489_v33 }
 0x980   : > { %4266 = vmatmul.mubr.msk.bf16.gmra.mrb[52].mxu0 %vm809_vm2, %v4490_v40 }
 0xa43   : > { %v4259_v27 = vpop.f32.mrb[44].mxu0 }
 0xa44   : > { %1951 = vrot.lane.b32.xlu0 %v4259_v27, %s4796_s20  ;;  %v1900_v41 = vpop.f32.mrb[45].mxu0 }
 0xa45   : > { %v4260_v3 = vpop.f32.mrb[46].mxu0 }
 0xa46   : > { %1953 = vrot.lane.b32.xlu1 %v4260_v3, %s4796_s20  ;;  %v1903_v7 = vpop.f32.mrb[47].mxu0 }
 0xa48   : > { %1947 = vrot.lane.b32.xlu0 %v1900_v41, %s4796_s20 }
 0xa4a   : > { %1949 = vrot.lane.b32.xlu1 %v1903_v7, %s4796_s20  ;;  %s5931_s20 = scalar_lea.sflag [#allocation3], %s599_s22 }
 0xa4b   : > { %v4263_v44 = vpop.f32.mrb[48].mxu0 }
 0xa4c   : > { %v1916_v47 = vpop.f32.mrb[49].mxu0 }
 0xa4d   : > { %v4264_v46 = vpop.f32.mrb[50].mxu0 }
 0xa4e   : > { %v1919_v43 = vpop.f32.mrb[51].mxu0 }
 0xa53   : > { %v4267_v48 = vpop.f32.mrb[52].mxu0 }
 0xa54   : > { %v1932_v49 = vpop.f32.mrb[53].mxu0 }
 0xa55   : > { %1962 = vrot.lane.b32.xlu0 %v1932_v49, %s4797_s1  ;;  %v4268_v51 = vpop.f32.mrb[54].mxu0  ;;  %v3913_v49 = vld [vmem:[%s5987_s10 + $0x38] sm:$0xff] }
 0xa56   : > { %v1935_v52 = vpop.f32.mrb[55].mxu0 }
 0xa57   : > { %1964 = vrot.lane.b32.xlu1 %v1935_v52, %s4797_s1  ;;  %v4491_v52 = vld [vmem:[%s5986_s9 + $0x10] sm:$0xff]  }
 0xa58   : > { %4273 = vmatprep.mubr.msk.bf16.mxu0 %vm809_vm2, %v4491_v52  ;;  %v4492_v52 = vld [vmem:[%s5986_s9 + $0x18] sm:$0xff]  }
 0xa59   : > { %1966 = vrot.lane.b32.xlu0 %v4267_v48, %s4797_s1  ;;  %v3912_v48 = vld [vmem:[%s5987_s10 + $0x30] sm:$0xff] }
 0xa5b   : > { %1968 = vrot.lane.b32.xlu1 %v4268_v51, %s4797_s1  ;;  %v3911_v51 = vld [vmem:[%s5987_s10 + $0x28] sm:$0xff]  ;;  %s4727_s1 = scalar_lea.vmem %s5921_s17, 512 }
 0xa5c   : > { %p4728_p11 = scmp.ne.s32.totalorder %s5921_s17, %s4727_s1 }
 0xa5e   : > { %p4729_p12 = pnand %p4728_p11, %p4936_p5 }
 0xa60   : > { %p4730_p13 = pneg %p4729_p12 }
 0xab6   : > { %v1952_v57 = vpop.permute.xlu0 %1951 }
 0xab7   : > { %v1960_v6 = vmul.f32 %v3900_v1, %v1952_v57 }
 0xab8   : > { %v1954_v54 = vpop.permute.xlu1 %1953 }
 0xab9   : > { %v1961_v29 = vmul.f32 %v3900_v1, %v1954_v54  ;;  %v1979_v15 = vadd.f32 %v4263_v44, %v1960_v6 }
 0xaba   : > { %v1948_v58 = vpop.permute.xlu0 %1947 }
 0xabb   : > { %v1958_v12 = vmul.f32 %v3900_v1, %v1948_v58  ;;  %v1980_v14 = vadd.f32 %v4264_v46, %v1961_v29 }
 0xabc   : > { %v1950_v4 = vpop.permute.xlu1 %1949 }
 0xabd   : > { %v1959_v9 = vmul.f32 %v3900_v1, %v1950_v4  ;;  %v1977_v10 = vadd.f32 %v1958_v12, %v1916_v47 }
 0xabf   : > { %v1978_v45 = vadd.f32 %v1959_v9, %v1919_v43  ;;  %v3910_v43 = vld [vmem:[%s5987_s10 + $0x20] sm:$0xff] }
 0xac7   : > { %v1963_v61 = vpop.permute.xlu0 %1962 }
 0xac8   : > { %v1973_v42 = vmul.f32 %v3901_v5, %v1963_v61 }
 0xac9   : > { %v1965_v34 = vpop.permute.xlu1 %1964 }
 0xaca   : > { %v1981_v60 = vadd.f32 %v1977_v10, %v1973_v42  ;;  %v1974_v62 = vmul.f32 %v3901_v5, %v1965_v34 }
 0xacb   : > { %v1967_v16 = vpop.permute.xlu0 %1966 }
 0xacc   : > { %v2010_v28 = vadd.f32 %v1993_v53, %v1981_v60  ;;  %v1982_v11 = vadd.f32 %v1978_v45, %v1974_v62  ;;  %v1975_v21 = vmul.f32 %v3901_v5, %v1967_v16 }
 0xacd   : > { %v1969_v59 = vpop.permute.xlu1 %1968 }
 0xace   : > { %v5383_v19 = vmax.f32 %v2010_v28, 0.0  ;;  %v2011_v25 = vadd.f32 %v1998_v55, %v1982_v11  ;;  %v1983_v18 = vadd.f32 %v1979_v15, %v1975_v21  ;;  %v1976_v24 = vmul.f32 %v3901_v5, %v1969_v59 }
 0xad0   : > { %v5385_v36 = vmax.f32 %v2011_v25, 0.0  ;;  %v2012_v37 = vadd.f32 %v2003_v50, %v1983_v18  ;;  %v1984_v38 = vadd.f32 %v1980_v14, %v1976_v24  ;;  %v2018_v39 = vmul.f32 %v5014_v30, %v5383_v19 }
 0xad2   : > { %v5389_v8 = vmax.f32 %v2012_v37, 0.0  ;;  %v2013_v33 = vadd.f32 %v2008_v56, %v1984_v38  ;;  %2022 = vadd.xlane.f32.xlu0 %v2018_v39  ;;  %v2019_v40 = vmul.f32 %v5014_v30, %v5385_v36  ;;  %v2034_v44 = vmul.f32 %v2018_v39, %v5383_v19 }
 0xad4   : > { %v5393_v27 = vmax.f32 %v2013_v33, 0.0  ;;  %2024 = vadd.xlane.f32.xlu1 %v2019_v40  ;;  %v2020_v41 = vmul.f32 %v5014_v30, %v5389_v8  ;;  %v2035_v47 = vmul.f32 %v2019_v40, %v5385_v36 }
 0xad6   : > { %v2021_v3 = vmul.f32 %v5014_v30, %v5393_v27  ;;  %v2036_v7 = vmul.f32 %v2020_v41, %v5389_v8 }
 0xad8   : > { %2026 = vadd.xlane.f32.xlu1 %v2020_v41  ;;  %2028 = vadd.xlane.f32.xlu0 %v2021_v3  ;;  %v2037_v46 = vmul.f32 %v2021_v3, %v5393_v27 }
 0xadc   : > { %2042 = vadd.xlane.f32.xlu1 %v2036_v7  ;;  %2038 = vadd.xlane.f32.xlu0 %v2034_v44 }
 0xae0   : > { %2040 = vadd.xlane.f32.xlu0 %v2035_v47 }
 0xae4   : > { %2044 = vadd.xlane.f32.xlu0 %v2037_v46 }
 0xaed   : > { %2092 = vperm.xlu1 %4465, %v3910_v43  }
 0xaf1   : > { %2102 = vperm.xlu1 %4465, %v3912_v48  }
 0xaf5   : > { %2107 = vperm.xlu1 %4465, %v3913_v49  }
 0xafa   : > { %2097 = vperm.xlu0 %4464, %v3911_v51  }
 0xb5f   : > { %v2023_v53 = vpop.xlane.xlu0 %2022 }
 0xb60   : > { %v2030_v50 = vmul.f32 0.015625, %v2023_v53 }
 0xb61   : > { %v2025_v55 = vpop.xlane.xlu1 %2024 }
 0xb62   : > { %v2050_v58 = vmul.f32 %v2030_v50, %v2030_v50  ;;  %v2031_v12 = vmul.f32 0.015625, %v2025_v55  ;;  %v2062_v39 = vsub.f32 %v5383_v19, %v2030_v50 }
 0xb64   : > { %v2051_v29 = vmul.f32 %v2031_v12, %v2031_v12  ;;  %v2063_v33 = vsub.f32 %v5385_v36, %v2031_v12 }
 0xb65   : > { %v2029_v56 = vpop.xlane.xlu0 %2028  ;;  %v2027_v57 = vpop.xlane.xlu1 %2026 }
 0xb66   : > { %v2032_v54 = vmul.f32 0.015625, %v2027_v57  ;;  %v2033_v34 = vmul.f32 0.015625, %v2029_v56 }
 0xb68   : > { %v2052_v5 = vmul.f32 %v2032_v54, %v2032_v54  ;;  %v2053_v11 = vmul.f32 %v2033_v34, %v2033_v34  ;;  %v2065_v44 = vsub.f32 %v5393_v27, %v2033_v34  ;;  %v2064_v47 = vsub.f32 %v5389_v8, %v2032_v54 }
 0xb69   : > { %v2039_v1 = vpop.xlane.xlu0 %2038  ;;  %v2043_v4 = vpop.xlane.xlu1 %2042 }
 0xb6a   : > { %v2046_v9 = vmul.f32 0.015625, %v2039_v1  ;;  %v2048_v61 = vmul.f32 0.015625, %v2043_v4 }
 0xb6c   : > { %v2054_v6 = vsub.f32 %v2046_v9, %v2050_v58  ;;  %v2056_v10 = vsub.f32 %v2048_v61, %v2052_v5 }
 0xb6d   : > { %v2041_v42 = vpop.xlane.xlu0 %2040  ;;  %v2093_v53 = vpop.permute.xlu1 %2092 }
 0xb6e   : > { %v2058_v45 = vmax.f32 %v2054_v6, 0.0  ;;  %v2047_v60 = vmul.f32 0.015625, %v2041_v42  ;;  %v2060_v16 = vmax.f32 %v2056_v10, 0.0 }
 0xb70   : > { %v2066_v62 = vadd.f32 1e-05, %v2058_v45  ;;  %v2055_v15 = vsub.f32 %v2047_v60, %v2051_v29  ;;  %v2068_v59 = vadd.f32 1e-05, %v2060_v16 }
 0xb71   : > { %v2045_v28 = vpop.xlane.xlu0 %2044  ;;  %v2103_v55 = vpop.permute.xlu1 %2102 }
 0xb72   : > { %v2059_v21 = vmax.f32 %v2055_v15, 0.0  ;;  %v2049_v14 = vmul.f32 0.015625, %v2045_v28  ;;  %4583 = vrsqrt.f32 %v2066_v62 }
 0xb74   : > { %v2067_v25 = vadd.f32 1e-05, %v2059_v21  ;;  %v2057_v18 = vsub.f32 %v2049_v14, %v2053_v11 }
 0xb75   : > { %v2108_v57 = vpop.permute.xlu1 %2107 }
 0xb76   : > { %4585 = vrsqrt.f32 %v2067_v25  ;;  %v2061_v24 = vmax.f32 %v2057_v18, 0.0 }
 0xb77   : > { %4587 = vrsqrt.f32 %v2068_v59 }
 0xb78   : > { %v2069_v37 = vadd.f32 1e-05, %v2061_v24 }
 0xb79   : > { %v2098_v58 = vpop.permute.xlu0 %2097 }
 0xb7a   : > { %4589 = vrsqrt.f32 %v2069_v37 }
 0xb7c   : > { %v4584_v38 = vpop.eup %4583 }
 0xb7d   : > { %v2074_v41 = vmul.f32 %v4584_v38, %v2062_v39 }
 0xb80   : > { %v4586_v40 = vpop.eup %4585 }
 0xb81   : > { %v2075_v3 = vmul.f32 %v4586_v40, %v2063_v33  ;;  %v4588_v7 = vpop.eup %4587 }
 0xb82   : > { %v2076_v48 = vmul.f32 %v4588_v7, %v2064_v47 }
 0xb83   : > { %v2083_v46 = vpack.c.bf16 %v2075_v3, %v2074_v41 }
 0xb84   : > { %v4590_v43 = vpop.eup %4589 }
 0xb85   : > { %4269 = vmatprep.subr.bf16.mxu0 %v2083_v46  ;;  %v2077_v49 = vmul.f32 %v4590_v43, %v2065_v44 }
 0xb86   : > { %4270 = vmatpush3.bf16.msra.mxu0 %v2083_v46 }
 0xb87   : > { %v2084_v51 = vpack.c.bf16 %v2077_v49, %v2076_v48 }
 0xb89   : > { %4271 = vmatprep.subr.bf16.mxu0 %v2084_v51 }
 0xb8a   : > { %4272 = vmatpush3.bf16.msra.mxu0 %v2084_v51 }
 0xb8d   : > { %4274 = vmatmul.mubr.msk.bf16.vlgmr.msra.gmra.mrb[56].mxu0 %vm809_vm2, %v4492_v52 }
 0xc60   : > { %v4275_v50 = vpop.f32.mrb[56].mxu0 }
 0xc61   : > { %v2160_v56 = vpop.f32.mrb[57].mxu0  ;;  %v2169_v1 = vadd.f32 %v4275_v50, %v2103_v55 }
 0xc62   : > { %v4276_v54 = vpop.f32.mrb[58].mxu0  ;;  %v2161_v5 = vadd.f32 %v2160_v56, %v2093_v53 }
 0xc63   : > { %v2172_v4 = vadd.f32 %v4276_v54, %v2108_v57  ;;  %v2163_v12 = vpop.f32.mrb[59].mxu0 }
 0xc64   : > { %v2164_v9 = vadd.f32 %v2163_v12, %v2098_v58 }
 0xc65   : > { %v2176_v61 = vpack.c.bf16 %v2172_v4, %v2169_v1 }
 0xc66   : > { %v2175_v6 = vpack.c.bf16 %v2164_v9, %v2161_v5 }
 0xc67   : > { %4277 = vmatprep.subr.bf16.mxu1 %v2176_v61 }
 0xc68   : > { %2177 = vxpose.xlu0.c.b16.start.end [1/1] (short) %v2175_v6, 128  ;;  %4278 = vmatpush3.bf16.msra.mxu1 %v2176_v61 }
 0xc69   : > { %4295 = vmatprep.subr.bf16.mxu1 %v4791_v2 }
 0xcce   : > { %v2185_v10 = vpop.trf.xlu0 }
 0xccf   : > { %4279 = vmatprep.mubr.msk.bf16.mxu1 %vm1281_vm6, %v2185_v10 }
 0xcd2   : > { %v2186_v42 = vpop.trf.xlu0 }
 0xcd3   : > { %4280 = vmatmul.mubr.msk.bf16.vlgmr.msra.gmra.mrb[16].mxu1 %vm1281_vm6, %v2186_v42 }
 0xcd6   : > { %v2187_v29 = vpop.trf.xlu0 }
 0xcd7   : > { %4283 = vmatprep.mubr.msk.bf16.mxu1 %vm1281_vm6, %v2187_v29 }
 0xcda   : > { %v2188_v34 = vpop.trf.xlu0 }
 0xcdb   : > { %4284 = vmatmul.mubr.msk.bf16.gmra.mrb[20].mxu1 %vm1281_vm6, %v2188_v34 }
 0xcde   : > { %v2189_v45 = vpop.trf.xlu0 }
 0xcdf   : > { %4287 = vmatprep.mubr.msk.bf16.mxu1 %vm1281_vm6, %v2189_v45 }
 0xce2   : > { %v2190_v60 = vpop.trf.xlu0 }
 0xce3   : > { %4288 = vmatmul.mubr.msk.bf16.gmra.mrb[24].mxu1 %vm1281_vm6, %v2190_v60 }
 0xce6   : > { %v2191_v62 = vpop.trf.xlu0 }
 0xce7   : > { %4291 = vmatprep.mubr.msk.bf16.mxu1 %vm1281_vm6, %v2191_v62 }
 0xcea   : > { %v2192_v16 = vpop.trf.xlu0 }
 0xceb   : > { %4292 = vmatmul.mubr.msk.bf16.gmra.mrb[28].mxu1 %vm1281_vm6, %v2192_v16 }
 0xcec   : > { %4311 = vmatprep.mubr.msk.bf16.mxu1 %vm4795_vm7, %v4791_v2 }
 0xda6   : > { %v4281_v15 = vpop.f32.mrb[16].mxu1 }
 0xda7   : > { %v2251_v28 = vpop.f32.mrb[17].mxu1  ;;  %v2260_v25 = vadd.f32 %v4281_v15, %v5124_v26 }
 0xda8   : > { %v2252_v11 = vadd.f32 %v2251_v28, %v5124_v26  ;;  %v4282_v21 = vpop.f32.mrb[18].mxu1 }
 0xda9   : > { %v2254_v14 = vpop.f32.mrb[19].mxu1  ;;  %v2263_v37 = vadd.f32 %v4282_v21, %v5124_v26 }
 0xdaa   : > { %v2255_v59 = vadd.f32 %v2254_v14, %v5124_v26  ;;  %2314 = vmax.xlane.f32.xlu1 %v2252_v11 }
 0xdac   : > { %2316 = vmax.xlane.f32.xlu0 %v2255_v59 }
 0xdae   : > { %2318 = vmax.xlane.f32.xlu1 %v2260_v25  ;;  %v4285_v18 = vpop.f32.mrb[20].mxu1 }
 0xdaf   : > { %v2267_v24 = vpop.f32.mrb[21].mxu1  ;;  %v2276_v46 = vadd.f32 %v4285_v18, %v5124_v26 }
 0xdb0   : > { %v4286_v38 = vpop.f32.mrb[22].mxu1  ;;  %v2268_v33 = vadd.f32 %v2267_v24, %v5124_v26 }
 0xdb1   : > { %v2270_v39 = vpop.f32.mrb[23].mxu1  ;;  %v2279_v49 = vadd.f32 %v4286_v38, %v5124_v26 }
 0xdb2   : > { %2320 = vmax.xlane.f32.xlu1 %v2263_v37  ;;  %v2271_v3 = vadd.f32 %v2270_v39, %v5124_v26 }
 0xdb6   : > { %v4289_v40 = vpop.f32.mrb[24].mxu1  ;;  %2322 = vmax.xlane.f32.xlu1 %v2268_v33 }
 0xdb7   : > { %v2283_v41 = vpop.f32.mrb[25].mxu1  ;;  %v5464_v57 = vadd.f32 %v4289_v40, %v5124_v26 }
 0xdb8   : > { %v4290_v7 = vpop.f32.mrb[26].mxu1  ;;  %v2284_v53 = vadd.f32 %v2283_v41, %v5124_v26 }
 0xdb9   : > { %v5445_v44 = vadd.f32 %v4290_v7, %v5124_v26  ;;  %v2286_v47 = vpop.f32.mrb[27].mxu1 }
 0xdba   : > { %2324 = vmax.xlane.f32.xlu1 %v2271_v3  ;;  %v5459_v56 = vadd.f32 %v2286_v47, %v5124_v26 }
 0xdbb   : > { %2336 = vmax.xlane.f32.xlu0 %v5445_v44 }
 0xdbe   : > { %v4293_v43 = vpop.f32.mrb[28].mxu1  ;;  %2326 = vmax.xlane.f32.xlu1 %v2276_v46 }
 0xdbf   : > { %v2299_v48 = vpop.f32.mrb[29].mxu1  ;;  %v5472_v58 = vadd.f32 %v4293_v43, %v5124_v26 }
 0xdc0   : > { %v4294_v51 = vpop.f32.mrb[30].mxu1  ;;  %v5467_v54 = vadd.f32 %v2299_v48, %v5124_v26 }
 0xdc1   : > { %v2302_v52 = vpop.f32.mrb[31].mxu1  ;;  %v5455_v50 = vadd.f32 %v4294_v51, %v5124_v26 }
 0xdc2   : > { %v5452_v55 = vadd.f32 %v2302_v52, %v5124_v26  ;;  %2328 = vmax.xlane.f32.xlu1 %v2279_v49 }
 0xdc4   : > { %2340 = vmax.xlane.f32.xlu0 %v5452_v55 }
 0xdc6   : > { %2330 = vmax.xlane.f32.xlu1 %v2284_v53 }
 0xdc8   : > { %2344 = vmax.xlane.f32.xlu0 %v5455_v50 }
 0xdca   : > { %2332 = vmax.xlane.f32.xlu1 %v5459_v56 }
 0xdce   : > { %2334 = vmax.xlane.f32.xlu1 %v5464_v57 }
 0xdd2   : > { %2338 = vmax.xlane.f32.xlu1 %v5467_v54 }
 0xdd6   : > { %2342 = vmax.xlane.f32.xlu1 %v5472_v58 }
 0xe37   : > { %v2315_v1 = vpop.xlane.xlu1 %2314 }
 0xe38   : > { %v2346_v4 = vsub.f32 %v2252_v11, %v2315_v1 }
 0xe39   : > { %v2317_v12 = vpop.xlane.xlu0 %2316 }
 0xe3a   : > { %v2362_v5 = vmul.f32 1.442695, %v2346_v4  ;;  %v2347_v9 = vsub.f32 %v2255_v59, %v2317_v12 }
 0xe3b   : > { %v2319_v61 = vpop.xlane.xlu1 %2318 }
 0xe3c   : > { %4591 = vpow2.f32 %v2362_v5  ;;  %v2364_v6 = vmul.f32 1.442695, %v2347_v9  ;;  %v2348_v10 = vsub.f32 %v2260_v25, %v2319_v61 }
 0xe3e   : > { %4593 = vpow2.f32 %v2364_v6  ;;  %v2366_v42 = vmul.f32 1.442695, %v2348_v10 }
 0xe3f   : > { %v2321_v29 = vpop.xlane.xlu1 %2320 }
 0xe40   : > { %4595 = vpow2.f32 %v2366_v42  ;;  %v2349_v34 = vsub.f32 %v2263_v37, %v2321_v29 }
 0xe42   : > { %v2368_v45 = vmul.f32 1.442695, %v2349_v34 }
 0xe43   : > { %v2323_v60 = vpop.xlane.xlu1 %2322 }
 0xe44   : > { %4597 = vpow2.f32 %v2368_v45  ;;  %v2350_v62 = vsub.f32 %v2268_v33, %v2323_v60 }
 0xe46   : > { %v5475_v16 = vpop.eup %4591  ;;  %v2370_v15 = vmul.f32 1.442695, %v2350_v62 }
 0xe47   : > { %2394 = vadd.xlane.f32.xlu1 %v5475_v16  ;;  %v2325_v28 = vpop.xlane.xlu1 %2324 }
 0xe48   : > { %v5478_v11 = vpop.eup %4593  ;;  %4599 = vpow2.f32 %v2370_v15  ;;  %v2351_v21 = vsub.f32 %v2271_v3, %v2325_v28  ;;  %v2337_v38 = vpop.xlane.xlu0 %2336 }
 0xe49   : > { %2396 = vadd.xlane.f32.xlu0 %v5478_v11  ;;  %v2357_v48 = vsub.f32 %v5445_v44, %v2337_v38  ;;  %v3931_v38 = vld [vmem:[%s5991_s14 + $0x28] sm:$0xff] }
 0xe4a   : > { %v5481_v14 = vpop.eup %4595  ;;  %v2372_v59 = vmul.f32 1.442695, %v2351_v21 }
 0xe4b   : > { %2398 = vadd.xlane.f32.xlu1 %v5481_v14  ;;  %v2327_v25 = vpop.xlane.xlu1 %2326  ;;  %v2384_v12 = vmul.f32 1.442695, %v2357_v48  ;;  %v3977_v48 = vld [vmem:[%s5985_s8 + $0x48] sm:$0xff] }
 0xe4c   : > { %4601 = vpow2.f32 %v2372_v59  ;;  %v2352_v18 = vsub.f32 %v2276_v46, %v2327_v25  ;;  %v748_v59 = vld [vmem:[%s5989_s12 + $0x10] sm:$0xff]  ;;  %v749_v25 = vld [vmem:[%s5989_s12 + $0x18] sm:$0xff] }
 0xe4e   : > { %v5484_v24 = vpop.eup %4597  ;;  %v2374_v37 = vmul.f32 1.442695, %v2352_v18  ;;  %v3930_v18 = vld [vmem:[%s5991_s14 + $0x20] sm:$0xff] }
 0xe4f   : > { %2400 = vadd.xlane.f32.xlu0 %v5484_v24  ;;  %v2329_v39 = vpop.xlane.xlu1 %2328 }
 0xe50   : > { %4603 = vpow2.f32 %v2374_v37  ;;  %v2353_v33 = vsub.f32 %v2279_v49, %v2329_v39  ;;  %v3932_v37 = vld [vmem:[%s5991_s14 + $0x30] sm:$0xff]  ;;  %v3942_v39 = vld [vmem:[%s5993_s16 + $0x20] sm:$0xff] }
 0xe51   : > { %v2341_v3 = vpop.xlane.xlu0 %2340 }
 0xe52   : > { %v5487_v40 = vpop.eup %4599  ;;  %v2376_v41 = vmul.f32 1.442695, %v2353_v33  ;;  %v2359_v6 = vsub.f32 %v5452_v55, %v2341_v3  ;;  %v3933_v33 = vld [vmem:[%s5991_s14 + $0x38] sm:$0xff]  ;;  %v3943_v3 = vld [vmem:[%s5993_s16 + $0x28] sm:$0xff] }
 0xe53   : > { %2402 = vadd.xlane.f32.xlu1 %v5487_v40  ;;  %v2331_v7 = vpop.xlane.xlu1 %2330 }
 0xe54   : > { %4605 = vpow2.f32 %v2376_v41  ;;  %v2354_v47 = vsub.f32 %v2284_v53, %v2331_v7  ;;  %v2388_v29 = vmul.f32 1.442695, %v2359_v6  ;;  %v3944_v41 = vld [vmem:[%s5993_s16 + $0x30] sm:$0xff]  ;;  %v3976_v7 = vld [vmem:[%s5985_s8 + $0x40] sm:$0xff] }
 0xe55   : > { %v2345_v52 = vpop.xlane.xlu0 %2344 }
 0xe56   : > { %v5490_v43 = vpop.eup %4601  ;;  %v2378_v46 = vmul.f32 1.442695, %v2354_v47  ;;  %v2361_v53 = vsub.f32 %v5455_v50, %v2345_v52  ;;  %v3945_v47 = vld [vmem:[%s5993_s16 + $0x38] sm:$0xff] }
 0xe57   : > { %2404 = vadd.xlane.f32.xlu0 %v5490_v43  ;;  %v2333_v51 = vpop.xlane.xlu1 %2332 }
 0xe58   : > { %4607 = vpow2.f32 %v2378_v46  ;;  %v2355_v49 = vsub.f32 %v5459_v56, %v2333_v51  ;;  %v2392_v10 = vmul.f32 1.442695, %v2361_v53  ;;  %v3978_v46 = vld [vmem:[%s5985_s8 + $0x50] sm:$0xff]  ;;  %v3979_v51 = vld [vmem:[%s5985_s8 + $0x58] sm:$0xff] }
 0xe5a   : > { %v5495_v1 = vpop.eup %4603  ;;  %v2380_v4 = vmul.f32 1.442695, %v2355_v49 }
 0xe5b   : > { %2406 = vadd.xlane.f32.xlu1 %v5495_v1  ;;  %v2335_v5 = vpop.xlane.xlu1 %2334 }
 0xe5c   : > { %4609 = vpow2.f32 %v2380_v4  ;;  %v2356_v9 = vsub.f32 %v5464_v57, %v2335_v5 }
 0xe5d   : > { %4611 = vpow2.f32 %v2384_v12 }
 0xe5e   : > { %v5500_v44 = vpop.eup %4605  ;;  %v2382_v61 = vmul.f32 1.442695, %v2356_v9 }
 0xe5f   : > { %2408 = vadd.xlane.f32.xlu0 %v5500_v44  ;;  %v2339_v56 = vpop.xlane.xlu1 %2338 }
 0xe60   : > { %4613 = vpow2.f32 %v2382_v61  ;;  %v2358_v57 = vsub.f32 %v5467_v54, %v2339_v56 }
 0xe61   : > { %4615 = vpow2.f32 %v2392_v10 }
 0xe62   : > { %v5504_v42 = vpop.eup %4607  ;;  %4617 = vpow2.f32 %v2388_v29  ;;  %v2386_v55 = vmul.f32 1.442695, %v2358_v57 }
 0xe63   : > { %2410 = vadd.xlane.f32.xlu1 %v5504_v42  ;;  %v2343_v50 = vpop.xlane.xlu1 %2342 }
 0xe64   : > { %v2360_v34 = vsub.f32 %v5472_v58, %v2343_v50 }
 0xe66   : > { %v5509_v45 = vpop.eup %4609  ;;  %v2390_v60 = vmul.f32 1.442695, %v2360_v34 }
 0xe67   : > { %2412 = vadd.xlane.f32.xlu0 %v5509_v45  ;;  %v5512_v62 = vpop.eup %4611 }
 0xe68   : > { %4619 = vpow2.f32 %v2390_v60 }
 0xe69   : > { %4621 = vpow2.f32 %v2386_v55 }
 0xe6a   : > { %v5514_v15 = vpop.eup %4613 }
 0xe6b   : > { %2416 = vadd.xlane.f32.xlu0 %v5512_v62  ;;  %2414 = vadd.xlane.f32.xlu1 %v5514_v15  ;;  %v5518_v54 = vpop.eup %4615 }
 0xe6c   : > { %v5521_v58 = vpop.eup %4617 }
 0xe6f   : > { %2424 = vadd.xlane.f32.xlu0 %v5518_v54 }
 0xe72   : > { %v5523_v28 = vpop.eup %4619 }
 0xe73   : > { %2420 = vadd.xlane.f32.xlu0 %v5521_v58  ;;  %2422 = vadd.xlane.f32.xlu1 %v5523_v28  ;;  %v5527_v21 = vpop.eup %4621 }
 0xe77   : > { %2418 = vadd.xlane.f32.xlu1 %v5527_v21 }
 0xe88   : > { %764 = vperm.xlu1 %4465, %v748_v59  }
 0xe89   : > { %769 = vperm.xlu0 %4464, %v749_v25  }
 0xe8c   : > { %2522 = vperm.xlu1 %4465, %v3930_v18  }
 0xe8d   : > { %2532 = vperm.xlu0 %4464, %v3932_v37  }
 0xe90   : > { %2527 = vperm.xlu1 %4465, %v3931_v38  }
 0xe91   : > { %2627 = vperm.xlu0 %4464, %v3942_v39  }
 0xe94   : > { %2537 = vperm.xlu1 %4465, %v3933_v33  }
 0xe95   : > { %2637 = vperm.xlu0 %4464, %v3944_v41  }
 0xe98   : > { %2632 = vperm.xlu1 %4465, %v3943_v3  }
 0xe99   : > { %2907 = vperm.xlu0 %4464, %v3976_v7  }
 0xe9c   : > { %2642 = vperm.xlu1 %4465, %v3945_v47  }
 0xe9d   : > { %2917 = vperm.xlu0 %4464, %v3978_v46  }
 0xea0   : > { %2912 = vperm.xlu1 %4465, %v3977_v48  }
 0xea4   : > { %2922 = vperm.xlu1 %4465, %v3979_v51  }
 0xed4   : > { %v2395_v49 = vpop.xlane.xlu1 %2394 }
 0xed5   : > { %4623 = vrcp.f32 %v2395_v49 }
 0xed6   : > { %v2397_v52 = vpop.xlane.xlu0 %2396 }
 0xed7   : > { %4625 = vrcp.f32 %v2397_v52 }
 0xed8   : > { %v2399_v4 = vpop.xlane.xlu1 %2398 }
 0xed9   : > { %4627 = vrcp.f32 %v2399_v4 }
 0xedc   : > { %v2401_v12 = vpop.xlane.xlu0 %2400 }
 0xedd   : > { %4629 = vrcp.f32 %v2401_v12 }
 0xedf   : > { %v4624_v5 = vpop.eup %4623 }
 0xee0   : > { %v2403_v9 = vpop.xlane.xlu1 %2402  ;;  %v2442_v61 = vmul.f32 %v4624_v5, %v5475_v16 }
 0xee1   : > { %v4626_v53 = vpop.eup %4625  ;;  %4631 = vrcp.f32 %v2403_v9 }
 0xee2   : > { %v2443_v6 = vmul.f32 %v4626_v53, %v5478_v11 }
 0xee3   : > { %v4628_v29 = vpop.eup %4627 }
 0xee4   : > { %v2405_v56 = vpop.xlane.xlu0 %2404  ;;  %v2458_v10 = vpack.c.bf16 %v2443_v6, %v2442_v61  ;;  %v2444_v60 = vmul.f32 %v4628_v29, %v5481_v14 }
 0xee5   : > { %4633 = vrcp.f32 %v2405_v56 }
 0xee6   : > { %4296 = vmatpush3.bf16.xpose.msra.mxu1 %v2458_v10 }
 0xee7   : > { %v4630_v50 = vpop.eup %4629  ;;  %4297 = vmatprep.subr.bf16.mxu1 %v4791_v2 }
 0xee8   : > { %v2445_v57 = vmul.f32 %v4630_v50, %v5484_v24  ;;  %v2407_v34 = vpop.xlane.xlu1 %2406 }
 0xee9   : > { %4635 = vrcp.f32 %v2407_v34 }
 0xeea   : > { %v2459_v59 = vpack.c.bf16 %v2445_v57, %v2444_v60 }
 0xeeb   : > { %v4632_v16 = vpop.eup %4631 }
 0xeec   : > { %v2409_v55 = vpop.xlane.xlu0 %2408  ;;  %v2446_v37 = vmul.f32 %v4632_v16, %v5487_v40  ;;  %v4493_v16 = vld [vmem:[%s5990_s13 + $0x10] sm:$0xff]  }
 0xeed   : > { %4637 = vrcp.f32 %v2409_v55  ;;  %4317 = vmatprep.mubr.msk.bf16.mxu0 %vm1281_vm6, %v4493_v16 }
 0xeee   : > { %4298 = vmatpush3.bf16.xpose.msra.mxu1 %v2459_v59 }
 0xeef   : > { %v4634_v11 = vpop.eup %4633  ;;  %4299 = vmatprep.subr.bf16.mxu1 %v4791_v2 }
 0xef0   : > { %v2447_v25 = vmul.f32 %v4634_v11, %v5490_v43  ;;  %v2411_v18 = vpop.xlane.xlu1 %2410 }
 0xef1   : > { %4639 = vrcp.f32 %v2411_v18 }
 0xef2   : > { %v2460_v24 = vpack.c.bf16 %v2447_v25, %v2446_v37 }
 0xef3   : > { %v4636_v39 = vpop.eup %4635 }
 0xef4   : > { %v2413_v38 = vpop.xlane.xlu0 %2412  ;;  %v2448_v7 = vmul.f32 %v4636_v39, %v5495_v1 }
 0xef5   : > { %4641 = vrcp.f32 %v2413_v38 }
 0xef6   : > { %4300 = vmatpush3.bf16.xpose.msra.mxu1 %v2460_v24 }
 0xef7   : > { %v4638_v14 = vpop.eup %4637  ;;  %4301 = vmatprep.subr.bf16.mxu1 %v4791_v2 }
 0xef8   : > { %v2417_v33 = vpop.xlane.xlu0 %2416  ;;  %v2415_v41 = vpop.xlane.xlu1 %2414  ;;  %v2449_v3 = vmul.f32 %v4638_v14, %v5500_v44 }
 0xef9   : > { %4643 = vrcp.f32 %v2417_v33 }
 0xefa   : > { %4645 = vrcp.f32 %v2415_v41  ;;  %v2461_v47 = vpack.c.bf16 %v2449_v3, %v2448_v7 }
 0xefb   : > { %v4640_v40 = vpop.eup %4639 }
 0xefc   : > { %v2425_v43 = vpop.xlane.xlu0 %2424  ;;  %v2450_v52 = vmul.f32 %v4640_v40, %v5504_v42 }
 0xefe   : > { %4302 = vmatpush3.bf16.xpose.msra.mxu1 %v2461_v47 }
 0xeff   : > { %v4642_v46 = vpop.eup %4641  ;;  %4303 = vmatprep.subr.bf16.mxu1 %v4791_v2 }
 0xf00   : > { %v2423_v48 = vpop.xlane.xlu1 %2422  ;;  %v2451_v51 = vmul.f32 %v4642_v46, %v5509_v45  ;;  %v2421_v49 = vpop.xlane.xlu0 %2420 }
 0xf01   : > { %4647 = vrcp.f32 %v2421_v49 }
 0xf02   : > { %v2462_v12 = vpack.c.bf16 %v2451_v51, %v2450_v52 }
 0xf03   : > { %v4644_v4 = vpop.eup %4643 }
 0xf04   : > { %v2419_v44 = vpop.xlane.xlu1 %2418  ;;  %v4646_v5 = vpop.eup %4645  ;;  %v2453_v61 = vmul.f32 %v4644_v4, %v5512_v62 }
 0xf05   : > { %4649 = vrcp.f32 %v2419_v44  ;;  %v2452_v9 = vmul.f32 %v4646_v5, %v5514_v15 }
 0xf06   : > { %4304 = vmatpush3.bf16.xpose.msra.mxu1 %v2462_v12  ;;  %4651 = vrcp.f32 %v2423_v48 }
 0xf07   : > { %4305 = vmatprep.subr.bf16.mxu1 %v4791_v2  ;;  %v2463_v10 = vpack.c.bf16 %v2453_v61, %v2452_v9  ;;  %4653 = vrcp.f32 %v2425_v43  ;;  %v4496_v61 = vld [vmem:[%s5992_s15 + $0x18] sm:$0xff]  }
 0xf08   : > { %v770_v1 = vpop.permute.xlu0 %769  ;;  %v765_v53 = vpop.permute.xlu1 %764 }
 0xf09   : > { %v865_v45 = vadd.f32 %v5305_v20, %v770_v1  ;;  %v862_v6 = vadd.f32 %v5303_v23, %v765_v53 }
 0xf0b   : > { %v885_v42 = vmul.f32 %v4983_v13, %v865_v45  ;;  %v884_v56 = vmul.f32 %v4983_v13, %v862_v6  ;;  %v4648_v50 = vpop.eup %4647 }
 0xf0c   : > { %v2455_v62 = vmul.f32 %v4648_v50, %v5521_v58  ;;  %v2523_v24 = vpop.permute.xlu1 %2522  ;;  %v2533_v14 = vpop.permute.xlu0 %2532 }
 0xf0d   : > { %v889_v29 = vpack.c.bf16 %v885_v42, %v884_v56 }
 0xf0e   : > { %4306 = vmatpush3.bf16.xpose.msra.mxu1 %v2463_v10 }
 0xf0f   : > { %v4650_v57 = vpop.eup %4649  ;;  %4307 = vmatprep.subr.bf16.mxu1 %v4791_v2 }
 0xf10   : > { %v2454_v15 = vmul.f32 %v4650_v57, %v5527_v21  ;;  %v4652_v34 = vpop.eup %4651  ;;  %v2528_v39 = vpop.permute.xlu1 %2527 }
 0xf11   : > { %v4654_v23 = vpop.eup %4653  ;;  %v2456_v60 = vmul.f32 %v4652_v34, %v5523_v28  ;;  %v4495_v28 = vld [vmem:[%s5992_s15 + $0x10] sm:$0xff]  }
 0xf12   : > { %v2464_v20 = vpack.c.bf16 %v2455_v62, %v2454_v15  ;;  %v2457_v55 = vmul.f32 %v4654_v23, %v5518_v54  ;;  %v4494_v54 = vld [vmem:[%s5990_s13 + $0x18] sm:$0xff]  }
 0xf14   : > { %v2465_v59 = vpack.c.bf16 %v2457_v55, %v2456_v60  ;;  %v2538_v7 = vpop.permute.xlu1 %2537 }
 0xf16   : > { %4308 = vmatpush3.bf16.xpose.msra.mxu1 %v2464_v20 }
 0xf17   : > { %4309 = vmatprep.subr.bf16.mxu1 %v4791_v2 }
 0xf1e   : > { %4310 = vmatpush3.bf16.xpose.msra.mxu1 %v2465_v59 }
 0xf25   : > { %4312 = vmatmul.mubr.bf16.vlgmr.msra.gmra.mrb[32].mxu1 %v889_v29 }
 0xff8   : > { %v2500_v58 = vpop.f32.mrb[32].mxu1 }
 0xff9   : > { %v4313_v21 = vpop.f32.mrb[33].mxu1  ;;  %v2512_v25 = vmax.f32 %v2500_v58, 0.0  ;;  %v4500_v58 = vld [vmem:[%s5984_s7 + $0x78] sm:$0xff]  }
 0xffa   : > { %v2503_v11 = vpop.f32.mrb[34].mxu1  ;;  %v4501_v21 = vld [vmem:[%s5984_s7 + $0x80] sm:$0xff]  }
 0xffb   : > { %v2513_v18 = vmax.f32 %v2503_v11, 0.0  ;;  %v4314_v37 = vpop.f32.mrb[35].mxu1  ;;  %v4502_v11 = vld [vmem:[%s5984_s7 + $0x88] sm:$0xff]  }
 0xffd   : > { %v2514_v38 = vpack.c.bf16 %v2513_v18, %v2512_v25 }
 0xfff   : > { %4315 = vmatprep.subr.bf16.mxu0 %v2514_v38 }
0x1000   : > { %4316 = vmatpush3.bf16.msra.mxu0 %v2514_v38 }
0x1003   : > { %4318 = vmatmul.mubr.msk.bf16.vlgmr.msra.gmra.mrb[60].mxu0 %vm1281_vm6, %v4494_v54 }
0x1004   : > { %4325 = vmatprep.mubr.msk.bf16.mxu0 %vm809_vm2, %v4495_v28 }
0x10d6   : > { %v4319_v33 = vpop.f32.mrb[60].mxu0 }
0x10d7   : > { %v2599_v41 = vadd.f32 %v4319_v33, %v2533_v14  ;;  %v2590_v3 = vpop.f32.mrb[61].mxu0 }
0x10d8   : > { %v2591_v43 = vadd.f32 %v2590_v3, %v2523_v24  ;;  %v4320_v47 = vpop.f32.mrb[62].mxu0 }
0x10d9   : > { %v2607_v40 = vmul.f32 %v2599_v41, %v4983_v13  ;;  %v2602_v46 = vadd.f32 %v4320_v47, %v2538_v7  ;;  %v2593_v48 = vpop.f32.mrb[63].mxu0 }
0x10da   : > { %v2605_v51 = vmul.f32 %v2591_v43, %v4983_v13  ;;  %v2594_v49 = vadd.f32 %v2593_v48, %v2528_v39 }
0x10db   : > { %v2608_v52 = vmul.f32 %v2602_v46, %v4983_v13  ;;  %v2611_v44 = vadd.f32 %v2607_v40, %v5389_v8  ;;  %v4497_v8 = vld [vmem:[%s5984_s7 + $0x60] sm:$0xff]  }
0x10dc   : > { %v2606_v4 = vmul.f32 %v2594_v49, %v4983_v13  ;;  %v2609_v5 = vadd.f32 %v2605_v51, %v5383_v19  ;;  %v2628_v19 = vpop.permute.xlu0 %2627  ;;  %v3974_v49 = vsel %vm2870_vm11, 1.0, %v4791_v2 }
0x10dd   : > { %v2612_v12 = vadd.f32 %v2608_v52, %v5393_v27 }
0x10de   : > { %v2610_v1 = vadd.f32 %v2606_v4, %v5385_v36  ;;  %v2633_v36 = vpop.permute.xlu1 %2632 }
0x10df   : > { %v2619_v53 = vpack.c.bf16 %v2612_v12, %v2611_v44  ;;  %v3975_v44 = vsel %vm2885_vm12, 1.0, %v4791_v2 }
0x10e0   : > { %v2618_v9 = vpack.c.bf16 %v2610_v1, %v2609_v5  ;;  %v2638_v45 = vpop.permute.xlu0 %2637 }
0x10e2   : > { %4321 = vmatprep.subr.bf16.mxu0 %v2618_v9  ;;  %v2643_v42 = vpop.permute.xlu1 %2642 }
0x10e3   : > { %4322 = vmatpush3.bf16.msra.mxu0 %v2618_v9 }
0x10e4   : > { %4323 = vmatprep.subr.bf16.mxu0 %v2619_v53  ;;  %v2908_v7 = vpop.permute.xlu0 %2907 }
0x10e6   : > { %v2913_v43 = vpop.permute.xlu1 %2912 }
0x10e7   : > { %4324 = vmatpush3.bf16.msra.mxu0 %v2619_v53 }
0x10e8   : > { %v2918_v47 = vpop.permute.xlu0 %2917 }
0x10ea   : > { %4326 = vmatmul.mubr.msk.bf16.vlgmr.msra.gmra.mrb[64].mxu0 %vm809_vm2, %v4496_v61  ;;  %v2923_v40 = vpop.permute.xlu1 %2922 }
0x10eb   : > { %4333 = vmatprep.mubr.msk.bf16.mxu0 %vm809_vm2, %v4497_v8 }
0x11bd   : > { %v4327_v27 = vpop.f32.mrb[64].mxu0 }
0x11be   : > { %v2695_v6 = vpop.f32.mrb[65].mxu0  ;;  %v2704_v56 = vadd.f32 %v4327_v27, %v2638_v45 }
0x11bf   : > { %v2696_v10 = vadd.f32 %v2695_v6, %v2628_v19  ;;  %v4328_v29 = vpop.f32.mrb[66].mxu0 }
0x11c0   : > { %v2707_v50 = vadd.f32 %v4328_v29, %v2643_v42  ;;  %v2698_v57 = vpop.f32.mrb[67].mxu0  ;;  %v2712_v34 = vadd.f32 %v2704_v56, %v5353_v35  ;;  %v4499_v35 = vld [vmem:[%s5984_s7 + $0x70] sm:$0xff]  }
0x11c1   : > { %v2710_v15 = vadd.f32 %v2696_v10, %v5344_v32  ;;  %v2699_v62 = vadd.f32 %v2698_v57, %v2633_v36 }
0x11c2   : > { %v2713_v20 = vadd.f32 %v2707_v50, %v5347_v17  ;;  %v5641_v16 = vmul.f32 %v2712_v34, %v4983_v13 }
0x11c3   : > { %v2711_v23 = vadd.f32 %v2699_v62, %v5350_v63  ;;  %v5632_v60 = vmul.f32 %v2710_v15, %v4983_v13  ;;  %v4498_v63 = vld [vmem:[%s5984_s7 + $0x68] sm:$0xff]  }
0x11c4   : > { %v5635_v55 = vmul.f32 %v2713_v20, %v4983_v13 }
0x11c5   : > { %v5638_v59 = vmul.f32 %v2711_v23, %v4983_v13 }
0x11c6   : > { %v2732_v17 = vpack.c.bf16 %v5635_v55, %v5641_v16 }
0x11c7   : > { %v2731_v32 = vpack.c.bf16 %v5638_v59, %v5632_v60 }
0x11c9   : > { %4329 = vmatprep.subr.bf16.mxu0 %v2731_v32 }
0x11ca   : > { %4330 = vmatpush3.bf16.msra.mxu0 %v2731_v32 }
0x11cb   : > { %4331 = vmatprep.subr.bf16.mxu0 %v2732_v17 }
0x11ce   : > { %4332 = vmatpush3.bf16.msra.mxu0 %v2732_v17 }
0x11d1   : > { %4334 = vmatmul.mubr.msk.bf16.vlgmr.msra.gmra.mrb[68].mxu0 %vm809_vm2, %v4498_v63 }
0x11d2   : > { %4337 = vmatprep.mubr.msk.bf16.mxu0 %vm809_vm2, %v4499_v35 }
0x11d9   : > { %4338 = vmatmul.mubr.msk.bf16.gmra.mrb[72].mxu0 %vm809_vm2, %v4500_v58 }
0x11da   : > { %4341 = vmatprep.mubr.msk.bf16.mxu0 %vm809_vm2, %v4501_v21 }
0x11e1   : > { %4342 = vmatmul.mubr.msk.bf16.gmra.mrb[76].mxu0 %vm809_vm2, %v4502_v11 }
0x12a4   : > { %v4335_v25 = vpop.f32.mrb[68].mxu0 }
0x12a5   : > { %2866 = vrot.lane.b32.xlu0 %v4335_v25, %s4798_s30  ;;  %v2815_v18 = vpop.f32.mrb[69].mxu0 }
0x12a6   : > { %v4336_v37 = vpop.f32.mrb[70].mxu0 }
0x12a7   : > { %2868 = vrot.lane.b32.xlu1 %v4336_v37, %s4798_s30  ;;  %v2818_v38 = vpop.f32.mrb[71].mxu0 }
0x12a9   : > { %2862 = vrot.lane.b32.xlu0 %v2815_v18, %s4798_s30 }
0x12ab   : > { %2864 = vrot.lane.b32.xlu1 %v2818_v38, %s4798_s30 }
0x12ac   : > { %v4339_v54 = vpop.f32.mrb[72].mxu0 }
0x12ad   : > { %v2831_v28 = vpop.f32.mrb[73].mxu0 }
0x12ae   : > { %v4340_v24 = vpop.f32.mrb[74].mxu0 }
0x12af   : > { %v2834_v39 = vpop.f32.mrb[75].mxu0 }
0x12b4   : > { %v4343_v14 = vpop.f32.mrb[76].mxu0 }
0x12b5   : > { %v2847_v33 = vpop.f32.mrb[77].mxu0 }
0x12b6   : > { %2877 = vrot.lane.b32.xlu0 %v2847_v33, %s4799_s25  ;;  %v4344_v41 = vpop.f32.mrb[78].mxu0 }
0x12b7   : > { %v2850_v3 = vpop.f32.mrb[79].mxu0 }
0x12b8   : > { %2879 = vrot.lane.b32.xlu1 %v2850_v3, %s4799_s25 }
0x12ba   : > { %2881 = vrot.lane.b32.xlu0 %v4343_v14, %s4799_s25 }
0x12bc   : > { %2883 = vrot.lane.b32.xlu1 %v4344_v41, %s4799_s25  ;;  %s6019_s25 = sld [smem:[#allocation15_spill]] }
0x12c2   : > { %s5927_s18 = scalar_lea.hbm %s6019_s25, %s4032_s27 }
0x1317   : > { %v2867_v46 = vpop.permute.xlu0 %2866 }
0x1318   : > { %v2875_v1 = vmul.f32 %v3974_v49, %v2867_v46 }
0x1319   : > { %v2869_v48 = vpop.permute.xlu1 %2868 }
0x131a   : > { %v2876_v61 = vmul.f32 %v3974_v49, %v2869_v48  ;;  %v2894_v6 = vadd.f32 %v4339_v54, %v2875_v1  ;;  %v3984_v54 = vld [vmem:[%s5987_s10 + $0x40] sm:$0xff] }
0x131b   : > { %v2863_v51 = vpop.permute.xlu0 %2862 }
0x131c   : > { %v2873_v4 = vmul.f32 %v3974_v49, %v2863_v51  ;;  %v2895_v10 = vadd.f32 %v4340_v24, %v2876_v61  ;;  %v3985_v24 = vld [vmem:[%s5987_s10 + $0x48] sm:$0xff] }
0x131d   : > { %v2865_v52 = vpop.permute.xlu1 %2864 }
0x131e   : > { %v2874_v12 = vmul.f32 %v3974_v49, %v2865_v52  ;;  %v2892_v53 = vadd.f32 %v2873_v4, %v2831_v28  ;;  %v3987_v28 = vld [vmem:[%s5987_s10 + $0x58] sm:$0xff] }
0x1320   : > { %v2893_v19 = vadd.f32 %v2874_v12, %v2834_v39  ;;  %v4503_v39 = vld [vmem:[%s5986_s9 + $0x20] sm:$0xff]  }
0x1321   : > { %4349 = vmatprep.mubr.msk.bf16.mxu1 %vm809_vm2, %v4503_v39 }
0x1328   : > { %v2878_v5 = vpop.permute.xlu0 %2877 }
0x1329   : > { %v2888_v9 = vmul.f32 %v3975_v44, %v2878_v5 }
0x132a   : > { %v2880_v8 = vpop.permute.xlu1 %2879 }
0x132b   : > { %v2896_v36 = vadd.f32 %v2892_v53, %v2888_v9  ;;  %v2889_v27 = vmul.f32 %v3975_v44, %v2880_v8 }
0x132c   : > { %v2882_v45 = vpop.permute.xlu0 %2881 }
0x132d   : > { %v2925_v42 = vadd.f32 %v2908_v7, %v2896_v36  ;;  %v2897_v22 = vadd.f32 %v2893_v19, %v2889_v27  ;;  %v2890_v56 = vmul.f32 %v3975_v44, %v2882_v45 }
0x132e   : > { %v2884_v29 = vpop.permute.xlu1 %2883 }
0x132f   : > { %v5671_v50 = vmax.f32 %v2925_v42, 0.0  ;;  %v2926_v57 = vadd.f32 %v2913_v43, %v2897_v22  ;;  %v2898_v15 = vadd.f32 %v2894_v6, %v2890_v56  ;;  %v2891_v62 = vmul.f32 %v3975_v44, %v2884_v29 }
0x1331   : > { %v5673_v20 = vmax.f32 %v2926_v57, 0.0  ;;  %v2927_v34 = vadd.f32 %v2918_v47, %v2898_v15  ;;  %v2899_v23 = vadd.f32 %v2895_v10, %v2891_v62  ;;  %v2933_v32 = vmul.f32 %v5014_v30, %v5671_v50 }
0x1333   : > { %v5677_v17 = vmax.f32 %v2927_v34, 0.0  ;;  %v2928_v63 = vadd.f32 %v2923_v40, %v2899_v23  ;;  %2937 = vadd.xlane.f32.xlu0 %v2933_v32  ;;  %v2934_v35 = vmul.f32 %v5014_v30, %v5673_v20  ;;  %v2949_v18 = vmul.f32 %v2933_v32, %v5671_v50 }
0x1335   : > { %v5681_v58 = vmax.f32 %v2928_v63, 0.0  ;;  %2939 = vadd.xlane.f32.xlu1 %v2934_v35  ;;  %v2935_v21 = vmul.f32 %v5014_v30, %v5677_v17  ;;  %v2950_v37 = vmul.f32 %v2934_v35, %v5673_v20 }
0x1337   : > { %v2936_v11 = vmul.f32 %v5014_v30, %v5681_v58  ;;  %v2951_v25 = vmul.f32 %v2935_v21, %v5677_v17  ;;  %v3986_v30 = vld [vmem:[%s5987_s10 + $0x50] sm:$0xff] }
0x1339   : > { %2941 = vadd.xlane.f32.xlu1 %v2935_v21  ;;  %2943 = vadd.xlane.f32.xlu0 %v2936_v11  ;;  %v2952_v38 = vmul.f32 %v2936_v11, %v5681_v58 }
0x133d   : > { %2957 = vadd.xlane.f32.xlu1 %v2951_v25  ;;  %2953 = vadd.xlane.f32.xlu0 %v2949_v18 }
0x1341   : > { %2955 = vadd.xlane.f32.xlu0 %v2950_v37 }
0x1345   : > { %2959 = vadd.xlane.f32.xlu0 %v2952_v38 }
0x134e   : > { %3007 = vperm.xlu1 %4465, %v3984_v54   ;;  %v4504_v54 = vld [vmem:[%s5986_s9 + $0x28] sm:$0xff]  }
0x1352   : > { %3017 = vperm.xlu1 %4465, %v3986_v30  }
0x1356   : > { %3022 = vperm.xlu1 %4465, %v3987_v28  }
0x135b   : > { %3012 = vperm.xlu0 %4464, %v3985_v24  }
0x13c0   : > { %v2938_v14 = vpop.xlane.xlu0 %2937 }
0x13c1   : > { %v2945_v41 = vmul.f32 0.015625, %v2938_v14 }
0x13c2   : > { %v2940_v33 = vpop.xlane.xlu1 %2939 }
0x13c3   : > { %v2965_v47 = vmul.f32 %v2945_v41, %v2945_v41  ;;  %v2946_v48 = vmul.f32 0.015625, %v2940_v33  ;;  %v2977_v15 = vsub.f32 %v5671_v50, %v2945_v41 }
0x13c5   : > { %v2966_v5 = vmul.f32 %v2946_v48, %v2946_v48  ;;  %v2978_v62 = vsub.f32 %v5673_v20, %v2946_v48 }
0x13c6   : > { %v2944_v3 = vpop.xlane.xlu0 %2943  ;;  %v2942_v7 = vpop.xlane.xlu1 %2941 }
0x13c7   : > { %v2947_v43 = vmul.f32 0.015625, %v2942_v7  ;;  %v2948_v1 = vmul.f32 0.015625, %v2944_v3 }
0x13c9   : > { %v2967_v51 = vmul.f32 %v2947_v43, %v2947_v43  ;;  %v2968_v27 = vmul.f32 %v2948_v1, %v2948_v1  ;;  %v2980_v35 = vsub.f32 %v5681_v58, %v2948_v1  ;;  %v2979_v21 = vsub.f32 %v5677_v17, %v2947_v43 }
0x13ca   : > { %v2954_v40 = vpop.xlane.xlu0 %2953  ;;  %v2958_v46 = vpop.xlane.xlu1 %2957 }
0x13cb   : > { %v2961_v49 = vmul.f32 0.015625, %v2954_v40  ;;  %v2963_v52 = vmul.f32 0.015625, %v2958_v46 }
0x13cd   : > { %v2969_v4 = vsub.f32 %v2961_v49, %v2965_v47  ;;  %v2971_v44 = vsub.f32 %v2963_v52, %v2967_v51 }
0x13ce   : > { %v2956_v12 = vpop.xlane.xlu0 %2955  ;;  %v3008_v30 = vpop.permute.xlu1 %3007 }
0x13cf   : > { %v2973_v53 = vmax.f32 %v2969_v4, 0.0  ;;  %v2962_v9 = vmul.f32 0.015625, %v2956_v12  ;;  %v2975_v8 = vmax.f32 %v2971_v44, 0.0 }
0x13d1   : > { %v2981_v61 = vadd.f32 1e-05, %v2973_v53  ;;  %v2970_v19 = vsub.f32 %v2962_v9, %v2966_v5  ;;  %v2983_v42 = vadd.f32 1e-05, %v2975_v8 }
0x13d2   : > { %v2960_v36 = vpop.xlane.xlu0 %2959  ;;  %v3018_v28 = vpop.permute.xlu1 %3017 }
0x13d3   : > { %v2974_v45 = vmax.f32 %v2970_v19, 0.0  ;;  %v2964_v6 = vmul.f32 0.015625, %v2960_v36  ;;  %4655 = vrsqrt.f32 %v2981_v61 }
0x13d5   : > { %v2982_v22 = vadd.f32 1e-05, %v2974_v45  ;;  %v2972_v56 = vsub.f32 %v2964_v6, %v2968_v27 }
0x13d6   : > { %v3023_v14 = vpop.permute.xlu1 %3022 }
0x13d7   : > { %4657 = vrsqrt.f32 %v2982_v22  ;;  %v2976_v10 = vmax.f32 %v2972_v56, 0.0 }
0x13d8   : > { %4659 = vrsqrt.f32 %v2983_v42 }
0x13d9   : > { %v2984_v29 = vadd.f32 1e-05, %v2976_v10 }
0x13da   : > { %v3013_v41 = vpop.permute.xlu0 %3012 }
0x13db   : > { %4661 = vrsqrt.f32 %v2984_v29 }
0x13dd   : > { %v4656_v57 = vpop.eup %4655 }
0x13de   : > { %v2989_v23 = vmul.f32 %v4656_v57, %v2977_v15 }
0x13e1   : > { %v4658_v34 = vpop.eup %4657 }
0x13e2   : > { %v2990_v32 = vmul.f32 %v4658_v34, %v2978_v62  ;;  %v4660_v63 = vpop.eup %4659 }
0x13e3   : > { %v2991_v18 = vmul.f32 %v4660_v63, %v2979_v21 }
0x13e4   : > { %v2998_v11 = vpack.c.bf16 %v2990_v32, %v2989_v23 }
0x13e5   : > { %v4662_v25 = vpop.eup %4661 }
0x13e6   : > { %4345 = vmatprep.subr.bf16.mxu1 %v2998_v11  ;;  %v2992_v37 = vmul.f32 %v4662_v25, %v2980_v35 }
0x13e7   : > { %4346 = vmatpush3.bf16.msra.mxu1 %v2998_v11 }
0x13e8   : > { %v2999_v38 = vpack.c.bf16 %v2992_v37, %v2991_v18 }
0x13ea   : > { %4347 = vmatprep.subr.bf16.mxu1 %v2999_v38 }
0x13eb   : > { %4348 = vmatpush3.bf16.msra.mxu1 %v2999_v38 }
0x13ec   : > { %4371 = vmatprep.subr.bf16.mxu1 %v4791_v2 }
0x13ee   : > { %4350 = vmatmul.mubr.msk.bf16.vlgmr.msra.gmra.mrb[36].mxu1 %vm809_vm2, %v4504_v54 }
0x13ef   : > { %4387 = vmatprep.mubr.msk.bf16.mxu1 %vm4795_vm7, %v4791_v2 }
0x14c1   : > { %v4351_v24 = vpop.f32.mrb[36].mxu1 }
0x14c2   : > { %v3075_v39 = vpop.f32.mrb[37].mxu1  ;;  %v3084_v3 = vadd.f32 %v4351_v24, %v3018_v28 }
0x14c3   : > { %v4352_v33 = vpop.f32.mrb[38].mxu1  ;;  %v3076_v47 = vadd.f32 %v3075_v39, %v3008_v30 }
0x14c4   : > { %v3087_v7 = vadd.f32 %v4352_v33, %v3023_v14  ;;  %v3078_v43 = vpop.f32.mrb[39].mxu1 }
0x14c5   : > { %v3079_v40 = vadd.f32 %v3078_v43, %v3013_v41 }
0x14c6   : > { %v3091_v46 = vpack.c.bf16 %v3087_v7, %v3084_v3 }
0x14c7   : > { %v3090_v48 = vpack.c.bf16 %v3079_v40, %v3076_v47 }
0x14c8   : > { %4353 = vmatprep.subr.bf16.mxu0 %v3091_v46 }
0x14c9   : > { %3092 = vxpose.xlu0.c.b16.start.end [1/1] (short) %v3090_v48, 128  ;;  %4354 = vmatpush3.bf16.msra.mxu0 %v3091_v46 }
0x152f   : > { %v3100_v51 = vpop.trf.xlu0 }
0x1530   : > { %4355 = vmatprep.mubr.msk.bf16.mxu0 %vm1281_vm6, %v3100_v51 }
0x1533   : > { %v3101_v49 = vpop.trf.xlu0 }
0x1534   : > { %4356 = vmatmul.mubr.msk.bf16.vlgmr.msra.gmra.mrb[80].mxu0 %vm1281_vm6, %v3101_v49 }
0x1537   : > { %v3102_v52 = vpop.trf.xlu0 }
0x1538   : > { %4359 = vmatprep.mubr.msk.bf16.mxu0 %vm1281_vm6, %v3102_v52 }
0x153b   : > { %v3103_v4 = vpop.trf.xlu0 }
0x153c   : > { %4360 = vmatmul.mubr.msk.bf16.gmra.mrb[84].mxu0 %vm1281_vm6, %v3103_v4 }
0x153f   : > { %v3104_v44 = vpop.trf.xlu0 }
0x1540   : > { %4363 = vmatprep.mubr.msk.bf16.mxu0 %vm1281_vm6, %v3104_v44 }
0x1543   : > { %v3105_v12 = vpop.trf.xlu0 }
0x1544   : > { %4364 = vmatmul.mubr.msk.bf16.gmra.mrb[88].mxu0 %vm1281_vm6, %v3105_v12 }
0x1547   : > { %v3106_v5 = vpop.trf.xlu0 }
0x1548   : > { %4367 = vmatprep.mubr.msk.bf16.mxu0 %vm1281_vm6, %v3106_v5 }
0x154b   : > { %v3107_v1 = vpop.trf.xlu0 }
0x154c   : > { %4368 = vmatmul.mubr.msk.bf16.gmra.mrb[92].mxu0 %vm1281_vm6, %v3107_v1 }
0x1607   : > { %v4357_v53 = vpop.f32.mrb[80].mxu0 }
0x1608   : > { %v3166_v9 = vpop.f32.mrb[81].mxu0  ;;  %v3175_v27 = vadd.f32 %v4357_v53, %v5124_v26 }
0x1609   : > { %v3167_v61 = vadd.f32 %v3166_v9, %v5124_v26  ;;  %v4358_v8 = vpop.f32.mrb[82].mxu0 }
0x160a   : > { %v3169_v19 = vpop.f32.mrb[83].mxu0  ;;  %v3178_v42 = vadd.f32 %v4358_v8, %v5124_v26 }
0x160b   : > { %v3170_v36 = vadd.f32 %v3169_v19, %v5124_v26  ;;  %3229 = vmax.xlane.f32.xlu1 %v3167_v61 }
0x160d   : > { %3231 = vmax.xlane.f32.xlu0 %v3170_v36 }
0x160f   : > { %3233 = vmax.xlane.f32.xlu1 %v3175_v27  ;;  %v4361_v45 = vpop.f32.mrb[84].mxu0 }
0x1610   : > { %v3182_v6 = vpop.f32.mrb[85].mxu0  ;;  %v3191_v32 = vadd.f32 %v4361_v45, %v5124_v26 }
0x1611   : > { %v4362_v22 = vpop.f32.mrb[86].mxu0  ;;  %v3183_v10 = vadd.f32 %v3182_v6, %v5124_v26 }
0x1612   : > { %v3185_v56 = vpop.f32.mrb[87].mxu0  ;;  %v3194_v21 = vadd.f32 %v4362_v22, %v5124_v26 }
0x1613   : > { %3235 = vmax.xlane.f32.xlu1 %v3178_v42  ;;  %v3186_v15 = vadd.f32 %v3185_v56, %v5124_v26 }
0x1617   : > { %v4365_v29 = vpop.f32.mrb[88].mxu0  ;;  %3237 = vmax.xlane.f32.xlu1 %v3183_v10 }
0x1618   : > { %v3198_v57 = vpop.f32.mrb[89].mxu0  ;;  %v5752_v30 = vadd.f32 %v4365_v29, %v5124_v26 }
0x1619   : > { %v4366_v62 = vpop.f32.mrb[90].mxu0  ;;  %v3199_v18 = vadd.f32 %v3198_v57, %v5124_v26 }
0x161a   : > { %v5733_v34 = vadd.f32 %v4366_v62, %v5124_v26  ;;  %v3201_v23 = vpop.f32.mrb[91].mxu0 }
0x161b   : > { %3239 = vmax.xlane.f32.xlu1 %v3186_v15  ;;  %v5747_v54 = vadd.f32 %v3201_v23, %v5124_v26 }
0x161c   : > { %3251 = vmax.xlane.f32.xlu0 %v5733_v34 }
0x161f   : > { %v4369_v63 = vpop.f32.mrb[92].mxu0  ;;  %3241 = vmax.xlane.f32.xlu1 %v3191_v32 }
0x1620   : > { %v3214_v35 = vpop.f32.mrb[93].mxu0  ;;  %v5760_v24 = vadd.f32 %v4369_v63, %v5124_v26 }
0x1621   : > { %v4370_v11 = vpop.f32.mrb[94].mxu0  ;;  %v5755_v28 = vadd.f32 %v3214_v35, %v5124_v26 }
0x1622   : > { %v3217_v25 = vpop.f32.mrb[95].mxu0  ;;  %v5743_v38 = vadd.f32 %v4370_v11, %v5124_v26 }
0x1623   : > { %v5740_v37 = vadd.f32 %v3217_v25, %v5124_v26  ;;  %3243 = vmax.xlane.f32.xlu1 %v3194_v21 }
0x1625   : > { %3255 = vmax.xlane.f32.xlu0 %v5740_v37 }
0x1627   : > { %3245 = vmax.xlane.f32.xlu1 %v3199_v18 }
0x1629   : > { %3259 = vmax.xlane.f32.xlu0 %v5743_v38 }
0x162b   : > { %3247 = vmax.xlane.f32.xlu1 %v5747_v54 }
0x162f   : > { %3249 = vmax.xlane.f32.xlu1 %v5752_v30 }
0x1633   : > { %3253 = vmax.xlane.f32.xlu1 %v5755_v28 }
0x1637   : > { %3257 = vmax.xlane.f32.xlu1 %v5760_v24 }
0x1698   : > { %v3230_v39 = vpop.xlane.xlu1 %3229 }
0x1699   : > { %v3261_v14 = vsub.f32 %v3167_v61, %v3230_v39 }
0x169a   : > { %v3232_v33 = vpop.xlane.xlu0 %3231 }
0x169b   : > { %v3277_v41 = vmul.f32 1.442695, %v3261_v14  ;;  %v3262_v3 = vsub.f32 %v3170_v36, %v3232_v33 }
0x169c   : > { %v3234_v7 = vpop.xlane.xlu1 %3233 }
0x169d   : > { %4663 = vpow2.f32 %v3277_v41  ;;  %v3279_v43 = vmul.f32 1.442695, %v3262_v3  ;;  %v3263_v47 = vsub.f32 %v3175_v27, %v3234_v7 }
0x169f   : > { %4665 = vpow2.f32 %v3279_v43  ;;  %v3281_v40 = vmul.f32 1.442695, %v3263_v47 }
0x16a0   : > { %v3236_v46 = vpop.xlane.xlu1 %3235 }
0x16a1   : > { %4667 = vpow2.f32 %v3281_v40  ;;  %v3264_v48 = vsub.f32 %v3178_v42, %v3236_v46 }
0x16a3   : > { %v3283_v51 = vmul.f32 1.442695, %v3264_v48 }
0x16a4   : > { %v3238_v49 = vpop.xlane.xlu1 %3237 }
0x16a5   : > { %4669 = vpow2.f32 %v3283_v51  ;;  %v3265_v26 = vsub.f32 %v3183_v10, %v3238_v49  ;;  %v750_v49 = vld [vmem:[%s5989_s12 + $0x20] sm:$0xff] }
0x16a7   : > { %v5763_v52 = vpop.eup %4663  ;;  %v3285_v4 = vmul.f32 1.442695, %v3265_v26  ;;  %v751_v26 = vld [vmem:[%s5989_s12 + $0x28] sm:$0xff] }
0x16a8   : > { %3309 = vadd.xlane.f32.xlu1 %v5763_v52  ;;  %v3240_v44 = vpop.xlane.xlu1 %3239 }
0x16a9   : > { %v5766_v12 = vpop.eup %4665  ;;  %4671 = vpow2.f32 %v3285_v4  ;;  %v3266_v5 = vsub.f32 %v3186_v15, %v3240_v44  ;;  %v3252_v36 = vpop.xlane.xlu0 %3251  ;;  %v4004_v4 = vld [vmem:[%s5991_s14 + $0x40] sm:$0xff]  ;;  %v4006_v44 = vld [vmem:[%s5991_s14 + $0x50] sm:$0xff] }
0x16aa   : > { %3311 = vadd.xlane.f32.xlu0 %v5766_v12  ;;  %v3272_v15 = vsub.f32 %v5733_v34, %v3252_v36  ;;  %v3640_v36 = vld [vmem:[%s5983_s6] sm:$0xff] }
0x16ab   : > { %v5769_v1 = vpop.eup %4667  ;;  %v3287_v53 = vmul.f32 1.442695, %v3266_v5  ;;  %v4005_v5 = vld [vmem:[%s5991_s14 + $0x48] sm:$0xff] }
0x16ac   : > { %3313 = vadd.xlane.f32.xlu1 %v5769_v1  ;;  %v3242_v9 = vpop.xlane.xlu1 %3241 }
0x16ad   : > { %4673 = vpow2.f32 %v3287_v53  ;;  %v3267_v61 = vsub.f32 %v3191_v32, %v3242_v9  ;;  %v4016_v53 = vld [vmem:[%s5993_s16 + $0x40] sm:$0xff]  ;;  %v4007_v9 = vld [vmem:[%s5991_s14 + $0x58] sm:$0xff] }
0x16af   : > { %v5772_v8 = vpop.eup %4669  ;;  %v3289_v19 = vmul.f32 1.442695, %v3267_v61  ;;  %v4018_v61 = vld [vmem:[%s5993_s16 + $0x50] sm:$0xff] }
0x16b0   : > { %3315 = vadd.xlane.f32.xlu0 %v5772_v8  ;;  %v3244_v27 = vpop.xlane.xlu1 %3243 }
0x16b1   : > { %4675 = vpow2.f32 %v3289_v19  ;;  %v3268_v45 = vsub.f32 %v3194_v21, %v3244_v27  ;;  %v3299_v21 = vmul.f32 1.442695, %v3272_v15  ;;  %v4017_v19 = vld [vmem:[%s5993_s16 + $0x48] sm:$0xff]  ;;  %v4019_v27 = vld [vmem:[%s5993_s16 + $0x58] sm:$0xff] }
0x16b2   : > { %v3256_v22 = vpop.xlane.xlu0 %3255 }
0x16b3   : > { %v5775_v6 = vpop.eup %4671  ;;  %v3291_v42 = vmul.f32 1.442695, %v3268_v45  ;;  %v3274_v14 = vsub.f32 %v5740_v37, %v3256_v22 }
0x16b4   : > { %3317 = vadd.xlane.f32.xlu1 %v5775_v6  ;;  %v3246_v56 = vpop.xlane.xlu1 %3245 }
0x16b5   : > { %4677 = vpow2.f32 %v3291_v42  ;;  %v3269_v10 = vsub.f32 %v3199_v18, %v3246_v56  ;;  %v3303_v3 = vmul.f32 1.442695, %v3274_v14 }
0x16b6   : > { %v3260_v32 = vpop.xlane.xlu0 %3259 }
0x16b7   : > { %v5778_v29 = vpop.eup %4673  ;;  %v3293_v57 = vmul.f32 1.442695, %v3269_v10  ;;  %v3276_v25 = vsub.f32 %v5743_v38, %v3260_v32 }
0x16b8   : > { %3319 = vadd.xlane.f32.xlu0 %v5778_v29  ;;  %v3248_v62 = vpop.xlane.xlu1 %3247 }
0x16b9   : > { %4679 = vpow2.f32 %v3293_v57  ;;  %v3270_v23 = vsub.f32 %v5747_v54, %v3248_v62  ;;  %v3307_v33 = vmul.f32 1.442695, %v3276_v25 }
0x16bb   : > { %v5783_v63 = vpop.eup %4675  ;;  %v3295_v35 = vmul.f32 1.442695, %v3270_v23 }
0x16bc   : > { %3321 = vadd.xlane.f32.xlu1 %v5783_v63  ;;  %v3250_v11 = vpop.xlane.xlu1 %3249 }
0x16bd   : > { %4681 = vpow2.f32 %v3295_v35  ;;  %v3271_v18 = vsub.f32 %v5752_v30, %v3250_v11 }
0x16be   : > { %4683 = vpow2.f32 %v3299_v21 }
0x16bf   : > { %v5788_v34 = vpop.eup %4677  ;;  %v3297_v39 = vmul.f32 1.442695, %v3271_v18 }
0x16c0   : > { %3323 = vadd.xlane.f32.xlu0 %v5788_v34  ;;  %v3254_v54 = vpop.xlane.xlu1 %3253 }
0x16c1   : > { %4685 = vpow2.f32 %v3297_v39  ;;  %v3273_v30 = vsub.f32 %v5755_v28, %v3254_v54 }
0x16c2   : > { %4687 = vpow2.f32 %v3307_v33 }
0x16c3   : > { %v5792_v41 = vpop.eup %4679  ;;  %4689 = vpow2.f32 %v3303_v3  ;;  %v3301_v37 = vmul.f32 1.442695, %v3273_v30 }
0x16c4   : > { %3325 = vadd.xlane.f32.xlu1 %v5792_v41  ;;  %v3258_v38 = vpop.xlane.xlu1 %3257 }
0x16c5   : > { %v3275_v7 = vsub.f32 %v5760_v24, %v3258_v38 }
0x16c7   : > { %v5797_v43 = vpop.eup %4681  ;;  %v3305_v47 = vmul.f32 1.442695, %v3275_v7 }
0x16c8   : > { %3327 = vadd.xlane.f32.xlu0 %v5797_v43  ;;  %v5800_v40 = vpop.eup %4683 }
0x16c9   : > { %4691 = vpow2.f32 %v3305_v47 }
0x16ca   : > { %4693 = vpow2.f32 %v3301_v37 }
0x16cb   : > { %v5802_v46 = vpop.eup %4685 }
0x16cc   : > { %3331 = vadd.xlane.f32.xlu0 %v5800_v40  ;;  %3329 = vadd.xlane.f32.xlu1 %v5802_v46  ;;  %v5806_v28 = vpop.eup %4687 }
0x16cd   : > { %v5809_v24 = vpop.eup %4689 }
0x16d0   : > { %3339 = vadd.xlane.f32.xlu0 %v5806_v28 }
0x16d3   : > { %v5811_v48 = vpop.eup %4691 }
0x16d4   : > { %3335 = vadd.xlane.f32.xlu0 %v5809_v24  ;;  %3337 = vadd.xlane.f32.xlu1 %v5811_v48  ;;  %v5815_v51 = vpop.eup %4693 }
0x16d8   : > { %3333 = vadd.xlane.f32.xlu1 %v5815_v51 }
0x16e9   : > { %774 = vperm.xlu1 %4465, %v750_v49  }
0x16ea   : > { %779 = vperm.xlu0 %4464, %v751_v26  }
0x16ed   : > { %3437 = vperm.xlu1 %4465, %v4004_v4  }
0x16ee   : > { %3447 = vperm.xlu0 %4464, %v4006_v44  }
0x16f1   : > { %3442 = vperm.xlu1 %4465, %v4005_v5  }
0x16f2   : > { %3542 = vperm.xlu0 %4464, %v4016_v53  }
0x16f5   : > { %3452 = vperm.xlu1 %4465, %v4007_v9  }
0x16f6   : > { %3552 = vperm.xlu0 %4464, %v4018_v61  }
0x16f9   : > { %3547 = vperm.xlu1 %4465, %v4017_v19  }
0x16fa   : > { %3643 = vperm.xlu0 %4464, %v3640_v36  }
0x16fd   : > { %3557 = vperm.xlu1 %4465, %v4019_v27  }
0x1735   : > { %v3310_v45 = vpop.xlane.xlu1 %3309 }
0x1736   : > { %4695 = vrcp.f32 %v3310_v45 }
0x1737   : > { %v3312_v42 = vpop.xlane.xlu0 %3311 }
0x1738   : > { %4697 = vrcp.f32 %v3312_v42 }
0x1739   : > { %v3314_v22 = vpop.xlane.xlu1 %3313 }
0x173a   : > { %4699 = vrcp.f32 %v3314_v22 }
0x173d   : > { %v3316_v56 = vpop.xlane.xlu0 %3315 }
0x173e   : > { %4701 = vrcp.f32 %v3316_v56 }
0x1740   : > { %v4696_v10 = vpop.eup %4695 }
0x1741   : > { %v3318_v15 = vpop.xlane.xlu1 %3317  ;;  %v3357_v62 = vmul.f32 %v4696_v10, %v5763_v52 }
0x1742   : > { %v4698_v57 = vpop.eup %4697  ;;  %4703 = vrcp.f32 %v3318_v15 }
0x1743   : > { %v3358_v23 = vmul.f32 %v4698_v57, %v5766_v12 }
0x1744   : > { %v4700_v21 = vpop.eup %4699 }
0x1745   : > { %v3320_v32 = vpop.xlane.xlu0 %3319  ;;  %v3373_v35 = vpack.c.bf16 %v3358_v23, %v3357_v62  ;;  %v3359_v39 = vmul.f32 %v4700_v21, %v5769_v1 }
0x1746   : > { %4705 = vrcp.f32 %v3320_v32 }
0x1747   : > { %4372 = vmatpush3.bf16.xpose.msra.mxu1 %v3373_v35 }
0x1748   : > { %v4702_v11 = vpop.eup %4701  ;;  %4373 = vmatprep.subr.bf16.mxu1 %v4791_v2 }
0x1749   : > { %v3360_v25 = vmul.f32 %v4702_v11, %v5772_v8  ;;  %v3322_v18 = vpop.xlane.xlu1 %3321 }
0x174a   : > { %4707 = vrcp.f32 %v3322_v18 }
0x174b   : > { %v3374_v54 = vpack.c.bf16 %v3360_v25, %v3359_v39  ;;  %v4505_v25 = vld [vmem:[%s5990_s13 + $0x20] sm:$0xff]  }
0x174c   : > { %v4704_v52 = vpop.eup %4703  ;;  %4393 = vmatprep.mubr.msk.bf16.mxu0 %vm1281_vm6, %v4505_v25 }
0x174d   : > { %v3324_v14 = vpop.xlane.xlu0 %3323  ;;  %v3361_v38 = vmul.f32 %v4704_v52, %v5775_v6 }
0x174e   : > { %4709 = vrcp.f32 %v3324_v14 }
0x174f   : > { %4374 = vmatpush3.bf16.xpose.msra.mxu1 %v3374_v54 }
0x1750   : > { %v4706_v12 = vpop.eup %4705  ;;  %4375 = vmatprep.subr.bf16.mxu1 %v4791_v2 }
0x1751   : > { %v3362_v33 = vmul.f32 %v4706_v12, %v5778_v29  ;;  %v3326_v3 = vpop.xlane.xlu1 %3325 }
0x1752   : > { %4711 = vrcp.f32 %v3326_v3 }
0x1753   : > { %v3375_v8 = vpack.c.bf16 %v3362_v33, %v3361_v38 }
0x1754   : > { %v4708_v7 = vpop.eup %4707 }
0x1755   : > { %v3328_v30 = vpop.xlane.xlu0 %3327  ;;  %v3363_v26 = vmul.f32 %v4708_v7, %v5783_v63 }
0x1756   : > { %4713 = vrcp.f32 %v3328_v30 }
0x1757   : > { %4376 = vmatpush3.bf16.xpose.msra.mxu1 %v3375_v8 }
0x1758   : > { %v4710_v1 = vpop.eup %4709  ;;  %4377 = vmatprep.subr.bf16.mxu1 %v4791_v2 }
0x1759   : > { %v3332_v47 = vpop.xlane.xlu0 %3331  ;;  %v3330_v37 = vpop.xlane.xlu1 %3329  ;;  %v3364_v49 = vmul.f32 %v4710_v1, %v5788_v34 }
0x175a   : > { %4715 = vrcp.f32 %v3332_v47 }
0x175b   : > { %4717 = vrcp.f32 %v3330_v37  ;;  %v3376_v4 = vpack.c.bf16 %v3364_v49, %v3363_v26 }
0x175c   : > { %v4712_v6 = vpop.eup %4711 }
0x175d   : > { %v3340_v29 = vpop.xlane.xlu0 %3339  ;;  %v3365_v61 = vmul.f32 %v4712_v6, %v5792_v41 }
0x175f   : > { %4378 = vmatpush3.bf16.xpose.msra.mxu1 %v3376_v4 }
0x1760   : > { %v4714_v44 = vpop.eup %4713  ;;  %4379 = vmatprep.subr.bf16.mxu1 %v4791_v2 }
0x1761   : > { %v3338_v5 = vpop.xlane.xlu1 %3337  ;;  %v3366_v53 = vmul.f32 %v4714_v44, %v5797_v43  ;;  %v3336_v9 = vpop.xlane.xlu0 %3335 }
0x1762   : > { %4719 = vrcp.f32 %v3336_v9 }
0x1763   : > { %v3377_v36 = vpack.c.bf16 %v3366_v53, %v3365_v61 }
0x1764   : > { %v4716_v19 = vpop.eup %4715 }
0x1765   : > { %v3334_v34 = vpop.xlane.xlu1 %3333  ;;  %v4718_v27 = vpop.eup %4717  ;;  %v3368_v22 = vmul.f32 %v4716_v19, %v5800_v40 }
0x1766   : > { %4721 = vrcp.f32 %v3334_v34  ;;  %v3367_v42 = vmul.f32 %v4718_v27, %v5802_v46 }
0x1767   : > { %4380 = vmatpush3.bf16.xpose.msra.mxu1 %v3377_v36  ;;  %4723 = vrcp.f32 %v3338_v5  ;;  %v4508_v36 = vld [vmem:[%s5992_s15 + $0x28] sm:$0xff]  }
0x1768   : > { %4381 = vmatprep.subr.bf16.mxu1 %v4791_v2  ;;  %v3378_v57 = vpack.c.bf16 %v3368_v22, %v3367_v42  ;;  %4725 = vrcp.f32 %v3340_v29 }
0x1769   : > { %v780_v63 = vpop.permute.xlu0 %779  ;;  %v775_v45 = vpop.permute.xlu1 %774 }
0x176a   : > { %v873_v43 = vadd.f32 %v5309_v31, %v780_v63  ;;  %v870_v56 = vadd.f32 %v5307_v0, %v775_v45 }
0x176c   : > { %v887_v41 = vmul.f32 %v4983_v13, %v873_v43  ;;  %v886_v10 = vmul.f32 %v4983_v13, %v870_v56  ;;  %v4720_v62 = vpop.eup %4719 }
0x176d   : > { %v3370_v40 = vmul.f32 %v4720_v62, %v5809_v24  ;;  %v3438_v12 = vpop.permute.xlu1 %3437  ;;  %v3448_v3 = vpop.permute.xlu0 %3447 }
0x176e   : > { %v890_v15 = vpack.c.bf16 %v887_v41, %v886_v10 }
0x176f   : > { %4382 = vmatpush3.bf16.xpose.msra.mxu1 %v3378_v57 }
0x1770   : > { %v4722_v23 = vpop.eup %4721  ;;  %4383 = vmatprep.subr.bf16.mxu1 %v4791_v2 }
0x1771   : > { %v3369_v46 = vmul.f32 %v4722_v23, %v5815_v51  ;;  %v4724_v32 = vpop.eup %4723  ;;  %v3443_v33 = vpop.permute.xlu1 %3442 }
0x1772   : > { %v4726_v0 = vpop.eup %4725  ;;  %v3371_v35 = vmul.f32 %v4724_v32, %v5811_v48  ;;  %v4507_v48 = vld [vmem:[%s5992_s15 + $0x20] sm:$0xff]  }
0x1773   : > { %v3379_v31 = vpack.c.bf16 %v3370_v40, %v3369_v46  ;;  %v3372_v21 = vmul.f32 %v4726_v0, %v5806_v28  ;;  %v4506_v28 = vld [vmem:[%s5990_s13 + $0x28] sm:$0xff]  }
0x1775   : > { %v3380_v11 = vpack.c.bf16 %v3372_v21, %v3371_v35  ;;  %v3453_v7 = vpop.permute.xlu1 %3452 }
0x1777   : > { %4384 = vmatpush3.bf16.xpose.msra.mxu1 %v3379_v31 }
0x1778   : > { %4385 = vmatprep.subr.bf16.mxu1 %v4791_v2 }
0x177f   : > { %4386 = vmatpush3.bf16.xpose.msra.mxu1 %v3380_v11 }
0x1786   : > { %4388 = vmatmul.mubr.bf16.vlgmr.msra.gmra.mrb[40].mxu1 %v890_v15 }
0x1859   : > { %v3415_v24 = vpop.f32.mrb[40].mxu1 }
0x185a   : > { %v4389_v51 = vpop.f32.mrb[41].mxu1  ;;  %v3427_v39 = vmax.f32 %v3415_v24, 0.0 }
0x185b   : > { %v3418_v18 = vpop.f32.mrb[42].mxu1 }
0x185c   : > { %v3428_v14 = vmax.f32 %v3418_v18, 0.0  ;;  %v4390_v54 = vpop.f32.mrb[43].mxu1 }
0x185e   : > { %v3429_v52 = vpack.c.bf16 %v3428_v14, %v3427_v39 }
0x1860   : > { %4391 = vmatprep.subr.bf16.mxu0 %v3429_v52 }
0x1861   : > { %4392 = vmatpush3.bf16.msra.mxu0 %v3429_v52 }
0x1864   : > { %4394 = vmatmul.mubr.msk.bf16.vlgmr.msra.gmra.mrb[96].mxu0 %vm1281_vm6, %v4506_v28 }
0x1865   : > { %4401 = vmatprep.mubr.msk.bf16.mxu0 %vm809_vm2, %v4507_v48 }
0x1937   : > { %v4395_v38 = vpop.f32.mrb[96].mxu0 }
0x1938   : > { %v3514_v30 = vadd.f32 %v4395_v38, %v3448_v3  ;;  %v3505_v8 = vpop.f32.mrb[97].mxu0 }
0x1939   : > { %v3506_v1 = vadd.f32 %v3505_v8, %v3438_v12  ;;  %v4396_v47 = vpop.f32.mrb[98].mxu0 }
0x193a   : > { %v3522_v37 = vmul.f32 %v3514_v30, %v4983_v13  ;;  %v3517_v49 = vadd.f32 %v4396_v47, %v3453_v7  ;;  %v3508_v26 = vpop.f32.mrb[99].mxu0 }
0x193b   : > { %v3520_v29 = vmul.f32 %v3506_v1, %v4983_v13  ;;  %v3509_v4 = vadd.f32 %v3508_v26, %v3443_v33 }
0x193c   : > { %v3523_v6 = vmul.f32 %v3517_v49, %v4983_v13  ;;  %v3526_v5 = vadd.f32 %v3522_v37, %v5677_v17 }
0x193d   : > { %v3521_v44 = vmul.f32 %v3509_v4, %v4983_v13  ;;  %v3524_v9 = vadd.f32 %v3520_v29, %v5671_v50  ;;  %v3543_v50 = vpop.permute.xlu0 %3542 }
0x193e   : > { %v3527_v53 = vadd.f32 %v3523_v6, %v5681_v58 }
0x193f   : > { %v3525_v61 = vadd.f32 %v3521_v44, %v5673_v20  ;;  %v3548_v20 = vpop.permute.xlu1 %3547 }
0x1940   : > { %v3534_v19 = vpack.c.bf16 %v3527_v53, %v3526_v5 }
0x1941   : > { %v3533_v34 = vpack.c.bf16 %v3525_v61, %v3524_v9  ;;  %v3553_v17 = vpop.permute.xlu0 %3552 }
0x1943   : > { %4397 = vmatprep.subr.bf16.mxu0 %v3533_v34  ;;  %v3558_v45 = vpop.permute.xlu1 %3557 }
0x1944   : > { %4398 = vmatpush3.bf16.msra.mxu0 %v3533_v34 }
0x1945   : > { %4399 = vmatprep.subr.bf16.mxu0 %v3534_v19 }
0x1948   : > { %4400 = vmatpush3.bf16.msra.mxu0 %v3534_v19 }
0x1949   : > { %4405 = vmatprep.subr.bf16.mxu0 %v4791_v2 }
0x194b   : > { %4402 = vmatmul.mubr.msk.bf16.vlgmr.msra.gmra.mrb[100].mxu0 %vm809_vm2, %v4508_v36 }
0x194c   : > { %4409 = vmatprep.mubr.msk.bf16.mxu0 %vm4795_vm7, %v4791_v2 }
0x1a1e   : > { %v4403_v58 = vpop.f32.mrb[100].mxu0 }
0x1a1f   : > { %v3619_v27 = vadd.f32 %v4403_v58, %v3553_v17  ;;  %v3610_v63 = vpop.f32.mrb[101].mxu0 }
0x1a20   : > { %v3611_v42 = vadd.f32 %v3610_v63, %v3543_v50  ;;  %v4404_v22 = vpop.f32.mrb[102].mxu0 }
0x1a21   : > { %v3627_v43 = vadd.f32 %v3619_v27, %v5641_v16  ;;  %v3622_v56 = vadd.f32 %v4404_v22, %v3558_v45  ;;  %v3613_v41 = vpop.f32.mrb[103].mxu0 }
0x1a22   : > { %v3625_v10 = vadd.f32 %v3611_v42, %v5632_v60  ;;  %v3614_v57 = vadd.f32 %v3613_v41, %v3548_v20 }
0x1a23   : > { %v3631_v15 = vmul.f32 %v3627_v43, %v4983_v13  ;;  %v3628_v62 = vadd.f32 %v3622_v56, %v5635_v55  ;;  %v3637_v55 = vld [vmem:[%s5982_s5] sm:$0xf] }
0x1a24   : > { %v3629_v23 = vmul.f32 %v3625_v10, %v4983_v13  ;;  %v3626_v46 = vadd.f32 %v3614_v57, %v5638_v59 }
0x1a25   : > { %3635 = vst [vmem:[%s601_s19 + $0x10] sm:$0xff] %v3631_v15  ;;  %v3632_v40 = vmul.f32 %v3628_v62, %v4983_v13 }
0x1a26   : > { %3633 = vst [vmem:[%s601_s19] sm:$0xff] %v3629_v23  ;;  %v3630_v16 = vmul.f32 %v3626_v46, %v4983_v13 }
0x1a27   : > { %3636 = vst [vmem:[%s601_s19 + $0x18] sm:$0xff] %v3632_v40  ;;  %v3639_v60 = vpack.c.bf16 %v3632_v40, %v3631_v15 }
0x1a28   : > { %3634 = vst [vmem:[%s601_s19 + $0x8] sm:$0xff] %v3630_v16  ;;  %v3638_v31 = vpack.c.bf16 %v3630_v16, %v3629_v23  ;;  %s4731_s19 = sshll.u32 %s4800_s23, 4  ;;  %s4732_s19 = int_to_ptr.vmem [resolvable:$false] %s4731_s19 }
0x1a29   : > { %s4733_s21 = scalar_lea.vmem %s4732_s19, 1024  ;;  %p4734_p0 = scmp.lt.s32.totalorder %s5921_s17, %s4732_s19 }
0x1a2a   : > { %4406 = vmatpush3.bf16.msra.mxu0 %v3638_v31  ;;  %p4735_p1 = scmp.lt.s32.totalorder %s4733_s21, %s4727_s1 }
0x1a2b   : > { %4407 = vmatprep.subr.bf16.mxu0 %v4791_v2 }
0x1a2c   : > { %p4736_p2 = por %p4735_p1, %p4734_p0 }
0x1a2e   : > { %4408 = vmatpush3.bf16.msra.mxu0 %v3639_v60  ;;  %p4737_p3 = pnand %p4736_p2, %p4730_p13 }
0x1a31   : > { %4410 = vmatmul.mubr.msk.bf16.vlgmr.msra.gmra.mrb[104].mxu0 %vm809_vm2, %v3637_v55 }
0x1a32   : > { %4740 = shalt.err (!%p4737_p3)
}
0x1a33   : > { %s4741_s0 = scalar_lea.hbm %s5927_s18, 512  ;;  %s4745_s27 = scalar_lea.hbm %s6019_s25, 1024 }
0x1a34   : > { %p4742_p4 = scmp.ne.s32.totalorder %s5927_s18, %s4741_s0  ;;  %p4746_p9 = scmp.lt.u32.totalorder %s5927_s18, %s6019_s25 }
0x1a35   : > { %p4747_p10 = scmp.lt.u32.totalorder %s4745_s27, %s4741_s0  ;;  %p4749_p12 = scmp.lt.u32.totalorder %s4741_s0, %s5927_s18 }
0x1a36   : > { %p4743_p7 = pnand %p4742_p4, %p4936_p5 }
0x1a37   : > { %p4748_p11 = por %p4747_p10, %p4746_p9 }
0x1a38   : > { %p4744_p8 = pneg %p4743_p7 }
0x1a39   : > { %p4750_p13 = por %p4749_p12, %p4748_p11 }
0x1a3b   : > { %p4751_p0 = pnand %p4750_p13, %p4744_p8 }
0x1a3d   : > { %4754 = shalt.err (!%p4751_p0)
}
0x1a3e   : > { %s4801_s1 = smov 128   ;;  %s4802_s23 = smov 8   ;;  %v3644_v2 = vpop.permute.xlu0 %3643 }
0x1a3f   : > { %4414 = dma.vmem_to_hbm [thread:$0]  (%p4936_p5), %s5921_s17, 512, %s5927_s18, %s5931_s20, %s4801_s1, %s4801_s1, %s4802_s23  }
0x1a40   : > { %s3828_s19 = sshll.u32 %s4952_s26, 3  ;;  %s6020_s0 = sld [smem:[#allocation14_spill]] }
0x1a46   : > { %s618_s24 = scalar_lea.vmem %s6020_s0, %s3828_s19 }
0x1b04   : > { %v3683_v59 = vpop.f32.mrb[104].mxu0 }
0x1b05   : > { %v3684_v32 = vadd.f32 %v3683_v59, %v3644_v2  ;;  %v4411_v0 = vpop.f32.mrb[105].mxu0 }
0x1b06   : > { %v3686_v35 = vpop.f32.mrb[106].mxu0 }
0x1b07   : > { %v3689_v21 = vmul.f32 %v3684_v32, %v4983_v13  ;;  %v4412_v11 = vpop.f32.mrb[107].mxu0 }
0x1b09   : > { %3690 = vst [vmem:[%s618_s24] sm:$0xff] %v3689_v21 }
0x1b0a PF: > { %s6021_s27 = sld [smem:[#allocation7_spill]]  ;;  %s6022_s29 = sld [smem:[#allocation5_spill]] }
0x1b10   : > { %p4420_p1 = scmp.ge.s32.totalorder %s6021_s27, 2  ;;  %s3734_s2 = sand.u32 1, %s6022_s29  }
0x1b11   : > { %s3735_s26 = scalar_lea.sflag [#allocation3], %s3734_s2 }
0x1b12   : > { %p4417_p5 = pnand %p4420_p1, %p4940_p6 }
0x1b14   : > { %4772 = dma.done.wait (!%p4417_p5), %s3735_s26, 512  }
0x1b15   : > { %4774 = vsyncadd (!%p4417_p5), %s3735_s26, 4294966784  ;;  %s6024_s30 = sld [smem:[#allocation8_spill]]  ;;  %s6025_s17 = sld [smem:[#allocation6_spill]] }
0x1b16   : > { %s6026_s29 = sld [smem:[#allocation9_spill]]  ;;  %s6027_s27 = smov %s4781_s28 }
0x1b1b   : > { %p29_p2 = scmp.ge.s32.totalorder %s6024_s30, 4   ;;  %s6028_s28 = smov %s6025_s17 }
0x1b1d   :  { %31 = sbr.rel (!%p29_p2) target bundleno = 9 (0x9), region = 157 }
0x1b24   :  { %3740 = vsyncpa [#allocation3], 1 }
0x1b25   :  { %3742 = vsyncpa [#allocation3 + $0x1], 1 }

</bundles_post_ra>
